<compile_context>
chip_gen: v7x
topology: tpu7x:2x2x1
jax: 0.10.0
libtpu: 0.0.40
codegen_flags: <defaults>
</compile_context>

<pallas_src>
import functools
import math

import jax
import jax.numpy as jnp
from jax.experimental import pallas as pl
from jax.experimental.pallas import tpu as pltpu

BN_EPS = 1e-5                                # nn.BatchNorm1d default eps
LN_EPS = 1e-5                                # nn.LayerNorm default eps
BN_SCALE = 1.0 / math.sqrt(1.0 + BN_EPS)     # eval-mode BN with init running stats


# ----------------------------------------------------------------------------
# helpers (value-level; usable both inside the kernel and in plain JAX)
# ----------------------------------------------------------------------------
def _gelu_tanh(x):
    c = math.sqrt(2.0 / math.pi)
    return 0.5 * x * (1.0 + jnp.tanh(c * (x + 0.044715 * x * x * x)))


def _layernorm(x, w, b):
    mu = jnp.mean(x, axis=-1, keepdims=True)
    xc = x - mu
    var = jnp.mean(xc * xc, axis=-1, keepdims=True)
    return xc * jax.lax.rsqrt(var + LN_EPS) * w + b


# ----------------------------------------------------------------------------
# the single fused kernel: one grid step == one full DASS_encoder (+ head half)
# ----------------------------------------------------------------------------
def _dass_encoder_kernel(x_ref, ckeep_ref, posadd_ref, kbias_ref, keep_ref,
                         conv_w_ref, conv_b_ref,
                         w_in_ref, b_in_ref, w_out_ref, b_out_ref,
                         ln1_w_ref, ln1_b_ref,
                         w_ff1_ref, b_ff1_ref, w_ff2_ref, b_ff2_ref,
                         ln2_w_ref, ln2_b_ref,
                         pred_w_ref,
                         cls_ref, pred_ref,
                         *, B, S_pad, H, Dh, n_layer, scale):
    D = H * Dh
    N = B * S_pad

    # ---- conv_block (Conv1d k=1 + BN(eval) + GELU) on all token rows -------
    conv = jnp.dot(x_ref[...].astype(jnp.bfloat16), conv_w_ref[...],
                   preferred_element_type=jnp.float32)
    conv = _gelu_tanh((conv + conv_b_ref[...]) * BN_SCALE)            # (N, D)

    # ---- token assembly: zero the conv output at cls/pad rows and add the
    #      precomputed (first_token / channel_emb / seq_emb) constant ---------
    x = conv * ckeep_ref[...] + posadd_ref[...]                       # (N, D) f32

    kbias = kbias_ref[...]                                            # (B,1,S_pad)

    # ---- transformer layers (post-LN TransformerEncoderLayer, eval) --------
    for l in range(n_layer):
        x_bf = x.astype(jnp.bfloat16)

        # fused QKV projection (single 2-D matmul, single bf16 cast)
        qkv = jnp.dot(x_bf, w_in_ref[l],
                      preferred_element_type=jnp.float32) + b_in_ref[l]   # (N,3D)
        qkv3 = qkv.reshape(B, S_pad, 3 * D).astype(jnp.bfloat16)

        # multi-head attention: batched einsums over B, static loop over heads
        head_outs = []
        for h in range(H):
            q = qkv3[:, :, h * Dh:(h + 1) * Dh]                       # (B,S,Dh)
            k = qkv3[:, :, D + h * Dh:D + (h + 1) * Dh]
            v = qkv3[:, :, 2 * D + h * Dh:2 * D + (h + 1) * Dh]
            s = jnp.einsum('bqd,bkd->bqk', q, k,
                           preferred_element_type=jnp.float32) * scale + kbias
            m = jnp.max(s, axis=-1, keepdims=True)
            e = jnp.exp(s - m)
            p = e * pl.reciprocal(jnp.sum(e, axis=-1, keepdims=True),
                                  approx=False)
            head_outs.append(
                jnp.einsum('bqk,bkd->bqd', p.astype(jnp.bfloat16), v,
                           preferred_element_type=jnp.float32))
        attn = jnp.concatenate(head_outs, axis=-1).reshape(N, D)      # (N, D) f32

        # out projection + residual + LN1
        proj = jnp.dot(attn.astype(jnp.bfloat16), w_out_ref[l],
                       preferred_element_type=jnp.float32) + b_out_ref[l]
        x1 = _layernorm(x + proj, ln1_w_ref[l], ln1_b_ref[l])

        # FFN (GELU) + residual + LN2
        h1 = _gelu_tanh(jnp.dot(x1.astype(jnp.bfloat16), w_ff1_ref[l],
                                preferred_element_type=jnp.float32) + b_ff1_ref[l])
        h2 = jnp.dot(h1.astype(jnp.bfloat16), w_ff2_ref[l],
                     preferred_element_type=jnp.float32) + b_ff2_ref[l]
        x = _layernorm(x1 + h2, ln2_w_ref[l], ln2_b_ref[l])

    # ---- cls extraction, (1 - M) masking, this encoder's half of the head --
    cls = x.reshape(B, S_pad, D)[:, 0, :] * keep_ref[...]             # (B, D)
    cls_ref[...] = cls
    pred_ref[...] = jnp.dot(cls.astype(jnp.bfloat16), pred_w_ref[...],
                            preferred_element_type=jnp.float32)       # (B, n_class)


# ----------------------------------------------------------------------------
# pallas_call wrapper
# ----------------------------------------------------------------------------
def _dass_encoders_call(x_tok, conv_keep, pos_add, kbias, keep_cls, p,
                        *, B, S_pad, heads):
    E, N, D = pos_add.shape
    C = x_tok.shape[-1]
    n_layer = p["w_in"].shape[1]
    FF = p["w_ff1"].shape[-1]
    n_class = p["pred_w"].shape[-1]
    H = heads
    Dh = D // H

    kernel = functools.partial(_dass_encoder_kernel, B=B, S_pad=S_pad, H=H,
                               Dh=Dh, n_layer=n_layer,
                               scale=1.0 / math.sqrt(Dh))

    def shared(*shape):                       # same block for both encoders
        nd = len(shape)
        return pl.BlockSpec(shape, lambda e, _n=nd: (0,) * _n)

    def per_e(*shape):                        # per-encoder block (leading E axis)
        nd = len(shape)
        return pl.BlockSpec((None,) + shape, lambda e, _n=nd: (e,) + (0,) * _n)

    return pl.pallas_call(
        kernel,
        out_shape=(jax.ShapeDtypeStruct((E, B, D), jnp.float32),
                   jax.ShapeDtypeStruct((E, B, n_class), jnp.float32)),
        grid=(E,),
        in_specs=[
            shared(N, C),                     # x_tok (zeros at cls/pad rows)
            shared(N, 1),                     # conv_keep (1 on real token rows)
            per_e(N, D),                      # pos_add (cls/channel/seq emb)
            shared(B, 1, S_pad),              # additive key-padding bias
            shared(B, 1),                     # keep_cls = 1 - M[:, 0]
            per_e(C, D), per_e(1, D),         # conv_w, conv_b
            per_e(n_layer, D, 3 * D), per_e(n_layer, 1, 3 * D),   # w_in, b_in
            per_e(n_layer, D, D), per_e(n_layer, 1, D),           # w_out, b_out
            per_e(n_layer, 1, D), per_e(n_layer, 1, D),           # ln1_w, ln1_b
            per_e(n_layer, D, FF), per_e(n_layer, 1, FF),         # w_ff1, b_ff1
            per_e(n_layer, FF, D), per_e(n_layer, 1, D),          # w_ff2, b_ff2
            per_e(n_layer, 1, D), per_e(n_layer, 1, D),           # ln2_w, ln2_b
            per_e(D, n_class),                # this encoder's predict-head half
        ],
        out_specs=(per_e(B, D), per_e(B, n_class)),
        compiler_params=pltpu.CompilerParams(
            dimension_semantics=("parallel",)),   # 2 encoders -> 2 TCs on v7x
    )(x_tok, conv_keep, pos_add, kbias, keep_cls,
      p["conv_w"], p["conv_b"],
      p["w_in"], p["b_in"], p["w_out"], p["b_out"],
      p["ln1_w"], p["ln1_b"],
      p["w_ff1"], p["b_ff1"], p["w_ff2"], p["b_ff2"],
      p["ln2_w"], p["ln2_b"],
      p["pred_w"])


# ----------------------------------------------------------------------------
# Model forward (thin glue: input slab / mask / param-derived constants only)
# ----------------------------------------------------------------------------
def dass_forward(params, X, S, M, heads):
    """DASS eval-mode forward -> (sub_emb, gen_emb, emotion_predict)."""
    del S  # subject labels only feed training-mode contrastive losses
    B, C, L = X.shape
    S_tok = L + 1
    S_pad = ((S_tok + 7) // 8) * 8            # sublane-align the token axis
    E, _, D = params["conv_w"].shape
    N = B * S_pad
    assert D % heads == 0

    # input token slab (B*S_pad, C): row 0 per batch = cls slot, rows 1..L =
    # channel vectors, rows > L = padding; cls/pad rows are zero.
    x_t = jnp.transpose(X, (0, 2, 1)).astype(jnp.float32)             # (B, L, C)
    x_t = jnp.pad(x_t, ((0, 0), (1, S_pad - S_tok), (0, 0)))
    x_tok = x_t.reshape(N, C)

    pos = jnp.arange(S_pad)
    keep_1d = ((pos >= 1) & (pos < S_tok)).astype(jnp.float32)        # (S_pad,)
    conv_keep = jnp.tile(keep_1d, B).reshape(N, 1)

    # key-padding mask extended over the padded positions (1 = padded key)
    Mf = M.astype(jnp.float32)                                        # (B, S_tok)
    mask_ext = jnp.pad(Mf, ((0, 0), (0, S_pad - S_tok)), constant_values=1.0)
    kbias = (mask_ext * (-1e30)).reshape(B, 1, S_pad)
    keep_cls = 1.0 - Mf[:, 0:1]                                       # (B, 1)

    # additive token-assembly constant (param-derived):
    #   pos 0      -> first_token + seq_emb[0]
    #   pos 1..L   -> channel_emb + seq_emb[pos]
    #   pos > L    -> 0 (masked padding rows)
    seq = jnp.pad(params["seq_emb"][:, :S_tok],
                  ((0, 0), (0, S_pad - S_tok)))                       # (E, S_pad)
    is_cls = (pos == 0)[None, :, None]
    is_real = ((pos >= 1) & (pos < S_tok))[None, :, None]
    pos_add = jnp.where(
        is_cls, params["first_token"][:, None, :] + seq[:, 0:1, None],
        jnp.where(is_real,
                  params["channel_emb"][:, None, :] + seq[:, :, None],
                  0.0))                                               # (E,S_pad,D)
    pos_add = jnp.broadcast_to(pos_add[:, None], (E, B, S_pad, D)).reshape(E, N, D)

    # one fused kernel: conv + assembly + all layers + masking + head halves
    cls_emb, pred_part = _dass_encoders_call(
        x_tok, conv_keep, pos_add, kbias, keep_cls, params,
        B=B, S_pad=S_pad, heads=heads)

    sub_emb, gen_emb = cls_emb[0], cls_emb[1]
    # final predict-head combine needs both encoders; (B, n_class) elementwise.
    emotion = _gelu_tanh((pred_part[0] + pred_part[1] + params["pred_b"])
                         * BN_SCALE)
    return sub_emb, gen_emb, emotion


# ----------------------------------------------------------------------------
# Deterministic parameter construction (shapes follow the PyTorch __init__,
# stacked over [subject, general] encoders and layers; matmul weights in bf16)
# ----------------------------------------------------------------------------
def init_params(key, n_class, n_channel, D, FF, n_layer):
    E = 2
    ks = jax.random.split(key, 9)

    def wmat(k, shape):
        return (jax.random.normal(k, shape, jnp.float32)
                / math.sqrt(shape[-2])).astype(jnp.bfloat16)

    return dict(
        conv_w=wmat(ks[0], (E, n_channel, D)),
        conv_b=jnp.zeros((E, 1, D), jnp.float32),
        first_token=0.02 * jax.random.normal(ks[1], (E, D), jnp.float32),
        channel_emb=0.02 * jax.random.normal(ks[2], (E, D), jnp.float32),
        seq_emb=0.02 * jax.random.normal(ks[3], (E, 63), jnp.float32),  # 62+1 pos
        w_in=wmat(ks[4], (E, n_layer, D, 3 * D)),
        b_in=jnp.zeros((E, n_layer, 1, 3 * D), jnp.float32),
        w_out=wmat(ks[5], (E, n_layer, D, D)),
        b_out=jnp.zeros((E, n_layer, 1, D), jnp.float32),
        ln1_w=jnp.ones((E, n_layer, 1, D), jnp.float32),
        ln1_b=jnp.zeros((E, n_layer, 1, D), jnp.float32),
        w_ff1=wmat(ks[6], (E, n_layer, D, FF)),
        b_ff1=jnp.zeros((E, n_layer, 1, FF), jnp.float32),
        w_ff2=wmat(ks[7], (E, n_layer, FF, D)),
        b_ff2=jnp.zeros((E, n_layer, 1, D), jnp.float32),
        ln2_w=jnp.ones((E, n_layer, 1, D), jnp.float32),
        ln2_b=jnp.zeros((E, n_layer, 1, D), jnp.float32),
        # predict head Linear(2D, n_class) split per encoder half:
        # pred_w[0] multiplies sub_emb (rows :D), pred_w[1] multiplies gen_emb.
        pred_w=wmat(ks[8], (E, D, n_class)),
        pred_b=jnp.zeros((1, n_class), jnp.float32),
    )


# ----------------------------------------------------------------------------
if __name__ == "__main__":
    key = jax.random.PRNGKey(0)

    # shapes consistent with DASS(n_class, n_sub, n_channel, conv_hidden_dim,
    #                             trans_hidden_dim, n_layer, heads)
    n_class, n_sub, n_channel = 3, 4, 4
    conv_hidden_dim, trans_hidden_dim = 32, 64
    n_layer, heads = 2, 4
    B, L = 2, 16                     # seq must satisfy seq + 1 <= 63

    k_param, k_x = jax.random.split(key, 2)
    params = init_params(k_param, n_class, n_channel, conv_hidden_dim,
                         trans_hidden_dim, n_layer)

    X = jax.random.normal(k_x, (B, n_channel, L), jnp.float32)       # (B, C, L)
    S = jnp.array([0, 1], jnp.int32)                                 # unused (eval)
    # key-padding mask over (cls + L) tokens: 1 = padded
    M = jnp.zeros((B, L + 1), jnp.float32).at[:, -2:].set(1.0)

    fwd = jax.jit(functools.partial(dass_forward, heads=heads))
    sub_emb, gen_emb, emotion_predict = fwd(params, X, S, M)
    jax.block_until_ready((sub_emb, gen_emb, emotion_predict))

    assert sub_emb.shape == (B, conv_hidden_dim)
    assert gen_emb.shape == (B, conv_hidden_dim)
    assert emotion_predict.shape == (B, n_class)
    assert bool(jnp.all(jnp.isfinite(sub_emb)))
    assert bool(jnp.all(jnp.isfinite(gen_emb)))
    assert bool(jnp.all(jnp.isfinite(emotion_predict)))
    print("KERNEL_OK")
</pallas_src>

<mosaic_0001>
module attributes {stable_mosaic.version = 11 : i64} {
  func.func @_dass_encoder_kernel(%arg0: i32, %arg1: memref<48x4xf32, #tpu.memory_space<vmem>>, %arg2: memref<48x1xf32, #tpu.memory_space<vmem>>, %arg3: memref<1x48x32xf32, #tpu.memory_space<vmem>>, %arg4: memref<2x1x24xf32, #tpu.memory_space<vmem>>, %arg5: memref<2x1xf32, #tpu.memory_space<vmem>>, %arg6: memref<1x4x32xbf16, #tpu.memory_space<vmem>>, %arg7: memref<1x1x32xf32, #tpu.memory_space<vmem>>, %arg8: memref<1x2x32x96xbf16, #tpu.memory_space<vmem>>, %arg9: memref<1x2x1x96xf32, #tpu.memory_space<vmem>>, %arg10: memref<1x2x32x32xbf16, #tpu.memory_space<vmem>>, %arg11: memref<1x2x1x32xf32, #tpu.memory_space<vmem>>, %arg12: memref<1x2x1x32xf32, #tpu.memory_space<vmem>>, %arg13: memref<1x2x1x32xf32, #tpu.memory_space<vmem>>, %arg14: memref<1x2x32x64xbf16, #tpu.memory_space<vmem>>, %arg15: memref<1x2x1x64xf32, #tpu.memory_space<vmem>>, %arg16: memref<1x2x64x32xbf16, #tpu.memory_space<vmem>>, %arg17: memref<1x2x1x32xf32, #tpu.memory_space<vmem>>, %arg18: memref<1x2x1x32xf32, #tpu.memory_space<vmem>>, %arg19: memref<1x2x1x32xf32, #tpu.memory_space<vmem>>, %arg20: memref<1x32x3xbf16, #tpu.memory_space<vmem>>, %arg21: memref<1x2x32xf32, #tpu.memory_space<vmem>>, %arg22: memref<1x2x3xf32, #tpu.memory_space<vmem>>) attributes {dimension_semantics = [#tpu.dimension_semantics<parallel>], iteration_bounds = array<i64: 2>, scalar_prefetch = 0 : i64, scratch_operands = 0 : i64, tpu.core_type = #tpu.core_type<tc>, window_params = [{pipeline_mode = #tpu.pipeline_mode<synchronous>, transform_indices = @transform_0, window_bounds = array<i64: 48, 4>}, {pipeline_mode = #tpu.pipeline_mode<synchronous>, transform_indices = @transform_1, window_bounds = array<i64: 48, 1>}, {transform_indices = @transform_2, window_bounds = array<i64: 1, 48, 32>}, {pipeline_mode = #tpu.pipeline_mode<synchronous>, transform_indices = @transform_3, window_bounds = array<i64: 2, 1, 24>}, {pipeline_mode = #tpu.pipeline_mode<synchronous>, transform_indices = @transform_4, window_bounds = array<i64: 2, 1>}, {transform_indices = @transform_5, window_bounds = array<i64: 1, 4, 32>}, {transform_indices = @transform_6, window_bounds = array<i64: 1, 1, 32>}, {transform_indices = @transform_7, window_bounds = array<i64: 1, 2, 32, 96>}, {transform_indices = @transform_8, window_bounds = array<i64: 1, 2, 1, 96>}, {transform_indices = @transform_9, window_bounds = array<i64: 1, 2, 32, 32>}, {transform_indices = @transform_10, window_bounds = array<i64: 1, 2, 1, 32>}, {transform_indices = @transform_11, window_bounds = array<i64: 1, 2, 1, 32>}, {transform_indices = @transform_12, window_bounds = array<i64: 1, 2, 1, 32>}, {transform_indices = @transform_13, window_bounds = array<i64: 1, 2, 32, 64>}, {transform_indices = @transform_14, window_bounds = array<i64: 1, 2, 1, 64>}, {transform_indices = @transform_15, window_bounds = array<i64: 1, 2, 64, 32>}, {transform_indices = @transform_16, window_bounds = array<i64: 1, 2, 1, 32>}, {transform_indices = @transform_17, window_bounds = array<i64: 1, 2, 1, 32>}, {transform_indices = @transform_18, window_bounds = array<i64: 1, 2, 1, 32>}, {transform_indices = @transform_19, window_bounds = array<i64: 1, 32, 3>}, {transform_indices = @transform_20, window_bounds = array<i64: 1, 2, 32>}, {transform_indices = @transform_21, window_bounds = array<i64: 1, 2, 3>}]} {
    %c0 = arith.constant 0 : index
    %c0_0 = arith.constant 0 : index
    %0 = vector.load %arg1[%c0, %c0_0] : memref<48x4xf32, #tpu.memory_space<vmem>>, vector<48x4xf32>
    %1 = arith.truncf %0 : vector<48x4xf32> to vector<48x4xbf16>
    %c0_1 = arith.constant 0 : index
    %c0_2 = arith.constant 0 : index
    %c0_3 = arith.constant 0 : index
    %2 = vector.load %arg6[%c0_1, %c0_2, %c0_3] : memref<1x4x32xbf16, #tpu.memory_space<vmem>>, vector<1x4x32xbf16>
    %3 = vector.shape_cast %2 : vector<1x4x32xbf16> to vector<4x32xbf16>
    %cst = arith.constant dense<0.000000e+00> : vector<48x32xf32>
    %4 = tpu.matmul %1, %3, %cst {dimension_numbers = #tpu.dot_dimension_numbers<[1], [0], [0], [1], [0, 0, 1, 1], [], []>} : vector<48x4xbf16>, vector<4x32xbf16>, vector<48x32xf32> -> vector<48x32xf32>
    %c0_4 = arith.constant 0 : index
    %c0_5 = arith.constant 0 : index
    %c0_6 = arith.constant 0 : index
    %5 = vector.load %arg7[%c0_4, %c0_5, %c0_6] : memref<1x1x32xf32, #tpu.memory_space<vmem>>, vector<1x1x32xf32>
    %6 = vector.shape_cast %5 : vector<1x1x32xf32> to vector<1x32xf32>
    %7 = vector.broadcast %6 : vector<1x32xf32> to vector<48x32xf32>
    %8 = arith.addf %4, %7 : vector<48x32xf32>
    %cst_7 = arith.constant 0.999994993 : f32
    %9 = vector.broadcast %cst_7 : f32 to vector<48x32xf32>
    %10 = arith.mulf %8, %9 : vector<48x32xf32>
    %cst_8 = arith.constant 5.000000e-01 : f32
    %11 = vector.broadcast %cst_8 : f32 to vector<48x32xf32>
    %12 = arith.mulf %11, %10 : vector<48x32xf32>
    %cst_9 = arith.constant 4.471500e-02 : f32
    %13 = vector.broadcast %cst_9 : f32 to vector<48x32xf32>
    %14 = arith.mulf %13, %10 : vector<48x32xf32>
    %15 = arith.mulf %14, %10 : vector<48x32xf32>
    %16 = arith.mulf %15, %10 : vector<48x32xf32>
    %17 = arith.addf %10, %16 : vector<48x32xf32>
    %cst_10 = arith.constant 0.797884583 : f32
    %18 = vector.broadcast %cst_10 : f32 to vector<48x32xf32>
    %19 = arith.mulf %18, %17 : vector<48x32xf32>
    %20 = math.tanh %19 : vector<48x32xf32>
    %cst_11 = arith.constant 1.000000e+00 : f32
    %21 = vector.broadcast %cst_11 : f32 to vector<48x32xf32>
    %22 = arith.addf %21, %20 : vector<48x32xf32>
    %23 = arith.mulf %12, %22 : vector<48x32xf32>
    %c0_12 = arith.constant 0 : index
    %c0_13 = arith.constant 0 : index
    %24 = vector.load %arg2[%c0_12, %c0_13] : memref<48x1xf32, #tpu.memory_space<vmem>>, vector<48x1xf32>
    %25 = vector.broadcast %24 : vector<48x1xf32> to vector<48x32xf32>
    %26 = arith.mulf %23, %25 : vector<48x32xf32>
    %c0_14 = arith.constant 0 : index
    %c0_15 = arith.constant 0 : index
    %c0_16 = arith.constant 0 : index
    %27 = vector.load %arg3[%c0_14, %c0_15, %c0_16] : memref<1x48x32xf32, #tpu.memory_space<vmem>>, vector<1x48x32xf32>
    %28 = vector.shape_cast %27 : vector<1x48x32xf32> to vector<48x32xf32>
    %29 = arith.addf %26, %28 : vector<48x32xf32>
    %c0_17 = arith.constant 0 : index
    %c0_18 = arith.constant 0 : index
    %c0_19 = arith.constant 0 : index
    %30 = vector.load %arg4[%c0_17, %c0_18, %c0_19] : memref<2x1x24xf32, #tpu.memory_space<vmem>>, vector<2x1x24xf32>
    %31 = arith.truncf %29 : vector<48x32xf32> to vector<48x32xbf16>
    %c0_20 = arith.constant 0 : index
    %c0_21 = arith.constant 0 : index
    %c0_22 = arith.constant 0 : index
    %c0_23 = arith.constant 0 : index
    %32 = vector.load %arg8[%c0_20, %c0_21, %c0_22, %c0_23] : memref<1x2x32x96xbf16, #tpu.memory_space<vmem>>, vector<1x1x32x96xbf16>
    %33 = vector.shape_cast %32 : vector<1x1x32x96xbf16> to vector<32x96xbf16>
    %cst_24 = arith.constant dense<0.000000e+00> : vector<48x96xf32>
    %34 = tpu.matmul %31, %33, %cst_24 {dimension_numbers = #tpu.dot_dimension_numbers<[1], [0], [0], [1], [0, 0, 1, 1], [], []>} : vector<48x32xbf16>, vector<32x96xbf16>, vector<48x96xf32> -> vector<48x96xf32>
    %c0_25 = arith.constant 0 : index
    %c0_26 = arith.constant 0 : index
    %c0_27 = arith.constant 0 : index
    %c0_28 = arith.constant 0 : index
    %35 = vector.load %arg9[%c0_25, %c0_26, %c0_27, %c0_28] : memref<1x2x1x96xf32, #tpu.memory_space<vmem>>, vector<1x1x1x96xf32>
    %36 = vector.shape_cast %35 : vector<1x1x1x96xf32> to vector<1x96xf32>
    %37 = vector.broadcast %36 : vector<1x96xf32> to vector<48x96xf32>
    %38 = arith.addf %34, %37 : vector<48x96xf32>
    %39 = vector.shape_cast %38 : vector<48x96xf32> to vector<2x24x96xf32>
    %40 = arith.truncf %39 : vector<2x24x96xf32> to vector<2x24x96xbf16>
    %41 = vector.extract_strided_slice %40 {offsets = [0, 0, 0], sizes = [2, 24, 8], strides = [1, 1, 1]} : vector<2x24x96xbf16> to vector<2x24x8xbf16>
    %42 = vector.extract_strided_slice %40 {offsets = [0, 0, 32], sizes = [2, 24, 8], strides = [1, 1, 1]} : vector<2x24x96xbf16> to vector<2x24x8xbf16>
    %43 = vector.extract_strided_slice %40 {offsets = [0, 0, 64], sizes = [2, 24, 8], strides = [1, 1, 1]} : vector<2x24x96xbf16> to vector<2x24x8xbf16>
    "tpu.trace_start"() <{level = 10 : i32, message = "bqd,bkd->bqk"}> : () -> ()
    %cst_29 = arith.constant dense<0.000000e+00> : vector<2x24x24xf32>
    %44 = tpu.matmul %41, %42, %cst_29 {dimension_numbers = #tpu.dot_dimension_numbers<[2], [2], [1], [1], [0, 0, 0, 1, 1, 1], [0], [0]>} : vector<2x24x8xbf16>, vector<2x24x8xbf16>, vector<2x24x24xf32> -> vector<2x24x24xf32>
    "tpu.trace_stop"() : () -> ()
    %cst_30 = arith.constant 0.353553385 : f32
    %45 = vector.broadcast %cst_30 : f32 to vector<2x24x24xf32>
    %46 = arith.mulf %44, %45 : vector<2x24x24xf32>
    %47 = vector.broadcast %30 : vector<2x1x24xf32> to vector<2x24x24xf32>
    %48 = arith.addf %46, %47 : vector<2x24x24xf32>
    %cst_31 = arith.constant dense<0xFF800000> : vector<2x24xf32>
    %49 = vector.multi_reduction <maximumf>, %48, %cst_31 [2] : vector<2x24x24xf32> to vector<2x24xf32>
    %50 = vector.shape_cast %49 : vector<2x24xf32> to vector<2x24x1xf32>
    %51 = vector.broadcast %50 : vector<2x24x1xf32> to vector<2x24x24xf32>
    %52 = arith.subf %48, %51 : vector<2x24x24xf32>
    %53 = math.exp %52 : vector<2x24x24xf32>
    %cst_32 = arith.constant dense<0.000000e+00> : vector<2x24xf32>
    %54 = vector.multi_reduction <add>, %53, %cst_32 [2] : vector<2x24x24xf32> to vector<2x24xf32>
    %55 = vector.shape_cast %54 : vector<2x24xf32> to vector<2x24x1xf32>
    %56 = tpu.reciprocal %55 : vector<2x24x1xf32> -> vector<2x24x1xf32>
    %57 = vector.broadcast %56 : vector<2x24x1xf32> to vector<2x24x24xf32>
    %58 = arith.mulf %53, %57 : vector<2x24x24xf32>
    %59 = arith.truncf %58 : vector<2x24x24xf32> to vector<2x24x24xbf16>
    "tpu.trace_start"() <{level = 10 : i32, message = "bqk,bkd->bqd"}> : () -> ()
    %cst_33 = arith.constant dense<0.000000e+00> : vector<2x24x8xf32>
    %60 = tpu.matmul %59, %43, %cst_33 {dimension_numbers = #tpu.dot_dimension_numbers<[2], [1], [1], [2], [0, 0, 0, 1, 1, 2], [0], [0]>} : vector<2x24x24xbf16>, vector<2x24x8xbf16>, vector<2x24x8xf32> -> vector<2x24x8xf32>
    "tpu.trace_stop"() : () -> ()
    %61 = vector.extract_strided_slice %40 {offsets = [0, 0, 8], sizes = [2, 24, 8], strides = [1, 1, 1]} : vector<2x24x96xbf16> to vector<2x24x8xbf16>
    %62 = vector.extract_strided_slice %40 {offsets = [0, 0, 40], sizes = [2, 24, 8], strides = [1, 1, 1]} : vector<2x24x96xbf16> to vector<2x24x8xbf16>
    %63 = vector.extract_strided_slice %40 {offsets = [0, 0, 72], sizes = [2, 24, 8], strides = [1, 1, 1]} : vector<2x24x96xbf16> to vector<2x24x8xbf16>
    "tpu.trace_start"() <{level = 10 : i32, message = "bqd,bkd->bqk"}> : () -> ()
    %cst_34 = arith.constant dense<0.000000e+00> : vector<2x24x24xf32>
    %64 = tpu.matmul %61, %62, %cst_34 {dimension_numbers = #tpu.dot_dimension_numbers<[2], [2], [1], [1], [0, 0, 0, 1, 1, 1], [0], [0]>} : vector<2x24x8xbf16>, vector<2x24x8xbf16>, vector<2x24x24xf32> -> vector<2x24x24xf32>
    "tpu.trace_stop"() : () -> ()
    %cst_35 = arith.constant 0.353553385 : f32
    %65 = vector.broadcast %cst_35 : f32 to vector<2x24x24xf32>
    %66 = arith.mulf %64, %65 : vector<2x24x24xf32>
    %67 = vector.broadcast %30 : vector<2x1x24xf32> to vector<2x24x24xf32>
    %68 = arith.addf %66, %67 : vector<2x24x24xf32>
    %cst_36 = arith.constant dense<0xFF800000> : vector<2x24xf32>
    %69 = vector.multi_reduction <maximumf>, %68, %cst_36 [2] : vector<2x24x24xf32> to vector<2x24xf32>
    %70 = vector.shape_cast %69 : vector<2x24xf32> to vector<2x24x1xf32>
    %71 = vector.broadcast %70 : vector<2x24x1xf32> to vector<2x24x24xf32>
    %72 = arith.subf %68, %71 : vector<2x24x24xf32>
    %73 = math.exp %72 : vector<2x24x24xf32>
    %cst_37 = arith.constant dense<0.000000e+00> : vector<2x24xf32>
    %74 = vector.multi_reduction <add>, %73, %cst_37 [2] : vector<2x24x24xf32> to vector<2x24xf32>
    %75 = vector.shape_cast %74 : vector<2x24xf32> to vector<2x24x1xf32>
    %76 = tpu.reciprocal %75 : vector<2x24x1xf32> -> vector<2x24x1xf32>
    %77 = vector.broadcast %76 : vector<2x24x1xf32> to vector<2x24x24xf32>
    %78 = arith.mulf %73, %77 : vector<2x24x24xf32>
    %79 = arith.truncf %78 : vector<2x24x24xf32> to vector<2x24x24xbf16>
    "tpu.trace_start"() <{level = 10 : i32, message = "bqk,bkd->bqd"}> : () -> ()
    %cst_38 = arith.constant dense<0.000000e+00> : vector<2x24x8xf32>
    %80 = tpu.matmul %79, %63, %cst_38 {dimension_numbers = #tpu.dot_dimension_numbers<[2], [1], [1], [2], [0, 0, 0, 1, 1, 2], [0], [0]>} : vector<2x24x24xbf16>, vector<2x24x8xbf16>, vector<2x24x8xf32> -> vector<2x24x8xf32>
    "tpu.trace_stop"() : () -> ()
    %81 = vector.extract_strided_slice %40 {offsets = [0, 0, 16], sizes = [2, 24, 8], strides = [1, 1, 1]} : vector<2x24x96xbf16> to vector<2x24x8xbf16>
    %82 = vector.extract_strided_slice %40 {offsets = [0, 0, 48], sizes = [2, 24, 8], strides = [1, 1, 1]} : vector<2x24x96xbf16> to vector<2x24x8xbf16>
    %83 = vector.extract_strided_slice %40 {offsets = [0, 0, 80], sizes = [2, 24, 8], strides = [1, 1, 1]} : vector<2x24x96xbf16> to vector<2x24x8xbf16>
    "tpu.trace_start"() <{level = 10 : i32, message = "bqd,bkd->bqk"}> : () -> ()
    %cst_39 = arith.constant dense<0.000000e+00> : vector<2x24x24xf32>
    %84 = tpu.matmul %81, %82, %cst_39 {dimension_numbers = #tpu.dot_dimension_numbers<[2], [2], [1], [1], [0, 0, 0, 1, 1, 1], [0], [0]>} : vector<2x24x8xbf16>, vector<2x24x8xbf16>, vector<2x24x24xf32> -> vector<2x24x24xf32>
    "tpu.trace_stop"() : () -> ()
    %cst_40 = arith.constant 0.353553385 : f32
    %85 = vector.broadcast %cst_40 : f32 to vector<2x24x24xf32>
    %86 = arith.mulf %84, %85 : vector<2x24x24xf32>
    %87 = vector.broadcast %30 : vector<2x1x24xf32> to vector<2x24x24xf32>
    %88 = arith.addf %86, %87 : vector<2x24x24xf32>
    %cst_41 = arith.constant dense<0xFF800000> : vector<2x24xf32>
    %89 = vector.multi_reduction <maximumf>, %88, %cst_41 [2] : vector<2x24x24xf32> to vector<2x24xf32>
    %90 = vector.shape_cast %89 : vector<2x24xf32> to vector<2x24x1xf32>
    %91 = vector.broadcast %90 : vector<2x24x1xf32> to vector<2x24x24xf32>
    %92 = arith.subf %88, %91 : vector<2x24x24xf32>
    %93 = math.exp %92 : vector<2x24x24xf32>
    %cst_42 = arith.constant dense<0.000000e+00> : vector<2x24xf32>
    %94 = vector.multi_reduction <add>, %93, %cst_42 [2] : vector<2x24x24xf32> to vector<2x24xf32>
    %95 = vector.shape_cast %94 : vector<2x24xf32> to vector<2x24x1xf32>
    %96 = tpu.reciprocal %95 : vector<2x24x1xf32> -> vector<2x24x1xf32>
    %97 = vector.broadcast %96 : vector<2x24x1xf32> to vector<2x24x24xf32>
    %98 = arith.mulf %93, %97 : vector<2x24x24xf32>
    %99 = arith.truncf %98 : vector<2x24x24xf32> to vector<2x24x24xbf16>
    "tpu.trace_start"() <{level = 10 : i32, message = "bqk,bkd->bqd"}> : () -> ()
    %cst_43 = arith.constant dense<0.000000e+00> : vector<2x24x8xf32>
    %100 = tpu.matmul %99, %83, %cst_43 {dimension_numbers = #tpu.dot_dimension_numbers<[2], [1], [1], [2], [0, 0, 0, 1, 1, 2], [0], [0]>} : vector<2x24x24xbf16>, vector<2x24x8xbf16>, vector<2x24x8xf32> -> vector<2x24x8xf32>
    "tpu.trace_stop"() : () -> ()
    %101 = vector.extract_strided_slice %40 {offsets = [0, 0, 24], sizes = [2, 24, 8], strides = [1, 1, 1]} : vector<2x24x96xbf16> to vector<2x24x8xbf16>
    %102 = vector.extract_strided_slice %40 {offsets = [0, 0, 56], sizes = [2, 24, 8], strides = [1, 1, 1]} : vector<2x24x96xbf16> to vector<2x24x8xbf16>
    %103 = vector.extract_strided_slice %40 {offsets = [0, 0, 88], sizes = [2, 24, 8], strides = [1, 1, 1]} : vector<2x24x96xbf16> to vector<2x24x8xbf16>
    "tpu.trace_start"() <{level = 10 : i32, message = "bqd,bkd->bqk"}> : () -> ()
    %cst_44 = arith.constant dense<0.000000e+00> : vector<2x24x24xf32>
    %104 = tpu.matmul %101, %102, %cst_44 {dimension_numbers = #tpu.dot_dimension_numbers<[2], [2], [1], [1], [0, 0, 0, 1, 1, 1], [0], [0]>} : vector<2x24x8xbf16>, vector<2x24x8xbf16>, vector<2x24x24xf32> -> vector<2x24x24xf32>
    "tpu.trace_stop"() : () -> ()
    %cst_45 = arith.constant 0.353553385 : f32
    %105 = vector.broadcast %cst_45 : f32 to vector<2x24x24xf32>
    %106 = arith.mulf %104, %105 : vector<2x24x24xf32>
    %107 = vector.broadcast %30 : vector<2x1x24xf32> to vector<2x24x24xf32>
    %108 = arith.addf %106, %107 : vector<2x24x24xf32>
    %cst_46 = arith.constant dense<0xFF800000> : vector<2x24xf32>
    %109 = vector.multi_reduction <maximumf>, %108, %cst_46 [2] : vector<2x24x24xf32> to vector<2x24xf32>
    %110 = vector.shape_cast %109 : vector<2x24xf32> to vector<2x24x1xf32>
    %111 = vector.broadcast %110 : vector<2x24x1xf32> to vector<2x24x24xf32>
    %112 = arith.subf %108, %111 : vector<2x24x24xf32>
    %113 = math.exp %112 : vector<2x24x24xf32>
    %cst_47 = arith.constant dense<0.000000e+00> : vector<2x24xf32>
    %114 = vector.multi_reduction <add>, %113, %cst_47 [2] : vector<2x24x24xf32> to vector<2x24xf32>
    %115 = vector.shape_cast %114 : vector<2x24xf32> to vector<2x24x1xf32>
    %116 = tpu.reciprocal %115 : vector<2x24x1xf32> -> vector<2x24x1xf32>
    %117 = vector.broadcast %116 : vector<2x24x1xf32> to vector<2x24x24xf32>
    %118 = arith.mulf %113, %117 : vector<2x24x24xf32>
    %119 = arith.truncf %118 : vector<2x24x24xf32> to vector<2x24x24xbf16>
    "tpu.trace_start"() <{level = 10 : i32, message = "bqk,bkd->bqd"}> : () -> ()
    %cst_48 = arith.constant dense<0.000000e+00> : vector<2x24x8xf32>
    %120 = tpu.matmul %119, %103, %cst_48 {dimension_numbers = #tpu.dot_dimension_numbers<[2], [1], [1], [2], [0, 0, 0, 1, 1, 2], [0], [0]>} : vector<2x24x24xbf16>, vector<2x24x8xbf16>, vector<2x24x8xf32> -> vector<2x24x8xf32>
    "tpu.trace_stop"() : () -> ()
    %121 = tpu.concatenate %60, %80, %100, %120 in 2 : vector<2x24x8xf32>, vector<2x24x8xf32>, vector<2x24x8xf32>, vector<2x24x8xf32> -> vector<2x24x32xf32>
    %122 = vector.shape_cast %121 : vector<2x24x32xf32> to vector<48x32xf32>
    %123 = arith.truncf %122 : vector<48x32xf32> to vector<48x32xbf16>
    %c0_49 = arith.constant 0 : index
    %c0_50 = arith.constant 0 : index
    %c0_51 = arith.constant 0 : index
    %c0_52 = arith.constant 0 : index
    %124 = vector.load %arg10[%c0_49, %c0_50, %c0_51, %c0_52] : memref<1x2x32x32xbf16, #tpu.memory_space<vmem>>, vector<1x1x32x32xbf16>
    %125 = vector.shape_cast %124 : vector<1x1x32x32xbf16> to vector<32x32xbf16>
    %cst_53 = arith.constant dense<0.000000e+00> : vector<48x32xf32>
    %126 = tpu.matmul %123, %125, %cst_53 {dimension_numbers = #tpu.dot_dimension_numbers<[1], [0], [0], [1], [0, 0, 1, 1], [], []>} : vector<48x32xbf16>, vector<32x32xbf16>, vector<48x32xf32> -> vector<48x32xf32>
    %c0_54 = arith.constant 0 : index
    %c0_55 = arith.constant 0 : index
    %c0_56 = arith.constant 0 : index
    %c0_57 = arith.constant 0 : index
    %127 = vector.load %arg11[%c0_54, %c0_55, %c0_56, %c0_57] : memref<1x2x1x32xf32, #tpu.memory_space<vmem>>, vector<1x1x1x32xf32>
    %128 = vector.shape_cast %127 : vector<1x1x1x32xf32> to vector<1x32xf32>
    %129 = vector.broadcast %128 : vector<1x32xf32> to vector<48x32xf32>
    %130 = arith.addf %126, %129 : vector<48x32xf32>
    %131 = arith.addf %29, %130 : vector<48x32xf32>
    %c0_58 = arith.constant 0 : index
    %c0_59 = arith.constant 0 : index
    %c0_60 = arith.constant 0 : index
    %c0_61 = arith.constant 0 : index
    %132 = vector.load %arg12[%c0_58, %c0_59, %c0_60, %c0_61] : memref<1x2x1x32xf32, #tpu.memory_space<vmem>>, vector<1x1x1x32xf32>
    %133 = vector.shape_cast %132 : vector<1x1x1x32xf32> to vector<1x32xf32>
    %c0_62 = arith.constant 0 : index
    %c0_63 = arith.constant 0 : index
    %c0_64 = arith.constant 0 : index
    %c0_65 = arith.constant 0 : index
    %134 = vector.load %arg13[%c0_62, %c0_63, %c0_64, %c0_65] : memref<1x2x1x32xf32, #tpu.memory_space<vmem>>, vector<1x1x1x32xf32>
    %135 = vector.shape_cast %134 : vector<1x1x1x32xf32> to vector<1x32xf32>
    %cst_66 = arith.constant dense<0.000000e+00> : vector<48xf32>
    %136 = vector.multi_reduction <add>, %131, %cst_66 [1] : vector<48x32xf32> to vector<48xf32>
    %137 = vector.shape_cast %136 : vector<48xf32> to vector<48x1xf32>
    %cst_67 = arith.constant 3.200000e+01 : f32
    %138 = vector.broadcast %cst_67 : f32 to vector<48x1xf32>
    %139 = arith.divf %137, %138 : vector<48x1xf32>
    %140 = vector.broadcast %139 : vector<48x1xf32> to vector<48x32xf32>
    %141 = arith.subf %131, %140 : vector<48x32xf32>
    %142 = arith.mulf %141, %141 : vector<48x32xf32>
    %cst_68 = arith.constant dense<0.000000e+00> : vector<48xf32>
    %143 = vector.multi_reduction <add>, %142, %cst_68 [1] : vector<48x32xf32> to vector<48xf32>
    %144 = vector.shape_cast %143 : vector<48xf32> to vector<48x1xf32>
    %cst_69 = arith.constant 3.200000e+01 : f32
    %145 = vector.broadcast %cst_69 : f32 to vector<48x1xf32>
    %146 = arith.divf %144, %145 : vector<48x1xf32>
    %cst_70 = arith.constant 9.99999974E-6 : f32
    %147 = vector.broadcast %cst_70 : f32 to vector<48x1xf32>
    %148 = arith.addf %146, %147 : vector<48x1xf32>
    %149 = math.rsqrt %148 : vector<48x1xf32>
    %150 = vector.broadcast %149 : vector<48x1xf32> to vector<48x32xf32>
    %151 = arith.mulf %141, %150 : vector<48x32xf32>
    %152 = vector.broadcast %133 : vector<1x32xf32> to vector<48x32xf32>
    %153 = arith.mulf %151, %152 : vector<48x32xf32>
    %154 = vector.broadcast %135 : vector<1x32xf32> to vector<48x32xf32>
    %155 = arith.addf %153, %154 : vector<48x32xf32>
    %156 = arith.truncf %155 : vector<48x32xf32> to vector<48x32xbf16>
    %c0_71 = arith.constant 0 : index
    %c0_72 = arith.constant 0 : index
    %c0_73 = arith.constant 0 : index
    %c0_74 = arith.constant 0 : index
    %157 = vector.load %arg14[%c0_71, %c0_72, %c0_73, %c0_74] : memref<1x2x32x64xbf16, #tpu.memory_space<vmem>>, vector<1x1x32x64xbf16>
    %158 = vector.shape_cast %157 : vector<1x1x32x64xbf16> to vector<32x64xbf16>
    %cst_75 = arith.constant dense<0.000000e+00> : vector<48x64xf32>
    %159 = tpu.matmul %156, %158, %cst_75 {dimension_numbers = #tpu.dot_dimension_numbers<[1], [0], [0], [1], [0, 0, 1, 1], [], []>} : vector<48x32xbf16>, vector<32x64xbf16>, vector<48x64xf32> -> vector<48x64xf32>
    %c0_76 = arith.constant 0 : index
    %c0_77 = arith.constant 0 : index
    %c0_78 = arith.constant 0 : index
    %c0_79 = arith.constant 0 : index
    %160 = vector.load %arg15[%c0_76, %c0_77, %c0_78, %c0_79] : memref<1x2x1x64xf32, #tpu.memory_space<vmem>>, vector<1x1x1x64xf32>
    %161 = vector.shape_cast %160 : vector<1x1x1x64xf32> to vector<1x64xf32>
    %162 = vector.broadcast %161 : vector<1x64xf32> to vector<48x64xf32>
    %163 = arith.addf %159, %162 : vector<48x64xf32>
    %cst_80 = arith.constant 5.000000e-01 : f32
    %164 = vector.broadcast %cst_80 : f32 to vector<48x64xf32>
    %165 = arith.mulf %164, %163 : vector<48x64xf32>
    %cst_81 = arith.constant 4.471500e-02 : f32
    %166 = vector.broadcast %cst_81 : f32 to vector<48x64xf32>
    %167 = arith.mulf %166, %163 : vector<48x64xf32>
    %168 = arith.mulf %167, %163 : vector<48x64xf32>
    %169 = arith.mulf %168, %163 : vector<48x64xf32>
    %170 = arith.addf %163, %169 : vector<48x64xf32>
    %cst_82 = arith.constant 0.797884583 : f32
    %171 = vector.broadcast %cst_82 : f32 to vector<48x64xf32>
    %172 = arith.mulf %171, %170 : vector<48x64xf32>
    %173 = math.tanh %172 : vector<48x64xf32>
    %cst_83 = arith.constant 1.000000e+00 : f32
    %174 = vector.broadcast %cst_83 : f32 to vector<48x64xf32>
    %175 = arith.addf %174, %173 : vector<48x64xf32>
    %176 = arith.mulf %165, %175 : vector<48x64xf32>
    %177 = arith.truncf %176 : vector<48x64xf32> to vector<48x64xbf16>
    %c0_84 = arith.constant 0 : index
    %c0_85 = arith.constant 0 : index
    %c0_86 = arith.constant 0 : index
    %c0_87 = arith.constant 0 : index
    %178 = vector.load %arg16[%c0_84, %c0_85, %c0_86, %c0_87] : memref<1x2x64x32xbf16, #tpu.memory_space<vmem>>, vector<1x1x64x32xbf16>
    %179 = vector.shape_cast %178 : vector<1x1x64x32xbf16> to vector<64x32xbf16>
    %cst_88 = arith.constant dense<0.000000e+00> : vector<48x32xf32>
    %180 = tpu.matmul %177, %179, %cst_88 {dimension_numbers = #tpu.dot_dimension_numbers<[1], [0], [0], [1], [0, 0, 1, 1], [], []>} : vector<48x64xbf16>, vector<64x32xbf16>, vector<48x32xf32> -> vector<48x32xf32>
    %c0_89 = arith.constant 0 : index
    %c0_90 = arith.constant 0 : index
    %c0_91 = arith.constant 0 : index
    %c0_92 = arith.constant 0 : index
    %181 = vector.load %arg17[%c0_89, %c0_90, %c0_91, %c0_92] : memref<1x2x1x32xf32, #tpu.memory_space<vmem>>, vector<1x1x1x32xf32>
    %182 = vector.shape_cast %181 : vector<1x1x1x32xf32> to vector<1x32xf32>
    %183 = vector.broadcast %182 : vector<1x32xf32> to vector<48x32xf32>
    %184 = arith.addf %180, %183 : vector<48x32xf32>
    %185 = arith.addf %155, %184 : vector<48x32xf32>
    %c0_93 = arith.constant 0 : index
    %c0_94 = arith.constant 0 : index
    %c0_95 = arith.constant 0 : index
    %c0_96 = arith.constant 0 : index
    %186 = vector.load %arg18[%c0_93, %c0_94, %c0_95, %c0_96] : memref<1x2x1x32xf32, #tpu.memory_space<vmem>>, vector<1x1x1x32xf32>
    %187 = vector.shape_cast %186 : vector<1x1x1x32xf32> to vector<1x32xf32>
    %c0_97 = arith.constant 0 : index
    %c0_98 = arith.constant 0 : index
    %c0_99 = arith.constant 0 : index
    %c0_100 = arith.constant 0 : index
    %188 = vector.load %arg19[%c0_97, %c0_98, %c0_99, %c0_100] : memref<1x2x1x32xf32, #tpu.memory_space<vmem>>, vector<1x1x1x32xf32>
    %189 = vector.shape_cast %188 : vector<1x1x1x32xf32> to vector<1x32xf32>
    %cst_101 = arith.constant dense<0.000000e+00> : vector<48xf32>
    %190 = vector.multi_reduction <add>, %185, %cst_101 [1] : vector<48x32xf32> to vector<48xf32>
    %191 = vector.shape_cast %190 : vector<48xf32> to vector<48x1xf32>
    %cst_102 = arith.constant 3.200000e+01 : f32
    %192 = vector.broadcast %cst_102 : f32 to vector<48x1xf32>
    %193 = arith.divf %191, %192 : vector<48x1xf32>
    %194 = vector.broadcast %193 : vector<48x1xf32> to vector<48x32xf32>
    %195 = arith.subf %185, %194 : vector<48x32xf32>
    %196 = arith.mulf %195, %195 : vector<48x32xf32>
    %cst_103 = arith.constant dense<0.000000e+00> : vector<48xf32>
    %197 = vector.multi_reduction <add>, %196, %cst_103 [1] : vector<48x32xf32> to vector<48xf32>
    %198 = vector.shape_cast %197 : vector<48xf32> to vector<48x1xf32>
    %cst_104 = arith.constant 3.200000e+01 : f32
    %199 = vector.broadcast %cst_104 : f32 to vector<48x1xf32>
    %200 = arith.divf %198, %199 : vector<48x1xf32>
    %cst_105 = arith.constant 9.99999974E-6 : f32
    %201 = vector.broadcast %cst_105 : f32 to vector<48x1xf32>
    %202 = arith.addf %200, %201 : vector<48x1xf32>
    %203 = math.rsqrt %202 : vector<48x1xf32>
    %204 = vector.broadcast %203 : vector<48x1xf32> to vector<48x32xf32>
    %205 = arith.mulf %195, %204 : vector<48x32xf32>
    %206 = vector.broadcast %187 : vector<1x32xf32> to vector<48x32xf32>
    %207 = arith.mulf %205, %206 : vector<48x32xf32>
    %208 = vector.broadcast %189 : vector<1x32xf32> to vector<48x32xf32>
    %209 = arith.addf %207, %208 : vector<48x32xf32>
    %210 = arith.truncf %209 : vector<48x32xf32> to vector<48x32xbf16>
    %c0_106 = arith.constant 0 : index
    %c1 = arith.constant 1 : index
    %c0_107 = arith.constant 0 : index
    %c0_108 = arith.constant 0 : index
    %211 = vector.load %arg8[%c0_106, %c1, %c0_107, %c0_108] : memref<1x2x32x96xbf16, #tpu.memory_space<vmem>>, vector<1x1x32x96xbf16>
    %212 = vector.shape_cast %211 : vector<1x1x32x96xbf16> to vector<32x96xbf16>
    %cst_109 = arith.constant dense<0.000000e+00> : vector<48x96xf32>
    %213 = tpu.matmul %210, %212, %cst_109 {dimension_numbers = #tpu.dot_dimension_numbers<[1], [0], [0], [1], [0, 0, 1, 1], [], []>} : vector<48x32xbf16>, vector<32x96xbf16>, vector<48x96xf32> -> vector<48x96xf32>
    %c0_110 = arith.constant 0 : index
    %c1_111 = arith.constant 1 : index
    %c0_112 = arith.constant 0 : index
    %c0_113 = arith.constant 0 : index
    %214 = vector.load %arg9[%c0_110, %c1_111, %c0_112, %c0_113] : memref<1x2x1x96xf32, #tpu.memory_space<vmem>>, vector<1x1x1x96xf32>
    %215 = vector.shape_cast %214 : vector<1x1x1x96xf32> to vector<1x96xf32>
    %216 = vector.broadcast %215 : vector<1x96xf32> to vector<48x96xf32>
    %217 = arith.addf %213, %216 : vector<48x96xf32>
    %218 = vector.shape_cast %217 : vector<48x96xf32> to vector<2x24x96xf32>
    %219 = arith.truncf %218 : vector<2x24x96xf32> to vector<2x24x96xbf16>
    %220 = vector.extract_strided_slice %219 {offsets = [0, 0, 0], sizes = [2, 24, 8], strides = [1, 1, 1]} : vector<2x24x96xbf16> to vector<2x24x8xbf16>
    %221 = vector.extract_strided_slice %219 {offsets = [0, 0, 32], sizes = [2, 24, 8], strides = [1, 1, 1]} : vector<2x24x96xbf16> to vector<2x24x8xbf16>
    %222 = vector.extract_strided_slice %219 {offsets = [0, 0, 64], sizes = [2, 24, 8], strides = [1, 1, 1]} : vector<2x24x96xbf16> to vector<2x24x8xbf16>
    "tpu.trace_start"() <{level = 10 : i32, message = "bqd,bkd->bqk"}> : () -> ()
    %cst_114 = arith.constant dense<0.000000e+00> : vector<2x24x24xf32>
    %223 = tpu.matmul %220, %221, %cst_114 {dimension_numbers = #tpu.dot_dimension_numbers<[2], [2], [1], [1], [0, 0, 0, 1, 1, 1], [0], [0]>} : vector<2x24x8xbf16>, vector<2x24x8xbf16>, vector<2x24x24xf32> -> vector<2x24x24xf32>
    "tpu.trace_stop"() : () -> ()
    %cst_115 = arith.constant 0.353553385 : f32
    %224 = vector.broadcast %cst_115 : f32 to vector<2x24x24xf32>
    %225 = arith.mulf %223, %224 : vector<2x24x24xf32>
    %226 = vector.broadcast %30 : vector<2x1x24xf32> to vector<2x24x24xf32>
    %227 = arith.addf %225, %226 : vector<2x24x24xf32>
    %cst_116 = arith.constant dense<0xFF800000> : vector<2x24xf32>
    %228 = vector.multi_reduction <maximumf>, %227, %cst_116 [2] : vector<2x24x24xf32> to vector<2x24xf32>
    %229 = vector.shape_cast %228 : vector<2x24xf32> to vector<2x24x1xf32>
    %230 = vector.broadcast %229 : vector<2x24x1xf32> to vector<2x24x24xf32>
    %231 = arith.subf %227, %230 : vector<2x24x24xf32>
    %232 = math.exp %231 : vector<2x24x24xf32>
    %cst_117 = arith.constant dense<0.000000e+00> : vector<2x24xf32>
    %233 = vector.multi_reduction <add>, %232, %cst_117 [2] : vector<2x24x24xf32> to vector<2x24xf32>
    %234 = vector.shape_cast %233 : vector<2x24xf32> to vector<2x24x1xf32>
    %235 = tpu.reciprocal %234 : vector<2x24x1xf32> -> vector<2x24x1xf32>
    %236 = vector.broadcast %235 : vector<2x24x1xf32> to vector<2x24x24xf32>
    %237 = arith.mulf %232, %236 : vector<2x24x24xf32>
    %238 = arith.truncf %237 : vector<2x24x24xf32> to vector<2x24x24xbf16>
    "tpu.trace_start"() <{level = 10 : i32, message = "bqk,bkd->bqd"}> : () -> ()
    %cst_118 = arith.constant dense<0.000000e+00> : vector<2x24x8xf32>
    %239 = tpu.matmul %238, %222, %cst_118 {dimension_numbers = #tpu.dot_dimension_numbers<[2], [1], [1], [2], [0, 0, 0, 1, 1, 2], [0], [0]>} : vector<2x24x24xbf16>, vector<2x24x8xbf16>, vector<2x24x8xf32> -> vector<2x24x8xf32>
    "tpu.trace_stop"() : () -> ()
    %240 = vector.extract_strided_slice %219 {offsets = [0, 0, 8], sizes = [2, 24, 8], strides = [1, 1, 1]} : vector<2x24x96xbf16> to vector<2x24x8xbf16>
    %241 = vector.extract_strided_slice %219 {offsets = [0, 0, 40], sizes = [2, 24, 8], strides = [1, 1, 1]} : vector<2x24x96xbf16> to vector<2x24x8xbf16>
    %242 = vector.extract_strided_slice %219 {offsets = [0, 0, 72], sizes = [2, 24, 8], strides = [1, 1, 1]} : vector<2x24x96xbf16> to vector<2x24x8xbf16>
    "tpu.trace_start"() <{level = 10 : i32, message = "bqd,bkd->bqk"}> : () -> ()
    %cst_119 = arith.constant dense<0.000000e+00> : vector<2x24x24xf32>
    %243 = tpu.matmul %240, %241, %cst_119 {dimension_numbers = #tpu.dot_dimension_numbers<[2], [2], [1], [1], [0, 0, 0, 1, 1, 1], [0], [0]>} : vector<2x24x8xbf16>, vector<2x24x8xbf16>, vector<2x24x24xf32> -> vector<2x24x24xf32>
    "tpu.trace_stop"() : () -> ()
    %cst_120 = arith.constant 0.353553385 : f32
    %244 = vector.broadcast %cst_120 : f32 to vector<2x24x24xf32>
    %245 = arith.mulf %243, %244 : vector<2x24x24xf32>
    %246 = vector.broadcast %30 : vector<2x1x24xf32> to vector<2x24x24xf32>
    %247 = arith.addf %245, %246 : vector<2x24x24xf32>
    %cst_121 = arith.constant dense<0xFF800000> : vector<2x24xf32>
    %248 = vector.multi_reduction <maximumf>, %247, %cst_121 [2] : vector<2x24x24xf32> to vector<2x24xf32>
    %249 = vector.shape_cast %248 : vector<2x24xf32> to vector<2x24x1xf32>
    %250 = vector.broadcast %249 : vector<2x24x1xf32> to vector<2x24x24xf32>
    %251 = arith.subf %247, %250 : vector<2x24x24xf32>
    %252 = math.exp %251 : vector<2x24x24xf32>
    %cst_122 = arith.constant dense<0.000000e+00> : vector<2x24xf32>
    %253 = vector.multi_reduction <add>, %252, %cst_122 [2] : vector<2x24x24xf32> to vector<2x24xf32>
    %254 = vector.shape_cast %253 : vector<2x24xf32> to vector<2x24x1xf32>
    %255 = tpu.reciprocal %254 : vector<2x24x1xf32> -> vector<2x24x1xf32>
    %256 = vector.broadcast %255 : vector<2x24x1xf32> to vector<2x24x24xf32>
    %257 = arith.mulf %252, %256 : vector<2x24x24xf32>
    %258 = arith.truncf %257 : vector<2x24x24xf32> to vector<2x24x24xbf16>
    "tpu.trace_start"() <{level = 10 : i32, message = "bqk,bkd->bqd"}> : () -> ()
    %cst_123 = arith.constant dense<0.000000e+00> : vector<2x24x8xf32>
    %259 = tpu.matmul %258, %242, %cst_123 {dimension_numbers = #tpu.dot_dimension_numbers<[2], [1], [1], [2], [0, 0, 0, 1, 1, 2], [0], [0]>} : vector<2x24x24xbf16>, vector<2x24x8xbf16>, vector<2x24x8xf32> -> vector<2x24x8xf32>
    "tpu.trace_stop"() : () -> ()
    %260 = vector.extract_strided_slice %219 {offsets = [0, 0, 16], sizes = [2, 24, 8], strides = [1, 1, 1]} : vector<2x24x96xbf16> to vector<2x24x8xbf16>
    %261 = vector.extract_strided_slice %219 {offsets = [0, 0, 48], sizes = [2, 24, 8], strides = [1, 1, 1]} : vector<2x24x96xbf16> to vector<2x24x8xbf16>
    %262 = vector.extract_strided_slice %219 {offsets = [0, 0, 80], sizes = [2, 24, 8], strides = [1, 1, 1]} : vector<2x24x96xbf16> to vector<2x24x8xbf16>
    "tpu.trace_start"() <{level = 10 : i32, message = "bqd,bkd->bqk"}> : () -> ()
    %cst_124 = arith.constant dense<0.000000e+00> : vector<2x24x24xf32>
    %263 = tpu.matmul %260, %261, %cst_124 {dimension_numbers = #tpu.dot_dimension_numbers<[2], [2], [1], [1], [0, 0, 0, 1, 1, 1], [0], [0]>} : vector<2x24x8xbf16>, vector<2x24x8xbf16>, vector<2x24x24xf32> -> vector<2x24x24xf32>
    "tpu.trace_stop"() : () -> ()
    %cst_125 = arith.constant 0.353553385 : f32
    %264 = vector.broadcast %cst_125 : f32 to vector<2x24x24xf32>
    %265 = arith.mulf %263, %264 : vector<2x24x24xf32>
    %266 = vector.broadcast %30 : vector<2x1x24xf32> to vector<2x24x24xf32>
    %267 = arith.addf %265, %266 : vector<2x24x24xf32>
    %cst_126 = arith.constant dense<0xFF800000> : vector<2x24xf32>
    %268 = vector.multi_reduction <maximumf>, %267, %cst_126 [2] : vector<2x24x24xf32> to vector<2x24xf32>
    %269 = vector.shape_cast %268 : vector<2x24xf32> to vector<2x24x1xf32>
    %270 = vector.broadcast %269 : vector<2x24x1xf32> to vector<2x24x24xf32>
    %271 = arith.subf %267, %270 : vector<2x24x24xf32>
    %272 = math.exp %271 : vector<2x24x24xf32>
    %cst_127 = arith.constant dense<0.000000e+00> : vector<2x24xf32>
    %273 = vector.multi_reduction <add>, %272, %cst_127 [2] : vector<2x24x24xf32> to vector<2x24xf32>
    %274 = vector.shape_cast %273 : vector<2x24xf32> to vector<2x24x1xf32>
    %275 = tpu.reciprocal %274 : vector<2x24x1xf32> -> vector<2x24x1xf32>
    %276 = vector.broadcast %275 : vector<2x24x1xf32> to vector<2x24x24xf32>
    %277 = arith.mulf %272, %276 : vector<2x24x24xf32>
    %278 = arith.truncf %277 : vector<2x24x24xf32> to vector<2x24x24xbf16>
    "tpu.trace_start"() <{level = 10 : i32, message = "bqk,bkd->bqd"}> : () -> ()
    %cst_128 = arith.constant dense<0.000000e+00> : vector<2x24x8xf32>
    %279 = tpu.matmul %278, %262, %cst_128 {dimension_numbers = #tpu.dot_dimension_numbers<[2], [1], [1], [2], [0, 0, 0, 1, 1, 2], [0], [0]>} : vector<2x24x24xbf16>, vector<2x24x8xbf16>, vector<2x24x8xf32> -> vector<2x24x8xf32>
    "tpu.trace_stop"() : () -> ()
    %280 = vector.extract_strided_slice %219 {offsets = [0, 0, 24], sizes = [2, 24, 8], strides = [1, 1, 1]} : vector<2x24x96xbf16> to vector<2x24x8xbf16>
    %281 = vector.extract_strided_slice %219 {offsets = [0, 0, 56], sizes = [2, 24, 8], strides = [1, 1, 1]} : vector<2x24x96xbf16> to vector<2x24x8xbf16>
    %282 = vector.extract_strided_slice %219 {offsets = [0, 0, 88], sizes = [2, 24, 8], strides = [1, 1, 1]} : vector<2x24x96xbf16> to vector<2x24x8xbf16>
    "tpu.trace_start"() <{level = 10 : i32, message = "bqd,bkd->bqk"}> : () -> ()
    %cst_129 = arith.constant dense<0.000000e+00> : vector<2x24x24xf32>
    %283 = tpu.matmul %280, %281, %cst_129 {dimension_numbers = #tpu.dot_dimension_numbers<[2], [2], [1], [1], [0, 0, 0, 1, 1, 1], [0], [0]>} : vector<2x24x8xbf16>, vector<2x24x8xbf16>, vector<2x24x24xf32> -> vector<2x24x24xf32>
    "tpu.trace_stop"() : () -> ()
    %cst_130 = arith.constant 0.353553385 : f32
    %284 = vector.broadcast %cst_130 : f32 to vector<2x24x24xf32>
    %285 = arith.mulf %283, %284 : vector<2x24x24xf32>
    %286 = vector.broadcast %30 : vector<2x1x24xf32> to vector<2x24x24xf32>
    %287 = arith.addf %285, %286 : vector<2x24x24xf32>
    %cst_131 = arith.constant dense<0xFF800000> : vector<2x24xf32>
    %288 = vector.multi_reduction <maximumf>, %287, %cst_131 [2] : vector<2x24x24xf32> to vector<2x24xf32>
    %289 = vector.shape_cast %288 : vector<2x24xf32> to vector<2x24x1xf32>
    %290 = vector.broadcast %289 : vector<2x24x1xf32> to vector<2x24x24xf32>
    %291 = arith.subf %287, %290 : vector<2x24x24xf32>
    %292 = math.exp %291 : vector<2x24x24xf32>
    %cst_132 = arith.constant dense<0.000000e+00> : vector<2x24xf32>
    %293 = vector.multi_reduction <add>, %292, %cst_132 [2] : vector<2x24x24xf32> to vector<2x24xf32>
    %294 = vector.shape_cast %293 : vector<2x24xf32> to vector<2x24x1xf32>
    %295 = tpu.reciprocal %294 : vector<2x24x1xf32> -> vector<2x24x1xf32>
    %296 = vector.broadcast %295 : vector<2x24x1xf32> to vector<2x24x24xf32>
    %297 = arith.mulf %292, %296 : vector<2x24x24xf32>
    %298 = arith.truncf %297 : vector<2x24x24xf32> to vector<2x24x24xbf16>
    "tpu.trace_start"() <{level = 10 : i32, message = "bqk,bkd->bqd"}> : () -> ()
    %cst_133 = arith.constant dense<0.000000e+00> : vector<2x24x8xf32>
    %299 = tpu.matmul %298, %282, %cst_133 {dimension_numbers = #tpu.dot_dimension_numbers<[2], [1], [1], [2], [0, 0, 0, 1, 1, 2], [0], [0]>} : vector<2x24x24xbf16>, vector<2x24x8xbf16>, vector<2x24x8xf32> -> vector<2x24x8xf32>
    "tpu.trace_stop"() : () -> ()
    %300 = tpu.concatenate %239, %259, %279, %299 in 2 : vector<2x24x8xf32>, vector<2x24x8xf32>, vector<2x24x8xf32>, vector<2x24x8xf32> -> vector<2x24x32xf32>
    %301 = vector.shape_cast %300 : vector<2x24x32xf32> to vector<48x32xf32>
    %302 = arith.truncf %301 : vector<48x32xf32> to vector<48x32xbf16>
    %c0_134 = arith.constant 0 : index
    %c1_135 = arith.constant 1 : index
    %c0_136 = arith.constant 0 : index
    %c0_137 = arith.constant 0 : index
    %303 = vector.load %arg10[%c0_134, %c1_135, %c0_136, %c0_137] : memref<1x2x32x32xbf16, #tpu.memory_space<vmem>>, vector<1x1x32x32xbf16>
    %304 = vector.shape_cast %303 : vector<1x1x32x32xbf16> to vector<32x32xbf16>
    %cst_138 = arith.constant dense<0.000000e+00> : vector<48x32xf32>
    %305 = tpu.matmul %302, %304, %cst_138 {dimension_numbers = #tpu.dot_dimension_numbers<[1], [0], [0], [1], [0, 0, 1, 1], [], []>} : vector<48x32xbf16>, vector<32x32xbf16>, vector<48x32xf32> -> vector<48x32xf32>
    %c0_139 = arith.constant 0 : index
    %c1_140 = arith.constant 1 : index
    %c0_141 = arith.constant 0 : index
    %c0_142 = arith.constant 0 : index
    %306 = vector.load %arg11[%c0_139, %c1_140, %c0_141, %c0_142] : memref<1x2x1x32xf32, #tpu.memory_space<vmem>>, vector<1x1x1x32xf32>
    %307 = vector.shape_cast %306 : vector<1x1x1x32xf32> to vector<1x32xf32>
    %308 = vector.broadcast %307 : vector<1x32xf32> to vector<48x32xf32>
    %309 = arith.addf %305, %308 : vector<48x32xf32>
    %310 = arith.addf %209, %309 : vector<48x32xf32>
    %c0_143 = arith.constant 0 : index
    %c1_144 = arith.constant 1 : index
    %c0_145 = arith.constant 0 : index
    %c0_146 = arith.constant 0 : index
    %311 = vector.load %arg12[%c0_143, %c1_144, %c0_145, %c0_146] : memref<1x2x1x32xf32, #tpu.memory_space<vmem>>, vector<1x1x1x32xf32>
    %312 = vector.shape_cast %311 : vector<1x1x1x32xf32> to vector<1x32xf32>
    %c0_147 = arith.constant 0 : index
    %c1_148 = arith.constant 1 : index
    %c0_149 = arith.constant 0 : index
    %c0_150 = arith.constant 0 : index
    %313 = vector.load %arg13[%c0_147, %c1_148, %c0_149, %c0_150] : memref<1x2x1x32xf32, #tpu.memory_space<vmem>>, vector<1x1x1x32xf32>
    %314 = vector.shape_cast %313 : vector<1x1x1x32xf32> to vector<1x32xf32>
    %cst_151 = arith.constant dense<0.000000e+00> : vector<48xf32>
    %315 = vector.multi_reduction <add>, %310, %cst_151 [1] : vector<48x32xf32> to vector<48xf32>
    %316 = vector.shape_cast %315 : vector<48xf32> to vector<48x1xf32>
    %cst_152 = arith.constant 3.200000e+01 : f32
    %317 = vector.broadcast %cst_152 : f32 to vector<48x1xf32>
    %318 = arith.divf %316, %317 : vector<48x1xf32>
    %319 = vector.broadcast %318 : vector<48x1xf32> to vector<48x32xf32>
    %320 = arith.subf %310, %319 : vector<48x32xf32>
    %321 = arith.mulf %320, %320 : vector<48x32xf32>
    %cst_153 = arith.constant dense<0.000000e+00> : vector<48xf32>
    %322 = vector.multi_reduction <add>, %321, %cst_153 [1] : vector<48x32xf32> to vector<48xf32>
    %323 = vector.shape_cast %322 : vector<48xf32> to vector<48x1xf32>
    %cst_154 = arith.constant 3.200000e+01 : f32
    %324 = vector.broadcast %cst_154 : f32 to vector<48x1xf32>
    %325 = arith.divf %323, %324 : vector<48x1xf32>
    %cst_155 = arith.constant 9.99999974E-6 : f32
    %326 = vector.broadcast %cst_155 : f32 to vector<48x1xf32>
    %327 = arith.addf %325, %326 : vector<48x1xf32>
    %328 = math.rsqrt %327 : vector<48x1xf32>
    %329 = vector.broadcast %328 : vector<48x1xf32> to vector<48x32xf32>
    %330 = arith.mulf %320, %329 : vector<48x32xf32>
    %331 = vector.broadcast %312 : vector<1x32xf32> to vector<48x32xf32>
    %332 = arith.mulf %330, %331 : vector<48x32xf32>
    %333 = vector.broadcast %314 : vector<1x32xf32> to vector<48x32xf32>
    %334 = arith.addf %332, %333 : vector<48x32xf32>
    %335 = arith.truncf %334 : vector<48x32xf32> to vector<48x32xbf16>
    %c0_156 = arith.constant 0 : index
    %c1_157 = arith.constant 1 : index
    %c0_158 = arith.constant 0 : index
    %c0_159 = arith.constant 0 : index
    %336 = vector.load %arg14[%c0_156, %c1_157, %c0_158, %c0_159] : memref<1x2x32x64xbf16, #tpu.memory_space<vmem>>, vector<1x1x32x64xbf16>
    %337 = vector.shape_cast %336 : vector<1x1x32x64xbf16> to vector<32x64xbf16>
    %cst_160 = arith.constant dense<0.000000e+00> : vector<48x64xf32>
    %338 = tpu.matmul %335, %337, %cst_160 {dimension_numbers = #tpu.dot_dimension_numbers<[1], [0], [0], [1], [0, 0, 1, 1], [], []>} : vector<48x32xbf16>, vector<32x64xbf16>, vector<48x64xf32> -> vector<48x64xf32>
    %c0_161 = arith.constant 0 : index
    %c1_162 = arith.constant 1 : index
    %c0_163 = arith.constant 0 : index
    %c0_164 = arith.constant 0 : index
    %339 = vector.load %arg15[%c0_161, %c1_162, %c0_163, %c0_164] : memref<1x2x1x64xf32, #tpu.memory_space<vmem>>, vector<1x1x1x64xf32>
    %340 = vector.shape_cast %339 : vector<1x1x1x64xf32> to vector<1x64xf32>
    %341 = vector.broadcast %340 : vector<1x64xf32> to vector<48x64xf32>
    %342 = arith.addf %338, %341 : vector<48x64xf32>
    %cst_165 = arith.constant 5.000000e-01 : f32
    %343 = vector.broadcast %cst_165 : f32 to vector<48x64xf32>
    %344 = arith.mulf %343, %342 : vector<48x64xf32>
    %cst_166 = arith.constant 4.471500e-02 : f32
    %345 = vector.broadcast %cst_166 : f32 to vector<48x64xf32>
    %346 = arith.mulf %345, %342 : vector<48x64xf32>
    %347 = arith.mulf %346, %342 : vector<48x64xf32>
    %348 = arith.mulf %347, %342 : vector<48x64xf32>
    %349 = arith.addf %342, %348 : vector<48x64xf32>
    %cst_167 = arith.constant 0.797884583 : f32
    %350 = vector.broadcast %cst_167 : f32 to vector<48x64xf32>
    %351 = arith.mulf %350, %349 : vector<48x64xf32>
    %352 = math.tanh %351 : vector<48x64xf32>
    %cst_168 = arith.constant 1.000000e+00 : f32
    %353 = vector.broadcast %cst_168 : f32 to vector<48x64xf32>
    %354 = arith.addf %353, %352 : vector<48x64xf32>
    %355 = arith.mulf %344, %354 : vector<48x64xf32>
    %356 = arith.truncf %355 : vector<48x64xf32> to vector<48x64xbf16>
    %c0_169 = arith.constant 0 : index
    %c1_170 = arith.constant 1 : index
    %c0_171 = arith.constant 0 : index
    %c0_172 = arith.constant 0 : index
    %357 = vector.load %arg16[%c0_169, %c1_170, %c0_171, %c0_172] : memref<1x2x64x32xbf16, #tpu.memory_space<vmem>>, vector<1x1x64x32xbf16>
    %358 = vector.shape_cast %357 : vector<1x1x64x32xbf16> to vector<64x32xbf16>
    %cst_173 = arith.constant dense<0.000000e+00> : vector<48x32xf32>
    %359 = tpu.matmul %356, %358, %cst_173 {dimension_numbers = #tpu.dot_dimension_numbers<[1], [0], [0], [1], [0, 0, 1, 1], [], []>} : vector<48x64xbf16>, vector<64x32xbf16>, vector<48x32xf32> -> vector<48x32xf32>
    %c0_174 = arith.constant 0 : index
    %c1_175 = arith.constant 1 : index
    %c0_176 = arith.constant 0 : index
    %c0_177 = arith.constant 0 : index
    %360 = vector.load %arg17[%c0_174, %c1_175, %c0_176, %c0_177] : memref<1x2x1x32xf32, #tpu.memory_space<vmem>>, vector<1x1x1x32xf32>
    %361 = vector.shape_cast %360 : vector<1x1x1x32xf32> to vector<1x32xf32>
    %362 = vector.broadcast %361 : vector<1x32xf32> to vector<48x32xf32>
    %363 = arith.addf %359, %362 : vector<48x32xf32>
    %364 = arith.addf %334, %363 : vector<48x32xf32>
    %c0_178 = arith.constant 0 : index
    %c1_179 = arith.constant 1 : index
    %c0_180 = arith.constant 0 : index
    %c0_181 = arith.constant 0 : index
    %365 = vector.load %arg18[%c0_178, %c1_179, %c0_180, %c0_181] : memref<1x2x1x32xf32, #tpu.memory_space<vmem>>, vector<1x1x1x32xf32>
    %366 = vector.shape_cast %365 : vector<1x1x1x32xf32> to vector<1x32xf32>
    %c0_182 = arith.constant 0 : index
    %c1_183 = arith.constant 1 : index
    %c0_184 = arith.constant 0 : index
    %c0_185 = arith.constant 0 : index
    %367 = vector.load %arg19[%c0_182, %c1_183, %c0_184, %c0_185] : memref<1x2x1x32xf32, #tpu.memory_space<vmem>>, vector<1x1x1x32xf32>
    %368 = vector.shape_cast %367 : vector<1x1x1x32xf32> to vector<1x32xf32>
    %cst_186 = arith.constant dense<0.000000e+00> : vector<48xf32>
    %369 = vector.multi_reduction <add>, %364, %cst_186 [1] : vector<48x32xf32> to vector<48xf32>
    %370 = vector.shape_cast %369 : vector<48xf32> to vector<48x1xf32>
    %cst_187 = arith.constant 3.200000e+01 : f32
    %371 = vector.broadcast %cst_187 : f32 to vector<48x1xf32>
    %372 = arith.divf %370, %371 : vector<48x1xf32>
    %373 = vector.broadcast %372 : vector<48x1xf32> to vector<48x32xf32>
    %374 = arith.subf %364, %373 : vector<48x32xf32>
    %375 = arith.mulf %374, %374 : vector<48x32xf32>
    %cst_188 = arith.constant dense<0.000000e+00> : vector<48xf32>
    %376 = vector.multi_reduction <add>, %375, %cst_188 [1] : vector<48x32xf32> to vector<48xf32>
    %377 = vector.shape_cast %376 : vector<48xf32> to vector<48x1xf32>
    %cst_189 = arith.constant 3.200000e+01 : f32
    %378 = vector.broadcast %cst_189 : f32 to vector<48x1xf32>
    %379 = arith.divf %377, %378 : vector<48x1xf32>
    %cst_190 = arith.constant 9.99999974E-6 : f32
    %380 = vector.broadcast %cst_190 : f32 to vector<48x1xf32>
    %381 = arith.addf %379, %380 : vector<48x1xf32>
    %382 = math.rsqrt %381 : vector<48x1xf32>
    %383 = vector.broadcast %382 : vector<48x1xf32> to vector<48x32xf32>
    %384 = arith.mulf %374, %383 : vector<48x32xf32>
    %385 = vector.broadcast %366 : vector<1x32xf32> to vector<48x32xf32>
    %386 = arith.mulf %384, %385 : vector<48x32xf32>
    %387 = vector.broadcast %368 : vector<1x32xf32> to vector<48x32xf32>
    %388 = arith.addf %386, %387 : vector<48x32xf32>
    %389 = vector.shape_cast %388 : vector<48x32xf32> to vector<2x24x32xf32>
    %390 = vector.extract_strided_slice %389 {offsets = [0, 0, 0], sizes = [2, 1, 32], strides = [1, 1, 1]} : vector<2x24x32xf32> to vector<2x1x32xf32>
    %391 = vector.shape_cast %390 : vector<2x1x32xf32> to vector<2x32xf32>
    %c0_191 = arith.constant 0 : index
    %c0_192 = arith.constant 0 : index
    %392 = vector.load %arg5[%c0_191, %c0_192] : memref<2x1xf32, #tpu.memory_space<vmem>>, vector<2x1xf32>
    %393 = vector.broadcast %392 : vector<2x1xf32> to vector<2x32xf32>
    %394 = arith.mulf %391, %393 : vector<2x32xf32>
    %c0_193 = arith.constant 0 : index
    %c0_194 = arith.constant 0 : index
    %c0_195 = arith.constant 0 : index
    %395 = vector.load %arg21[%c0_193, %c0_194, %c0_195] : memref<1x2x32xf32, #tpu.memory_space<vmem>>, vector<1x2x32xf32>
    %396 = vector.shape_cast %395 : vector<1x2x32xf32> to vector<2x32xf32>
    %397 = vector.shape_cast %394 : vector<2x32xf32> to vector<1x2x32xf32>
    tpu.vector_store %arg21[%c0_193, %c0_194, %c0_195], %397 {strides = array<i32>} : memref<1x2x32xf32, #tpu.memory_space<vmem>>, vector<1x2x32xf32>,
    %398 = arith.truncf %394 : vector<2x32xf32> to vector<2x32xbf16>
    %c0_196 = arith.constant 0 : index
    %c0_197 = arith.constant 0 : index
    %c0_198 = arith.constant 0 : index
    %399 = vector.load %arg20[%c0_196, %c0_197, %c0_198] : memref<1x32x3xbf16, #tpu.memory_space<vmem>>, vector<1x32x3xbf16>
    %400 = vector.shape_cast %399 : vector<1x32x3xbf16> to vector<32x3xbf16>
    %cst_199 = arith.constant dense<0.000000e+00> : vector<2x3xf32>
    %401 = tpu.matmul %398, %400, %cst_199 {dimension_numbers = #tpu.dot_dimension_numbers<[1], [0], [0], [1], [0, 0, 1, 1], [], []>} : vector<2x32xbf16>, vector<32x3xbf16>, vector<2x3xf32> -> vector<2x3xf32>
    %c0_200 = arith.constant 0 : index
    %c0_201 = arith.constant 0 : index
    %c0_202 = arith.constant 0 : index
    %402 = vector.load %arg22[%c0_200, %c0_201, %c0_202] : memref<1x2x3xf32, #tpu.memory_space<vmem>>, vector<1x2x3xf32>
    %403 = vector.shape_cast %402 : vector<1x2x3xf32> to vector<2x3xf32>
    %404 = vector.shape_cast %401 : vector<2x3xf32> to vector<1x2x3xf32>
    tpu.vector_store %arg22[%c0_200, %c0_201, %c0_202], %404 {strides = array<i32>} : memref<1x2x3xf32, #tpu.memory_space<vmem>>, vector<1x2x3xf32>,
    return
  }
  func.func @transform_0(%arg0: i32) -> (i32, i32) {
    %c0_i32 = arith.constant 0 : i32
    %c0_i32_0 = arith.constant 0 : i32
    %c0_i32_1 = arith.constant 0 : i32
    return %c0_i32, %c0_i32_0 : i32, i32
  }
  func.func @transform_1(%arg0: i32) -> (i32, i32) {
    %c0_i32 = arith.constant 0 : i32
    %c0_i32_0 = arith.constant 0 : i32
    %c0_i32_1 = arith.constant 0 : i32
    return %c0_i32, %c0_i32_0 : i32, i32
  }
  func.func @transform_2(%arg0: i32) -> (i32, i32, i32) {
    %c0_i32 = arith.constant 0 : i32
    %c0_i32_0 = arith.constant 0 : i32
    %c0_i32_1 = arith.constant 0 : i32
    return %arg0, %c0_i32, %c0_i32_0 : i32, i32, i32
  }
  func.func @transform_3(%arg0: i32) -> (i32, i32, i32) {
    %c0_i32 = arith.constant 0 : i32
    %c0_i32_0 = arith.constant 0 : i32
    %c0_i32_1 = arith.constant 0 : i32
    %c0_i32_2 = arith.constant 0 : i32
    return %c0_i32, %c0_i32_0, %c0_i32_1 : i32, i32, i32
  }
  func.func @transform_4(%arg0: i32) -> (i32, i32) {
    %c0_i32 = arith.constant 0 : i32
    %c0_i32_0 = arith.constant 0 : i32
    %c0_i32_1 = arith.constant 0 : i32
    return %c0_i32, %c0_i32_0 : i32, i32
  }
  func.func @transform_5(%arg0: i32) -> (i32, i32, i32) {
    %c0_i32 = arith.constant 0 : i32
    %c0_i32_0 = arith.constant 0 : i32
    %c0_i32_1 = arith.constant 0 : i32
    return %arg0, %c0_i32, %c0_i32_0 : i32, i32, i32
  }
  func.func @transform_6(%arg0: i32) -> (i32, i32, i32) {
    %c0_i32 = arith.constant 0 : i32
    %c0_i32_0 = arith.constant 0 : i32
    %c0_i32_1 = arith.constant 0 : i32
    return %arg0, %c0_i32, %c0_i32_0 : i32, i32, i32
  }
  func.func @transform_7(%arg0: i32) -> (i32, i32, i32, i32) {
    %c0_i32 = arith.constant 0 : i32
    %c0_i32_0 = arith.constant 0 : i32
    %c0_i32_1 = arith.constant 0 : i32
    %c0_i32_2 = arith.constant 0 : i32
    return %arg0, %c0_i32, %c0_i32_0, %c0_i32_1 : i32, i32, i32, i32
  }
  func.func @transform_8(%arg0: i32) -> (i32, i32, i32, i32) {
    %c0_i32 = arith.constant 0 : i32
    %c0_i32_0 = arith.constant 0 : i32
    %c0_i32_1 = arith.constant 0 : i32
    %c0_i32_2 = arith.constant 0 : i32
    return %arg0, %c0_i32, %c0_i32_0, %c0_i32_1 : i32, i32, i32, i32
  }
  func.func @transform_9(%arg0: i32) -> (i32, i32, i32, i32) {
    %c0_i32 = arith.constant 0 : i32
    %c0_i32_0 = arith.constant 0 : i32
    %c0_i32_1 = arith.constant 0 : i32
    %c0_i32_2 = arith.constant 0 : i32
    return %arg0, %c0_i32, %c0_i32_0, %c0_i32_1 : i32, i32, i32, i32
  }
  func.func @transform_10(%arg0: i32) -> (i32, i32, i32, i32) {
    %c0_i32 = arith.constant 0 : i32
    %c0_i32_0 = arith.constant 0 : i32
    %c0_i32_1 = arith.constant 0 : i32
    %c0_i32_2 = arith.constant 0 : i32
    return %arg0, %c0_i32, %c0_i32_0, %c0_i32_1 : i32, i32, i32, i32
  }
  func.func @transform_11(%arg0: i32) -> (i32, i32, i32, i32) {
    %c0_i32 = arith.constant 0 : i32
    %c0_i32_0 = arith.constant 0 : i32
    %c0_i32_1 = arith.constant 0 : i32
    %c0_i32_2 = arith.constant 0 : i32
    return %arg0, %c0_i32, %c0_i32_0, %c0_i32_1 : i32, i32, i32, i32
  }
  func.func @transform_12(%arg0: i32) -> (i32, i32, i32, i32) {
    %c0_i32 = arith.constant 0 : i32
    %c0_i32_0 = arith.constant 0 : i32
    %c0_i32_1 = arith.constant 0 : i32
    %c0_i32_2 = arith.constant 0 : i32
    return %arg0, %c0_i32, %c0_i32_0, %c0_i32_1 : i32, i32, i32, i32
  }
  func.func @transform_13(%arg0: i32) -> (i32, i32, i32, i32) {
    %c0_i32 = arith.constant 0 : i32
    %c0_i32_0 = arith.constant 0 : i32
    %c0_i32_1 = arith.constant 0 : i32
    %c0_i32_2 = arith.constant 0 : i32
    return %arg0, %c0_i32, %c0_i32_0, %c0_i32_1 : i32, i32, i32, i32
  }
  func.func @transform_14(%arg0: i32) -> (i32, i32, i32, i32) {
    %c0_i32 = arith.constant 0 : i32
    %c0_i32_0 = arith.constant 0 : i32
    %c0_i32_1 = arith.constant 0 : i32
    %c0_i32_2 = arith.constant 0 : i32
    return %arg0, %c0_i32, %c0_i32_0, %c0_i32_1 : i32, i32, i32, i32
  }
  func.func @transform_15(%arg0: i32) -> (i32, i32, i32, i32) {
    %c0_i32 = arith.constant 0 : i32
    %c0_i32_0 = arith.constant 0 : i32
    %c0_i32_1 = arith.constant 0 : i32
    %c0_i32_2 = arith.constant 0 : i32
    return %arg0, %c0_i32, %c0_i32_0, %c0_i32_1 : i32, i32, i32, i32
  }
  func.func @transform_16(%arg0: i32) -> (i32, i32, i32, i32) {
    %c0_i32 = arith.constant 0 : i32
    %c0_i32_0 = arith.constant 0 : i32
    %c0_i32_1 = arith.constant 0 : i32
    %c0_i32_2 = arith.constant 0 : i32
    return %arg0, %c0_i32, %c0_i32_0, %c0_i32_1 : i32, i32, i32, i32
  }
  func.func @transform_17(%arg0: i32) -> (i32, i32, i32, i32) {
    %c0_i32 = arith.constant 0 : i32
    %c0_i32_0 = arith.constant 0 : i32
    %c0_i32_1 = arith.constant 0 : i32
    %c0_i32_2 = arith.constant 0 : i32
    return %arg0, %c0_i32, %c0_i32_0, %c0_i32_1 : i32, i32, i32, i32
  }
  func.func @transform_18(%arg0: i32) -> (i32, i32, i32, i32) {
    %c0_i32 = arith.constant 0 : i32
    %c0_i32_0 = arith.constant 0 : i32
    %c0_i32_1 = arith.constant 0 : i32
    %c0_i32_2 = arith.constant 0 : i32
    return %arg0, %c0_i32, %c0_i32_0, %c0_i32_1 : i32, i32, i32, i32
  }
  func.func @transform_19(%arg0: i32) -> (i32, i32, i32) {
    %c0_i32 = arith.constant 0 : i32
    %c0_i32_0 = arith.constant 0 : i32
    %c0_i32_1 = arith.constant 0 : i32
    return %arg0, %c0_i32, %c0_i32_0 : i32, i32, i32
  }
  func.func @transform_20(%arg0: i32) -> (i32, i32, i32) {
    %c0_i32 = arith.constant 0 : i32
    %c0_i32_0 = arith.constant 0 : i32
    %c0_i32_1 = arith.constant 0 : i32
    return %arg0, %c0_i32, %c0_i32_0 : i32, i32, i32
  }
  func.func @transform_21(%arg0: i32) -> (i32, i32, i32) {
    %c0_i32 = arith.constant 0 : i32
    %c0_i32_0 = arith.constant 0 : i32
    %c0_i32_1 = arith.constant 0 : i32
    return %arg0, %c0_i32, %c0_i32_0 : i32, i32, i32
  }
}

</mosaic_0001>

<bundles_post_ra>
// kernel: tile.8
= control target key start
LH: loop header
LB: loop body
LE: loop exit
PB: predicated region body
PF: predicated region fallthrough
CT: control target
= control target key end

     0   :  { %s22_s0 = inlined_call_operand.vmem [shape: f32[24], index: 0, kind: input, shape index: {}]   ;;  %s23_s1 = inlined_call_operand.vmem [shape: f32[2,24], index: 1, kind: output, shape index: {}]  }
   0x1   :  { %v4_v0 = vld [vmem:[%s22_s0] ss:$0 sm:$0xff] }
   0x2   :  { %5 = vst [vmem:[%s23_s1] sm:$0x3] %v4_v0 }

// kernel: tile.0
= control target key start
LH: loop header
LB: loop body
LE: loop exit
PB: predicated region body
PF: predicated region fallthrough
CT: control target
= control target key end

     0   :  { %s226_s8 = smov 125   ;;  %s227_s9 = smov 126   ;;  %vm7_vm0 = vcmask 7168   ;;  %s357_s0 = inlined_call_operand.vmem [shape: f32[2,24], index: 0, kind: input, shape index: {}]   ;;  %s358_s1 = inlined_call_operand.vmem [shape: f32[48,1], index: 1, kind: output, shape index: {}]  }
   0x1   :  { %v4_v0 = vld [vmem:[%s357_s0] sm:$0x3]  ;;  %s225_s0 = smov 127   ;;  %s228_s10 = smov 124  }
   0x2   :  { %5 = vst [vmem:[#allocation0] sm:$0x3] %v4_v0  ;;  %s52_s11 = smov 3  ;;  %s229_s12 = smov 123  }
   0x3   :  { %s230_s13 = smov 122   ;;  %s60_s14 = smov 3 }
   0x4   :  { %s68_s15 = smov 3  ;;  %s231_s16 = smov 121  }
   0x5   :  { %s232_s17 = smov 120   ;;  %s76_s18 = smov 3 }
   0x6   :  { %s84_s19 = smov 3  ;;  %s233_s20 = smov 119  }
   0x7   :  { %s234_s21 = smov 118   ;;  %s92_s22 = smov 3 }
   0x8   :  { %s100_s23 = smov 3  ;;  %s235_s24 = smov 117  }
   0x9   :  { %v9_v1 = vld [vmem:[#allocation0] sm:$0x3]   ;;  %s236_s25 = smov 116   ;;  %s108_s26 = smov 3 }
   0xa   :  { %v21_v2 = vld [vmem:[#allocation0] sm:$0x3]   ;;  %10 = vrot.lane.b32.xlu0 %v9_v1, %s225_s0  ;;  %s116_s27 = smov 3  ;;  %s237_s28 = smov 115  }
   0xb   :  { %22 = vrot.lane.b32.xlu1 %v21_v2, %s226_s8  ;;  %v15_v3 = vld [vmem:[#allocation0] sm:$0x3]   ;;  %s238_s29 = smov 114   ;;  %s124_s30 = smov 3 }
   0xc   :  { %v27_v4 = vld [vmem:[#allocation0] sm:$0x3]   ;;  %s132_s2 = smov 3  ;;  %s239_s3 = smov 113  }
   0xd   :  { %v33_v5 = vld [vmem:[#allocation0] sm:$0x3]   ;;  %s240_s4 = smov 112   ;;  %s140_s5 = smov 3 }
   0xe   :  { %16 = vrot.lane.b32.xlu0 %v15_v3, %s227_s9  ;;  %v39_v6 = vld [vmem:[#allocation0] sm:$0x3]   ;;  %s148_s6 = smov 3  ;;  %s241_s8 = smov 111  }
   0xf   :  { %28 = vrot.lane.b32.xlu1 %v27_v4, %s228_s10  ;;  %v45_v7 = vld [vmem:[#allocation0] sm:$0x3]   ;;  %s242_s9 = smov 110   ;;  %s156_s10 = smov 3 }
  0x10   :  { %v53_v8 = vld [vmem:[#allocation0 + $0x1] ss:$-1 sm:%s52_s11]   ;;  %s164_s11 = smov 3 }
  0x11   :  { %v61_v9 = vld [vmem:[#allocation0 + $0x1] ss:$-1 sm:%s60_s14]   ;;  %s172_s14 = smov 3 }
  0x12   :  { %34 = vrot.lane.b32.xlu0 %v33_v5, %s229_s12  ;;  %v69_v10 = vld [vmem:[#allocation0 + $0x1] ss:$-1 sm:%s68_s15]   ;;  %s243_s12 = smov 109   ;;  %s245_s15 = smov 107  }
  0x13   :  { %40 = vrot.lane.b32.xlu1 %v39_v6, %s230_s13  ;;  %v77_v11 = vld [vmem:[#allocation0 + $0x1] ss:$-1 sm:%s76_s18]   ;;  %s244_s13 = smov 108  }
  0x14   :  { %v85_v12 = vld [vmem:[#allocation0 + $0x1] ss:$-1 sm:%s84_s19]  }
  0x15   :  { %v93_v13 = vld [vmem:[#allocation0 + $0x1] ss:$-1 sm:%s92_s22]  }
  0x16   :  { %46 = vrot.lane.b32.xlu0 %v45_v7, %s231_s16  ;;  %v101_v14 = vld [vmem:[#allocation0 + $0x1] ss:$-1 sm:%s100_s23]   ;;  %s246_s16 = smov 106  }
  0x17   :  { %54 = vrot.lane.b32.xlu1 %v53_v8, %s232_s17  ;;  %v109_v15 = vld [vmem:[#allocation0 + $0x1] ss:$-1 sm:%s108_s26]   ;;  %s247_s17 = smov 105  }
  0x18   :  { %v117_v16 = vld [vmem:[#allocation0 + $0x1] ss:$-1 sm:%s116_s27]  }
  0x19   :  { %v125_v17 = vld [vmem:[#allocation0 + $0x1] ss:$-1 sm:%s124_s30]  }
  0x1a   :  { %62 = vrot.lane.b32.xlu0 %v61_v9, %s233_s20  ;;  %v133_v18 = vld [vmem:[#allocation0 + $0x1] ss:$-1 sm:%s132_s2]  }
  0x1b   :  { %70 = vrot.lane.b32.xlu1 %v69_v10, %s234_s21  ;;  %v6_v19 = vld [vmem:[#allocation0] sm:$0x3]  }
  0x1c   :  { %8 = vst.msk [vmem:[%s358_s1] ss:$24 sm:$0x3] %vm7_vm0, %v6_v19   ;;  %v141_v20 = vld [vmem:[#allocation0 + $0x1] ss:$-1 sm:%s140_s5]  }
  0x1d   :  { %v149_v21 = vld [vmem:[#allocation0 + $0x1] ss:$-1 sm:%s148_s6]  }
  0x1e   :  { %78 = vrot.lane.b32.xlu0 %v77_v11, %s235_s24  ;;  %v157_v22 = vld [vmem:[#allocation0 + $0x1] ss:$-1 sm:%s156_s10]  }
  0x1f   :  { %86 = vrot.lane.b32.xlu1 %v85_v12, %s236_s25  ;;  %v165_v23 = vld [vmem:[#allocation0 + $0x1] ss:$-1 sm:%s164_s11]  }
  0x20   :  { %v173_v24 = vld [vmem:[#allocation0 + $0x1] ss:$-1 sm:%s172_s14]  }
  0x22   :  { %94 = vrot.lane.b32.xlu0 %v93_v13, %s237_s28 }
  0x23   :  { %102 = vrot.lane.b32.xlu1 %v101_v14, %s238_s29 }
  0x26   :  { %110 = vrot.lane.b32.xlu0 %v109_v15, %s239_s3 }
  0x27   :  { %118 = vrot.lane.b32.xlu1 %v117_v16, %s240_s4 }
  0x2a   :  { %126 = vrot.lane.b32.xlu0 %v125_v17, %s241_s8 }
  0x2b   :  { %134 = vrot.lane.b32.xlu1 %v133_v18, %s242_s9 }
  0x2e   :  { %142 = vrot.lane.b32.xlu0 %v141_v20, %s243_s12 }
  0x2f   :  { %150 = vrot.lane.b32.xlu1 %v149_v21, %s244_s13 }
  0x32   :  { %158 = vrot.lane.b32.xlu0 %v157_v22, %s245_s15 }
  0x33   :  { %166 = vrot.lane.b32.xlu1 %v165_v23, %s246_s16 }
  0x36   :  { %174 = vrot.lane.b32.xlu0 %v173_v24, %s247_s17 }
  0x7c   :  { %v11_v25 = vpop.permute.xlu0 %10  }
  0x7d   :  { %v23_v26 = vpop.permute.xlu1 %22   ;;  %179 = vst.msk [vmem:[%s358_s1 + $0x1] ss:$24 sm:$0x3] %vm7_vm0, %v11_v25  }
  0x7e   :  { %181 = vst.msk [vmem:[%s358_s1 + $0x3] ss:$24 sm:$0x3] %vm7_vm0, %v23_v26  }
  0x80   :  { %v17_v27 = vpop.permute.xlu0 %16  }
  0x81   :  { %v29_v28 = vpop.permute.xlu1 %28   ;;  %180 = vst.msk [vmem:[%s358_s1 + $0x2] ss:$24 sm:$0x3] %vm7_vm0, %v17_v27  }
  0x82   :  { %182 = vst.msk [vmem:[%s358_s1 + $0x4] ss:$24 sm:$0x3] %vm7_vm0, %v29_v28  }
  0x84   :  { %v35_v29 = vpop.permute.xlu0 %34  }
  0x85   :  { %v41_v30 = vpop.permute.xlu1 %40   ;;  %183 = vst.msk [vmem:[%s358_s1 + $0x5] ss:$24 sm:$0x3] %vm7_vm0, %v35_v29  }
  0x86   :  { %184 = vst.msk [vmem:[%s358_s1 + $0x6] ss:$24 sm:$0x3] %vm7_vm0, %v41_v30  }
  0x88   :  { %v47_v31 = vpop.permute.xlu0 %46  }
  0x89   :  { %v55_v32 = vpop.permute.xlu1 %54   ;;  %185 = vst.msk [vmem:[%s358_s1 + $0x7] ss:$24 sm:$0x3] %vm7_vm0, %v47_v31  }
  0x8a   :  { %186 = vst.msk [vmem:[%s358_s1 + $0x20] ss:$-24 sm:$0x3] %vm7_vm0, %v55_v32  }
  0x8c   :  { %v63_v33 = vpop.permute.xlu0 %62  }
  0x8d   :  { %v71_v34 = vpop.permute.xlu1 %70   ;;  %187 = vst.msk [vmem:[%s358_s1 + $0x21] ss:$-24 sm:$0x3] %vm7_vm0, %v63_v33  }
  0x8e   :  { %188 = vst.msk [vmem:[%s358_s1 + $0x22] ss:$-24 sm:$0x3] %vm7_vm0, %v71_v34  }
  0x90   :  { %v79_v35 = vpop.permute.xlu0 %78  }
  0x91   :  { %v87_v36 = vpop.permute.xlu1 %86   ;;  %189 = vst.msk [vmem:[%s358_s1 + $0x23] ss:$-24 sm:$0x3] %vm7_vm0, %v79_v35  }
  0x92   :  { %190 = vst.msk [vmem:[%s358_s1 + $0x24] ss:$-24 sm:$0x3] %vm7_vm0, %v87_v36  }
  0x94   :  { %v95_v37 = vpop.permute.xlu0 %94  }
  0x95   :  { %v103_v38 = vpop.permute.xlu1 %102   ;;  %191 = vst.msk [vmem:[%s358_s1 + $0x25] ss:$-24 sm:$0x3] %vm7_vm0, %v95_v37  }
  0x96   :  { %192 = vst.msk [vmem:[%s358_s1 + $0x26] ss:$-24 sm:$0x3] %vm7_vm0, %v103_v38  }
  0x98   :  { %v111_v39 = vpop.permute.xlu0 %110  }
  0x99   :  { %v119_v40 = vpop.permute.xlu1 %118   ;;  %193 = vst.msk [vmem:[%s358_s1 + $0x27] ss:$-24 sm:$0x3] %vm7_vm0, %v111_v39  }
  0x9a   :  { %194 = vst.msk [vmem:[%s358_s1 + $0x28] ss:$-24 sm:$0x3] %vm7_vm0, %v119_v40  }
  0x9c   :  { %v127_v41 = vpop.permute.xlu0 %126  }
  0x9d   :  { %v135_v42 = vpop.permute.xlu1 %134   ;;  %195 = vst.msk [vmem:[%s358_s1 + $0x29] ss:$-24 sm:$0x3] %vm7_vm0, %v127_v41  }
  0x9e   :  { %196 = vst.msk [vmem:[%s358_s1 + $0x2a] ss:$-24 sm:$0x3] %vm7_vm0, %v135_v42  }
  0xa0   :  { %v143_v43 = vpop.permute.xlu0 %142  }
  0xa1   :  { %v151_v44 = vpop.permute.xlu1 %150   ;;  %197 = vst.msk [vmem:[%s358_s1 + $0x2b] ss:$-24 sm:$0x3] %vm7_vm0, %v143_v43  }
  0xa2   :  { %198 = vst.msk [vmem:[%s358_s1 + $0x2c] ss:$-24 sm:$0x3] %vm7_vm0, %v151_v44  }
  0xa4   :  { %v159_v45 = vpop.permute.xlu0 %158  }
  0xa5   :  { %v167_v46 = vpop.permute.xlu1 %166   ;;  %199 = vst.msk [vmem:[%s358_s1 + $0x2d] ss:$-24 sm:$0x3] %vm7_vm0, %v159_v45  }
  0xa6   :  { %200 = vst.msk [vmem:[%s358_s1 + $0x2e] ss:$-24 sm:$0x3] %vm7_vm0, %v167_v46  }
  0xa8   :  { %v175_v47 = vpop.permute.xlu0 %174  }
  0xa9   :  { %201 = vst.msk [vmem:[%s358_s1 + $0x2f] ss:$-24 sm:$0x3] %vm7_vm0, %v175_v47  }

// kernel: dass_forward.1
= control target key start
LH: loop header
LB: loop body
LE: loop exit
PB: predicated region body
PF: predicated region fallthrough
CT: control target
= control target key end

     0   :  { %s8327_s0 = inlined_call_operand.vmem [shape: f32[48,4], index: 0, kind: input, shape index: {}]   ;;  %s8328_s1 = inlined_call_operand.vmem [shape: f32[48,1], index: 1, kind: input, shape index: {}]   ;;  %s8329_s2 = inlined_call_operand.vmem [shape: f32[2,48,32], index: 2, kind: input, shape index: {}]   ;;  %s8330_s3 = inlined_call_operand.vmem [shape: f32[2,1,24], index: 3, kind: input, shape index: {}]   ;;  %s8331_s4 = inlined_call_operand.vmem [shape: f32[2,1], index: 4, kind: input, shape index: {}]   ;;  %s8332_s5 = inlined_call_operand.vmem [shape: bf16[2,4,32], index: 5, kind: input, shape index: {}]   ;;  %s8333_s6 = inlined_call_operand.vmem [shape: f32[2,1,32], index: 6, kind: input, shape index: {}]   ;;  %s8334_s7 = inlined_call_operand.vmem [shape: bf16[2,2,32,96], index: 7, kind: input, shape index: {}]   ;;  %s8335_s8 = inlined_call_operand.vmem [shape: f32[2,2,1,96], index: 8, kind: input, shape index: {}]   ;;  %s8336_s9 = inlined_call_operand.vmem [shape: bf16[2,2,32,32], index: 9, kind: input, shape index: {}]   ;;  %s8337_s10 = inlined_call_operand.vmem [shape: f32[2,2,1,32], index: 10, kind: input, shape index: {}]   ;;  %s8338_s11 = inlined_call_operand.vmem [shape: f32[2,2,1,32], index: 11, kind: input, shape index: {}]   ;;  %s8339_s12 = inlined_call_operand.vmem [shape: f32[2,2,1,32], index: 12, kind: input, shape index: {}]   ;;  %s8340_s13 = inlined_call_operand.vmem [shape: bf16[2,2,32,64], index: 13, kind: input, shape index: {}]   ;;  %s8341_s14 = inlined_call_operand.vmem [shape: f32[2,2,1,64], index: 14, kind: input, shape index: {}]   ;;  %s8342_s15 = inlined_call_operand.vmem [shape: bf16[2,2,64,32], index: 15, kind: input, shape index: {}]   ;;  %s8343_s16 = inlined_call_operand.vmem [shape: f32[2,2,1,32], index: 16, kind: input, shape index: {}]   ;;  %s8344_s17 = inlined_call_operand.vmem [shape: f32[2,2,1,32], index: 17, kind: input, shape index: {}]   ;;  %s8345_s18 = inlined_call_operand.vmem [shape: f32[2,2,1,32], index: 18, kind: input, shape index: {}]   ;;  %s8346_s19 = inlined_call_operand.vmem [shape: bf16[2,32,3], index: 19, kind: input, shape index: {}]   ;;  %s8347_s20 = inlined_call_operand.vmem [shape: f32[2,2,32], index: 20, kind: output, shape index: {0}]   ;;  %s8348_s21 = inlined_call_operand.vmem [shape: f32[2,2,3], index: 21, kind: output, shape index: {1}]  }
   0x1   :  { %8382 = sst [smem:[#allocation3_spill]] %s8327_s0 }
   0x2   :  { %8383 = sst [smem:[#allocation4_spill]] %s8328_s1 }
   0x3   :  { %8384 = sst [smem:[#allocation5_spill]] %s8329_s2  ;;  %s7067_s2 = smov 0  }
   0x4   :  { %8385 = sst [smem:[#allocation6_spill]] %s8330_s3 }
   0x5   :  { %8386 = sst [smem:[#allocation7_spill]] %s8331_s4 }
   0x6   :  { %8387 = sst [smem:[#allocation8_spill]] %s8332_s5 }
   0x7   :  { %8388 = sst [smem:[#allocation9_spill]] %s8333_s6 }
   0x8   :  { %8389 = sst [smem:[#allocation10_spill]] %s8346_s19 }
   0x9   :  { %8390 = sst [smem:[#allocation11_spill]] %s8347_s20 }
   0xa   :  { %8391 = sst [smem:[#allocation12_spill]] %s8348_s21 }
   0xb LB: > { %8392 = sst [smem:[#allocation2_spill]] %s6938_s2  ;;  %s5682_s25 = sadd.s32 4294967295, %s6938_s2   ;;  %s6938_s2 = sphi %s7067_s2, %s32_s2  }
   0xc   : > { %p5686_p0 = scmp.ge.s32.totalorder %s6938_s2, 1  ;;  %p729_p1 = scmp.lt.s32.totalorder %s6938_s2, 3 }
   0xe   : > { %p730_p2 = pnand %p5686_p0, %p729_p1 }
   0xf   : > { %p856_p3 = scmp.lt.s32.totalorder (!%p730_p2), %s5682_s25, 1  ;;  %v6940_v0 = vmov (!%p730_p2), 0.0   ;;  %vm6941_vm0 = vmmov (!%p730_p2), 0   ;;  %s8393_s3 = sld [smem:[#allocation4_spill]] (!%p730_p2)  ;;  %v6942_v4 = vmov (!%p730_p2), 0   ;;  %vm961_vm1 = vcmask (!%p730_p2), 1041408  }
  0x10   : > { %733 = sbr.rel (%p730_p2) target bundleno = 9182 (0x23de), region = 100  ;;  %6056 = vmatprep.subr.bf16.mxu0 (!%p730_p2), %v6940_v0  ;;  %6470 = vmatprep.subr.bf16.mxu1 (!%p730_p2), %v6940_v0  ;;  %s8394_s30 = sld [smem:[#allocation3_spill]] (!%p730_p2)  ;;  %vm951_vm2 = vcmask (!%p730_p2), 31744   ;;  %vm1164_vm3 = vcmask (!%p730_p2), 261120   ;;  %vm1241_vm4 = vcmask (!%p730_p2), 64512   ;;  %vm1392_vm5 = vcmask (!%p730_p2), 195584  }
  0x11   : > { %6058 = vmatprep.mubr.msk.bf16.mxu0 (!%p730_p2), %vm6941_vm0, %v6940_v0  ;;  %6066 = vmatprep.mubr.msk.bf16.mxu1 (!%p730_p2), %vm6941_vm0, %v6940_v0  ;;  %s8395_s4 = sld [smem:[#allocation8_spill]] (!%p730_p2)  ;;  %s8396_s6 = sld [smem:[#allocation9_spill]] (!%p730_p2)  ;;  %vm1474_vm6 = vcmask (!%p730_p2), 1043456   ;;  %vm2692_vm7 = vcmask (!%p730_p2), 130048   ;;  %vm3096_vm8 = vcmask (!%p730_p2), 523264   ;;  %vm5346_vm9 = vcmask (!%p730_p2), 1041409  }
  0x12   : > { %6546 = vset.pattern.permute.xlu0 (!%p730_p2), %v6942_v4  ;;  %6547 = vset.pattern.permute.xlu1 (!%p730_p2), %v6942_v4  ;;  %s8379_s26 = smov (!%p730_p2), 96   ;;  %s8367_s0 = smov (!%p730_p2), 120   ;;  %vm5349_vm10 = vcmask (!%p730_p2), 254976   ;;  %vm5419_vm11 = vcmask (!%p730_p2), 17408  }
  0x13   : > { %s8365_s23 = smov (!%p730_p2), 56   ;;  %s8363_s27 = smov (!%p730_p2), 80  }
  0x14   : > { %s8353_s21 = smov (!%p730_p2), 48  }
  0x15   : > { %v1082_v1 = vld [vmem:[%s8393_s3] sm:$0xff] (!%p730_p2)  ;;  %v1084_v2 = vld [vmem:[%s8393_s3 + $0x10] sm:$0xff] (!%p730_p2)  ;;  %v1083_v8 = vld [vmem:[%s8393_s3 + $0x8] sm:$0xff] (!%p730_p2) }
  0x16   : > { %v934_v3 = vld [vmem:[%s8394_s30] sm:$0xff] (!%p730_p2)  ;;  %v935_v5 = vld [vmem:[%s8394_s30 + $0x8] sm:$0xff] (!%p730_p2)  ;;  %1090 = vperm.xlu0 (!%p730_p2), %6546, %v1082_v1   ;;  %1100 = vperm.xlu1 (!%p730_p2), %6547, %v1084_v2   ;;  %v1085_v9 = vld [vmem:[%s8393_s3 + $0x18] sm:$0xff] (!%p730_p2) }
  0x17   : > { %s8419_s25 = smov (!%p856_p3, %s5682_s25), 1  ;;  %v938_v6 = vld [vmem:[%s8394_s30 + $0x20] sm:$0xff]  ;;  %v939_v7 = vld [vmem:[%s8394_s30 + $0x28] sm:$0xff]  ;;  %v940_v12 = vpack.c.bf16 %v935_v5, %v934_v3  ;;  %v936_v16 = vld [vmem:[%s8394_s30 + $0x10] sm:$0xff] }
  0x18   : > { %s7093_s5 = sshll.u32 %s8419_s25, 1  ;;  %s5875_s22 = sshll.u32 %s8419_s25, 6  ;;  %v942_v13 = vpack.c.bf16 %v939_v7, %v938_v6  ;;  %v1086_v14 = vld [vmem:[%s8393_s3 + $0x20] sm:$0xff]  ;;  %v1087_v15 = vld [vmem:[%s8393_s3 + $0x28] sm:$0xff]  ;;  %v937_v17 = vld [vmem:[%s8394_s30 + $0x18] sm:$0xff] }
  0x19   : > { %s864_s2 = scalar_lea.vmem %s8395_s4, %s7093_s5  ;;  %s7112_s19 = scalar_lea.vmem %s8342_s15, %s5875_s22  ;;  %v941_v18 = vpack.c.bf16 %v937_v17, %v936_v16 }
  0x1a   : > { %v943_v10 = vld [vmem:[%s864_s2] sm:$0x3]  ;;  %1095 = vperm.xlu0 %6546, %v1083_v8   ;;  %1105 = vperm.xlu1 %6547, %v1085_v9   ;;  %s7141_s4 = sshll.u32 %s8419_s25, 5  ;;  %s867_s28 = scalar_lea.vmem %s8396_s6, %s8419_s25 }
  0x1b   : > { %v963_v11 = vsel %vm961_vm1, %v943_v10, 0  ;;  %s7147_s24 = scalar_lea.vmem %s8334_s7, %s7141_s4  ;;  %v5709_v21 = vld [vmem:[%s867_s28] ss:$0 sm:$0xff]  ;;  %s6520_s20 = smul.u32 48, %s8419_s25 }
  0x1c   : > { %6057 = vmatpush3.bf16.msra.mxu0 %v963_v11  ;;  %6471 = vmatpush3.bf16.msra.mxu1 %v963_v11  ;;  %v6638_v19 = vld [vmem:[%s7147_s24] sm:$0xff]   ;;  %v6639_v20 = vld [vmem:[%s7147_s24 + $0x8] sm:$0xff]   ;;  %s8397_s22 = sld [smem:[#allocation5_spill]]  ;;  %s7211_s1 = scalar_lea.vmem %s8335_s8, %s7093_s5 }
  0x1d   : > { %6070 = vmatprep.subr.bf16.mxu1 %v6940_v0  ;;  %s8359_s28 = smov 112   ;;  %s8357_s2 = smov 72  }
  0x1e   : > { %1110 = vperm.xlu0 %6546, %v1086_v14   ;;  %1115 = vperm.xlu1 %6547, %v1087_v15   ;;  %s7755_s6 = scalar_lea.vmem %s8345_s18, %s7093_s5  ;;  %s8399_s3 = smov 96  }
  0x1f   : > { %6059 = vmatmul.mubr.msk.bf16.vlgmr.msra.gmra.mrb[0].mxu0 %vm951_vm2, %v940_v12  ;;  %6067 = vmatmul.mubr.msk.bf16.vlgmr.msra.gmra.mrb[0].mxu1 %vm951_vm2, %v942_v13 }
  0x20   : > { %6062 = vmatprep.mubr.msk.bf16.mxu0 %vm6941_vm0, %v6940_v0  ;;  %6074 = vmatprep.mubr.msk.bf16.mxu1 %vm6941_vm0, %v6940_v0 }
  0x21   : > { %6071 = vmatpush3.bf16.msra.mxu1 %v6638_v19 }
  0x22   : > { %6072 = vmatprep.subr.bf16.mxu1 %v6940_v0  ;;  %s7172_s29 = scalar_lea.vmem %s8397_s22, %s6520_s20  ;;  %s8398_s20 = sld [smem:[#allocation6_spill]] }
  0x23   : > { %s8377_s22 = smov 64  }
  0x25   : > { %6073 = vmatpush3.bf16.msra.mxu1 %v6639_v20 }
  0x27   : > { %6063 = vmatmul.mubr.msk.bf16.gmra.mrb[4].mxu0 %vm951_vm2, %v941_v18 }
  0x95   : > { %v1091_v14 = vpop.permute.xlu0 %1090 }
  0xf2   : > { %v999_v22 = vpop.f32.mrb[0].mxu0  ;;  %v1015_v23 = vpop.f32.mrb[0].mxu1 }
  0xf3   : > { %v1000_v24 = vadd.f32 %v5709_v21, %v999_v22  ;;  %v1016_v25 = vadd.f32 %v5709_v21, %v1015_v23  ;;  %v6060_v26 = vpop.f32.mrb[1].mxu0  ;;  %v6068_v27 = vpop.f32.mrb[1].mxu1 }
  0xf4   : > { %v1002_v28 = vpop.f32.mrb[2].mxu0  ;;  %v1018_v29 = vpop.f32.mrb[2].mxu1  ;;  %v1125_v26 = vld [vmem:[%s7172_s29 + $0x8] sm:$0xff] }
  0xf5   : > { %v1022_v30 = vmul.f32 0.999995, %v1000_v24  ;;  %v7156_v31 = vmul.f32 0.999995, %v1016_v25  ;;  %v1003_v32 = vadd.f32 %v5709_v21, %v1002_v28  ;;  %v1019_v33 = vadd.f32 %v5709_v21, %v1018_v29  ;;  %v6061_v34 = vpop.f32.mrb[3].mxu0  ;;  %v6069_v35 = vpop.f32.mrb[3].mxu1 }
  0xf6   : > { %v1124_v24 = vld [vmem:[%s7172_s29] sm:$0xff]  ;;  %v1096_v25 = vpop.permute.xlu0 %1095 }
  0xf7   : > { %v1034_v36 = vmul.f32 0.044715, %v1022_v30  ;;  %v1038_v37 = vmul.f32 0.044715, %v7156_v31  ;;  %v1023_v38 = vmul.f32 0.999995, %v1003_v32 }
  0xf8   : > { %v7159_v39 = vmul.f32 0.999995, %v1019_v33  ;;  %v1028_v15 = vmul.f32 0.5, %v1022_v30 }
  0xf9   : > { %v1035_v40 = vmul.f32 0.044715, %v1023_v38  ;;  %v1040_v41 = vmul.f32 %v1034_v36, %v1022_v30  ;;  %v1044_v44 = vmul.f32 %v1038_v37, %v7156_v31  ;;  %v1029_v19 = vmul.f32 0.5, %v1023_v38 }
  0xfa   : > { %v1039_v42 = vmul.f32 0.044715, %v7159_v39  ;;  %v1007_v43 = vpop.f32.mrb[4].mxu0 }
  0xfb   : > { %v1008_v45 = vadd.f32 %v5709_v21, %v1007_v43  ;;  %v6064_v46 = vpop.f32.mrb[5].mxu0  ;;  %v1046_v47 = vmul.f32 %v1040_v41, %v1022_v30  ;;  %v1041_v48 = vmul.f32 %v1035_v40, %v1023_v38  ;;  %v1050_v56 = vmul.f32 %v1044_v44, %v7156_v31 }
  0xfc   : > { %v1010_v49 = vpop.f32.mrb[6].mxu0  ;;  %v1045_v50 = vmul.f32 %v1039_v42, %v7159_v39  ;;  %v1033_v40 = vmul.f32 0.5, %v7159_v39 }
  0xfd   : > { %v1024_v51 = vmul.f32 0.999995, %v1008_v45  ;;  %v1011_v52 = vadd.f32 %v5709_v21, %v1010_v49  ;;  %v6065_v53 = vpop.f32.mrb[7].mxu0  ;;  %v1052_v54 = vadd.f32 %v1046_v47, %v1022_v30  ;;  %v1047_v55 = vmul.f32 %v1041_v48, %v1023_v38  ;;  %v1101_v21 = vpop.permute.xlu1 %1100  ;;  %v1126_v49 = vld [vmem:[%s7172_s29 + $0x10] sm:$0xff] }
  0xfe   : > { %v1051_v57 = vmul.f32 %v1045_v50, %v7159_v39  ;;  %v1056_v3 = vadd.f32 %v1050_v56, %v7156_v31  ;;  %v1032_v47 = vmul.f32 0.5, %v7156_v31  ;;  %v1127_v50 = vld [vmem:[%s7172_s29 + $0x18] sm:$0xff] }
  0xff   : > { %v1036_v58 = vmul.f32 0.044715, %v1024_v51  ;;  %v1025_v59 = vmul.f32 0.999995, %v1011_v52  ;;  %v1058_v60 = vmul.f32 0.7978846, %v1052_v54  ;;  %v1053_v61 = vadd.f32 %v1047_v55, %v1023_v38 }
 0x100   : > { %v1057_v62 = vadd.f32 %v1051_v57, %v7159_v39  ;;  %v1062_v9 = vmul.f32 0.7978846, %v1056_v3  ;;  %v1030_v33 = vmul.f32 0.5, %v1024_v51  ;;  %v1111_v57 = vpop.permute.xlu0 %1110 }
 0x101   : > { %v1037_v63 = vmul.f32 0.044715, %v1025_v59  ;;  %6660 = vtanh.f32 %v1058_v60  ;;  %v1042_v1 = vmul.f32 %v1036_v58, %v1024_v51  ;;  %v1059_v2 = vmul.f32 0.7978846, %v1053_v61  ;;  %v1106_v37 = vpop.permute.xlu1 %1105  ;;  %v1129_v58 = vld [vmem:[%s7172_s29 + $0x28] sm:$0xff]  ;;  %v1128_v60 = vld [vmem:[%s7172_s29 + $0x20] sm:$0xff] }
 0x102   : > { %v1063_v6 = vmul.f32 0.7978846, %v1057_v62  ;;  %v1031_v38 = vmul.f32 0.5, %v1025_v59  ;;  %s8375_s29 = smov 88  }
 0x103   : > { %v1048_v4 = vmul.f32 %v1042_v1, %v1024_v51  ;;  %6662 = vtanh.f32 %v1059_v2  ;;  %v1043_v5 = vmul.f32 %v1037_v63, %v1025_v59  ;;  %v5713_v1 = vld [vmem:[%s7211_s1] ss:$0 sm:$0xff] }
 0x104   : > { %6664 = vtanh.f32 %v1063_v6 }
 0x105   : > { %v1054_v7 = vadd.f32 %v1048_v4, %v1024_v51  ;;  %v1049_v8 = vmul.f32 %v1043_v5, %v1025_v59  ;;  %v1116_v52 = vpop.permute.xlu1 %1115 }
 0x107   : > { %v1060_v10 = vmul.f32 0.7978846, %v1054_v7  ;;  %v1055_v11 = vadd.f32 %v1049_v8, %v1025_v59 }
 0x109   : > { %6666 = vtanh.f32 %v1060_v10  ;;  %v1061_v12 = vmul.f32 0.7978846, %v1055_v11 }
 0x10a   : > { %6668 = vtanh.f32 %v1062_v9 }
 0x10b   : > { %v6661_v13 = vpop.eup %6660  ;;  %6670 = vtanh.f32 %v1061_v12 }
 0x10c   : > { %v1070_v16 = vadd.f32 1.0, %v6661_v13 }
 0x10d   : > { %v6663_v17 = vpop.eup %6662 }
 0x10e   : > { %v1076_v18 = vmul.f32 %v1070_v16, %v1028_v15  ;;  %v1071_v20 = vadd.f32 1.0, %v6663_v17  ;;  %v6665_v27 = vpop.eup %6664 }
 0x10f   : > { %v1075_v44 = vadd.f32 1.0, %v6665_v27 }
 0x110   : > { %v1118_v22 = vmul.f32 %v1091_v14, %v1076_v18  ;;  %v1077_v23 = vmul.f32 %v1071_v20, %v1029_v19 }
 0x111   : > { %v1081_v51 = vmul.f32 %v1075_v44, %v1033_v40 }
 0x112   : > { %v1119_v28 = vmul.f32 %v1096_v25, %v1077_v23  ;;  %v7176_v32 = vadd.f32 %v1124_v24, %v1118_v22 }
 0x113   : > { %v6667_v29 = vpop.eup %6666  ;;  %v1123_v56 = vmul.f32 %v1116_v52, %v1081_v51  ;;  %v7260_v51 = vld [vmem:[%s8398_s20 + $0x1] ss:$0 sm:$0xff] }
 0x114   : > { %v6669_v30 = vpop.eup %6668  ;;  %v1072_v34 = vadd.f32 1.0, %v6667_v29  ;;  %v7178_v35 = vadd.f32 %v1125_v26, %v1119_v28 }
 0x115   : > { %v6671_v36 = vpop.eup %6670  ;;  %v1074_v48 = vadd.f32 1.0, %v6669_v30  ;;  %v7200_v61 = vadd.f32 %v1129_v58, %v1123_v56 }
 0x116   : > { %v1078_v41 = vmul.f32 %v1072_v34, %v1030_v33  ;;  %v1138_v42 = vpack.c.bf16 %v7178_v35, %v7176_v32  ;;  %v1073_v43 = vadd.f32 1.0, %v6671_v36 }
 0x117   : > { %v1080_v55 = vmul.f32 %v1074_v48, %v1032_v47 }
 0x118   : > { %v1120_v45 = vmul.f32 %v1101_v21, %v1078_v41  ;;  %v1079_v46 = vmul.f32 %v1073_v43, %v1031_v38  ;;  %6075 = vmatmul.mubr.msk.bf16.vlgmr.msra.gmra.mrb[4].mxu1 %vm1164_vm3, %v1138_v42 }
 0x119   : > { %6078 = vmatprep.mubr.msk.bf16.mxu1 %vm6941_vm0, %v6940_v0  ;;  %v1122_v59 = vmul.f32 %v1111_v57, %v1080_v55 }
 0x11a   : > { %v1121_v39 = vmul.f32 %v1106_v37, %v1079_v46  ;;  %v7189_v53 = vadd.f32 %v1126_v49, %v1120_v45  ;;  %v7249_v37 = vld [vmem:[%s8398_s20] ss:$0 sm:$0xff] }
 0x11b   : > { %v7202_v62 = vadd.f32 %v1128_v60, %v1122_v59 }
 0x11c   : > { %v7191_v54 = vadd.f32 %v1127_v50, %v1121_v39 }
 0x11d   : > { %v1140_v63 = vpack.c.bf16 %v7200_v61, %v7202_v62 }
 0x11e   : > { %v1139_v31 = vpack.c.bf16 %v7191_v54, %v7189_v53 }
 0x120   : > { %6079 = vmatmul.mubr.msk.bf16.gmra.mrb[8].mxu1 %vm1164_vm3, %v1139_v31 }
 0x121   : > { %6082 = vmatprep.mubr.msk.bf16.mxu1 %vm6941_vm0, %v6940_v0 }
 0x128   : > { %6083 = vmatmul.mubr.msk.bf16.gmra.mrb[12].mxu1 %vm1164_vm3, %v1140_v63 }
 0x1eb   : > { %v1208_v2 = vpop.f32.mrb[4].mxu1 }
 0x1ec   : > { %v6076_v3 = vpop.f32.mrb[5].mxu1  ;;  %v1209_v5 = vadd.f32 %v5713_v1, %v1208_v2 }
 0x1ed   : > { %v1211_v4 = vpop.f32.mrb[6].mxu1 }
 0x1ee   : > { %v1212_v6 = vadd.f32 %v5713_v1, %v1211_v4  ;;  %v6077_v7 = vpop.f32.mrb[7].mxu1 }
 0x1f0   : > { %v7214_v8 = vpack.c.bf16 %v1212_v6, %v1209_v5 }
 0x1f2   : > { %1237 = vrot.lane.b32.xlu0 %v7214_v8, %s8379_s26  ;;  %6090 = vmatprep.mubr.msk.bf16.mxu0 %vm1241_vm4, %v7214_v8 }
 0x1f3   : > { %v1216_v9 = vpop.f32.mrb[8].mxu1 }
 0x1f4   : > { %v1217_v10 = vadd.f32 %v5713_v1, %v1216_v9  ;;  %v6080_v11 = vpop.f32.mrb[9].mxu1 }
 0x1f5   : > { %v1219_v12 = vpop.f32.mrb[10].mxu1 }
 0x1f6   : > { %v7220_v13 = vpack.c.bf16 %v1217_v10, %v1217_v10  ;;  %v6081_v14 = vpop.f32.mrb[11].mxu1  ;;  %v1220_v16 = vadd.f32 %v5713_v1, %v1219_v12 }
 0x1f8   : > { %1239 = vrot.lane.b32.xlu1 %v7220_v13, %s8379_s26 }
 0x1fb   : > { %v1224_v15 = vpop.f32.mrb[12].mxu1 }
 0x1fc   : > { %v1225_v17 = vadd.f32 %v5713_v1, %v1224_v15  ;;  %v6084_v18 = vpop.f32.mrb[13].mxu1 }
 0x1fd   : > { %v1227_v19 = vpop.f32.mrb[14].mxu1 }
 0x1fe   : > { %v7224_v20 = vpack.c.bf16 %v1225_v17, %v1220_v16  ;;  %v1228_v21 = vadd.f32 %v5713_v1, %v1227_v19  ;;  %v6085_v22 = vpop.f32.mrb[15].mxu1 }
 0x200   : > { %v7226_v23 = vpack.c.bf16 %v1228_v21, %v1228_v21  ;;  %1304 = vrot.lane.b32.xlu0 %v7224_v20, %s8379_s26  ;;  %6098 = vmatprep.mubr.msk.bf16.mxu1 %vm1241_vm4, %v7224_v20 }
 0x202   : > { %1306 = vrot.lane.b32.xlu1 %v7226_v23, %s8379_s26  ;;  %s8402_s26 = smov 120  }
 0x264   : > { %v1238_v24 = vpop.permute.xlu0 %1237 }
 0x265   : > { %6472 = vmatprep.subr.msk.bf16.mxu0 %vm1241_vm4, %v1238_v24  ;;  %v1249_v25 = vsel %vm1241_vm4, %v1238_v24, 0 }
 0x266   : > { %6087 = vmatpush3.bf16.xpose.msra.mxu0 %v1249_v25 }
 0x26a   : > { %v1240_v26 = vpop.permute.xlu1 %1239 }
 0x26b   : > { %6473 = vmatprep.subr.msk.bf16.mxu0 %vm1241_vm4, %v1240_v26  ;;  %v1252_v27 = vsel %vm1241_vm4, %v1240_v26, 0 }
 0x26e   : > { %6089 = vmatpush3.bf16.xpose.msra.mxu0 %v1252_v27 }
 0x272   : > { %v1305_v28 = vpop.permute.xlu0 %1304 }
 0x273   : > { %6474 = vmatprep.subr.msk.bf16.mxu1 %vm1241_vm4, %v1305_v28  ;;  %v1315_v29 = vsel %vm1241_vm4, %v1305_v28, 0 }
 0x274   : > { %6095 = vmatpush3.bf16.xpose.msra.mxu1 %v1315_v29  ;;  %v1307_v30 = vpop.permute.xlu1 %1306 }
 0x275   : > { %6091 = vmatmul.mubr.msk.bf16.vlgmr.msra.gmra.mrb[8].mxu0 %vm1241_vm4, %v7220_v13  ;;  %6475 = vmatprep.subr.msk.bf16.mxu1 %vm1241_vm4, %v1307_v30  ;;  %v1318_v33 = vsel %vm1241_vm4, %v1307_v30, 0 }
 0x27c   : > { %6097 = vmatpush3.bf16.xpose.msra.mxu1 %v1318_v33 }
 0x283   : > { %6099 = vmatmul.mubr.msk.bf16.vlgmr.msra.gmra.mrb[16].mxu1 %vm1241_vm4, %v7226_v23 }
 0x348   : > { %v6092_v34 = vpop.f32.mrb[8].mxu0 }
 0x349   : > { %v1288_v36 = vpop.f32.mrb[9].mxu0  ;;  %v1370_v38 = vmul.f32 0.35355338, %v6092_v34 }
 0x34a   : > { %v1368_v40 = vmul.f32 0.35355338, %v1288_v36  ;;  %v6093_v41 = vpop.f32.mrb[10].mxu0 }
 0x34b   : > { %v1291_v42 = vpop.f32.mrb[11].mxu0  ;;  %v1388_v47 = vadd.f32 %v7249_v37, %v1370_v38 }
 0x34c   : > { %v1369_v43 = vmul.f32 0.35355338, %v1291_v42  ;;  %v1386_v44 = vadd.f32 %v7249_v37, %v1368_v40 }
 0x34d   : > { %v1399_v49 = vsel %vm1392_vm5, %v1388_v47, -inf }
 0x34e   : > { %v1393_v45 = vsel %vm1392_vm5, %v1386_v44, -inf  ;;  %v1387_v46 = vadd.f32 %v7249_v37, %v1369_v43 }
 0x34f   : > { %1394 = vmax.xlane.f32.xlu0 %v1393_v45 }
 0x350   : > { %v1396_v48 = vsel %vm1392_vm5, %v1387_v46, -inf }
 0x351   : > { %1397 = vmax.xlane.f32.xlu1 %v1396_v48 }
 0x353   : > { %1400 = vmax.xlane.f32.xlu0 %v1399_v49 }
 0x356   : > { %v6100_v50 = vpop.f32.mrb[16].mxu1 }
 0x357   : > { %v1354_v39 = vpop.f32.mrb[17].mxu1  ;;  %v1373_v52 = vmul.f32 0.35355338, %v6100_v50 }
 0x358   : > { %v1371_v55 = vmul.f32 0.35355338, %v1354_v39  ;;  %v6101_v31 = vpop.f32.mrb[18].mxu1 }
 0x359   : > { %v1357_v56 = vpop.f32.mrb[19].mxu1  ;;  %v1391_v59 = vadd.f32 %v7260_v51, %v1373_v52 }
 0x35a   : > { %v1389_v57 = vadd.f32 %v7260_v51, %v1371_v55  ;;  %v1372_v63 = vmul.f32 0.35355338, %v1357_v56 }
 0x35b   : > { %v1408_v60 = vsel %vm1392_vm5, %v1391_v59, -inf }
 0x35c   : > { %v1402_v58 = vsel %vm1392_vm5, %v1389_v57, -inf  ;;  %v1390_v1 = vadd.f32 %v7260_v51, %v1372_v63 }
 0x35d   : > { %1403 = vmax.xlane.f32.xlu0 %v1402_v58 }
 0x35e   : > { %v1405_v2 = vsel %vm1392_vm5, %v1390_v1, -inf }
 0x361   : > { %1409 = vmax.xlane.f32.xlu0 %v1408_v60 }
 0x362   : > { %1463 = vrot.lane.b32.xlu1 %v7214_v8, %s8377_s22 }
 0x366   : > { %1526 = vrot.lane.b32.xlu1 %v7224_v20, %s8377_s22 }
 0x377   : > { %1465 = vrot.lane.b32.xlu0 %v7220_v13, %s8377_s22 }
 0x37b   : > { %1528 = vrot.lane.b32.xlu0 %v7226_v23, %s8377_s22  ;;  %s7655_s22 = scalar_lea.vmem %s8339_s12, %s7093_s5 }
 0x38a   : > { %1406 = vmax.xlane.f32.xlu1 %v1405_v2 }
 0x39b   : > { %1592 = vrot.lane.b32.xlu1 %v7214_v8, %s8375_s29 }
 0x3dc   : > { %v1395_v3 = vpop.xlane.xlu0 %1394 }
 0x3dd   : > { %v1411_v5 = vsub.f32 %v1386_v44, %v1395_v3 }
 0x3de   : > { %v1398_v4 = vpop.xlane.xlu1 %1397 }
 0x3df   : > { %v1412_v6 = vsub.f32 %v1387_v46, %v1398_v4  ;;  %v1417_v12 = vmul.f32 1.442695, %v1411_v5 }
 0x3e0   : > { %v1401_v7 = vpop.xlane.xlu0 %1400 }
 0x3e1   : > { %v1419_v9 = vmul.f32 1.442695, %v1412_v6  ;;  %v1413_v10 = vsub.f32 %v1388_v47, %v1401_v7 }
 0x3e2   : > { %v1464_v11 = vpop.permute.xlu1 %1463 }
 0x3e3   : > { %6672 = vpow2.f32 %v1419_v9  ;;  %v1421_v14 = vmul.f32 1.442695, %v1413_v10  ;;  %6102 = vmatprep.subr.bf16.mxu0 %v1464_v11 }
 0x3e4   : > { %6103 = vmatpush3.bf16.msra.mxu0 %v1464_v11 }
 0x3e5   : > { %6674 = vpow2.f32 %v1421_v14 }
 0x3e6   : > { %v1527_v15 = vpop.permute.xlu1 %1526  ;;  %6676 = vpow2.f32 %v1417_v12 }
 0x3e7   : > { %6110 = vmatprep.subr.bf16.mxu1 %v1527_v15 }
 0x3e8   : > { %6111 = vmatpush3.bf16.msra.mxu1 %v1527_v15 }
 0x3ea   : > { %v1404_v16 = vpop.xlane.xlu0 %1403 }
 0x3eb   : > { %v1414_v18 = vsub.f32 %v1389_v57, %v1404_v16 }
 0x3ed   : > { %v6673_v17 = vpop.eup %6672  ;;  %v1423_v27 = vmul.f32 1.442695, %v1414_v18 }
 0x3ee   : > { %v1410_v19 = vpop.xlane.xlu0 %1409  ;;  %v1432_v21 = vsel %vm1392_vm5, %v6673_v17, 0.0 }
 0x3ef   : > { %v6675_v22 = vpop.eup %6674  ;;  %v1416_v24 = vsub.f32 %v1391_v59, %v1410_v19  ;;  %1433 = vadd.xlane.f32.xlu0 %v1432_v21 }
 0x3f0   : > { %v1435_v25 = vsel %vm1392_vm5, %v6675_v22, 0.0  ;;  %v6677_v26 = vpop.eup %6676 }
 0x3f1   : > { %v1427_v28 = vmul.f32 1.442695, %v1416_v24  ;;  %1436 = vadd.xlane.f32.xlu1 %v1435_v25  ;;  %v1429_v33 = vsel %vm1392_vm5, %v6677_v26, 0.0 }
 0x3f2   : > { %v1466_v29 = vpop.permute.xlu0 %1465 }
 0x3f3   : > { %6678 = vpow2.f32 %v1427_v28  ;;  %6476 = vmatprep.subr.msk.bf16.mxu0 %vm1474_vm6, %v1466_v29  ;;  %v1476_v30 = vsel %vm1474_vm6, %v1466_v29, 0 }
 0x3f4   : > { %6105 = vmatpush3.bf16.msra.mxu0 %v1476_v30  ;;  %6680 = vpow2.f32 %v1423_v27 }
 0x3f5   : > { %1430 = vadd.xlane.f32.xlu1 %v1429_v33 }
 0x3f6   : > { %v1529_v34 = vpop.permute.xlu0 %1528 }
 0x3f7   : > { %6477 = vmatprep.subr.msk.bf16.mxu1 %vm1474_vm6, %v1529_v34  ;;  %v1538_v36 = vsel %vm1474_vm6, %v1529_v34, 0 }
 0x3f8   : > { %6113 = vmatpush3.bf16.msra.mxu1 %v1538_v36 }
 0x3fd   : > { %v6679_v38 = vpop.eup %6678 }
 0x3fe   : > { %v1444_v40 = vsel %vm1392_vm5, %v6679_v38, 0.0  ;;  %v6681_v41 = vpop.eup %6680 }
 0x3ff   : > { %1445 = vadd.xlane.f32.xlu0 %v1444_v40  ;;  %v1438_v42 = vsel %vm1392_vm5, %v6681_v41, 0.0 }
 0x403   : > { %1439 = vadd.xlane.f32.xlu0 %v1438_v42 }
 0x406   : > { %1594 = vrot.lane.b32.xlu1 %v7220_v13, %s8375_s29 }
 0x417   : > { %v1407_v43 = vpop.xlane.xlu1 %1406 }
 0x418   : > { %v1415_v44 = vsub.f32 %v1390_v1, %v1407_v43 }
 0x419   : > { %1660 = vrot.lane.b32.xlu0 %v7224_v20, %s8375_s29 }
 0x41a   : > { %v1425_v45 = vmul.f32 1.442695, %v1415_v44 }
 0x41b   : > { %v1593_v46 = vpop.permute.xlu1 %1592 }
 0x41c   : > { %6682 = vpow2.f32 %v1425_v45  ;;  %6478 = vmatprep.subr.msk.bf16.mxu0 %vm1241_vm4, %v1593_v46  ;;  %v1603_v2 = vsel %vm1241_vm4, %v1593_v46, 0 }
 0x41d   : > { %1590 = vrot.lane.b32.xlu0 %v7220_v13, %s8367_s0 }
 0x421   : > { %1656 = vrot.lane.b32.xlu0 %v7224_v20, %s8367_s0 }
 0x426   : > { %v6683_v47 = vpop.eup %6682 }
 0x427   : > { %v1441_v48 = vsel %vm1392_vm5, %v6683_v47, 0.0 }
 0x42a   : > { %1442 = vadd.xlane.f32.xlu1 %v1441_v48 }
 0x43b   : > { %1588 = vrot.lane.b32.xlu1 %v7214_v8, %s8367_s0 }
 0x43f   : > { %1662 = vrot.lane.b32.xlu1 %v7226_v23, %s8375_s29  ;;  %s7748_s29 = scalar_lea.vmem %s8344_s17, %s7093_s5 }
 0x443   : > { %1658 = vrot.lane.b32.xlu1 %v7226_v23, %s8367_s0  ;;  %s8369_s0 = smov 24  }
 0x47c   : > { %v1434_v49 = vpop.xlane.xlu0 %1433 }
 0x47e   : > { %v1437_v50 = vpop.xlane.xlu1 %1436 }
 0x47f   : > { %6684 = vrcp.f32 %v1437_v50 }
 0x480   : > { %6686 = vrcp.f32 %v1434_v49 }
 0x482   : > { %v1431_v39 = vpop.xlane.xlu1 %1430 }
 0x483   : > { %6688 = vrcp.f32 %v1431_v39 }
 0x486   : > { %v1595_v3 = vpop.permute.xlu1 %1594 }
 0x487   : > { %v1606_v5 = vsel %vm1241_vm4, %v1595_v3, 0 }
 0x489   : > { %v6685_v52 = vpop.eup %6684 }
 0x48a   : > { %v6687_v55 = vpop.eup %6686  ;;  %v1455_v57 = vmul.f32 %v6685_v52, %v6675_v22 }
 0x48b   : > { %v1454_v59 = vmul.f32 %v6687_v55, %v6673_v17 }
 0x48c   : > { %v1446_v31 = vpop.xlane.xlu0 %1445  ;;  %v1460_v1 = vpack.c.bf16 %v1455_v57, %v1455_v57 }
 0x48d   : > { %v6689_v56 = vpop.eup %6688  ;;  %6690 = vrcp.f32 %v1446_v31 }
 0x48e   : > { %v1453_v58 = vmul.f32 %v6689_v56, %v6677_v26 }
 0x490   : > { %v1440_v60 = vpop.xlane.xlu0 %1439  ;;  %v1459_v63 = vpack.c.bf16 %v1454_v59, %v1453_v58 }
 0x491   : > { %6692 = vrcp.f32 %v1440_v60 }
 0x492   : > { %6106 = vmatprep.mubr.msk.bf16.mxu0 %vm1392_vm5, %v1459_v63 }
 0x493   : > { %6107 = vmatmul.mubr.msk.bf16.vlgmr.msra.gmra.mrb[12].mxu0 %vm1392_vm5, %v1460_v1 }
 0x494   : > { %6119 = vmatpush3.bf16.xpose.msra.mxu0 %v1603_v2  ;;  %v1661_v4 = vpop.permute.xlu0 %1660 }
 0x495   : > { %6479 = vmatprep.subr.msk.bf16.mxu0 %vm1241_vm4, %v1595_v3  ;;  %6480 = vmatprep.subr.msk.bf16.mxu1 %vm1241_vm4, %v1661_v4  ;;  %v1671_v21 = vsel %vm1241_vm4, %v1661_v4, 0 }
 0x497   : > { %v6691_v10 = vpop.eup %6690 }
 0x498   : > { %v1591_v9 = vpop.permute.xlu0 %1590  ;;  %v1458_v14 = vmul.f32 %v6691_v10, %v6679_v38 }
 0x49a   : > { %v1462_v18 = vpack.c.bf16 %v1458_v14, %v1458_v14 }
 0x49b   : > { %v6693_v11 = vpop.eup %6692 }
 0x49c   : > { %6121 = vmatpush3.bf16.xpose.msra.mxu0 %v1606_v5  ;;  %v1456_v15 = vmul.f32 %v6693_v11, %v6681_v41  ;;  %v1657_v19 = vpop.permute.xlu0 %1656 }
 0x4b7   : > { %v1443_v6 = vpop.xlane.xlu1 %1442 }
 0x4b8   : > { %6694 = vrcp.f32 %v1443_v6 }
 0x4bb   : > { %v1589_v7 = vpop.permute.xlu1 %1588 }
 0x4bc   : > { %6122 = vmatprep.mubr.msk.bf16.mxu0 %vm1241_vm4, %v1589_v7 }
 0x4bd   : > { %6123 = vmatmul.mubr.msk.bf16.vlgmr.msra.gmra.mrb[16].mxu0 %vm1241_vm4, %v1591_v9 }
 0x4bf   : > { %v1663_v22 = vpop.permute.xlu1 %1662 }
 0x4c0   : > { %v1674_v24 = vsel %vm1241_vm4, %v1663_v22, 0 }
 0x4c2   : > { %v6695_v12 = vpop.eup %6694 }
 0x4c3   : > { %v1457_v16 = vmul.f32 %v6695_v12, %v6683_v47  ;;  %v1659_v25 = vpop.permute.xlu1 %1658 }
 0x4c5   : > { %v1461_v17 = vpack.c.bf16 %v1457_v16, %v1456_v15 }
 0x4c7   : > { %6114 = vmatprep.mubr.msk.bf16.mxu1 %vm1392_vm5, %v1461_v17 }
 0x4c8   : > { %6115 = vmatmul.mubr.msk.bf16.vlgmr.msra.gmra.mrb[20].mxu1 %vm1392_vm5, %v1462_v18 }
 0x4c9   : > { %6127 = vmatpush3.bf16.xpose.msra.mxu1 %v1671_v21  ;;  %6130 = vmatprep.mubr.msk.bf16.mxu1 %vm1241_vm4, %v1657_v19 }
 0x4ca   : > { %6481 = vmatprep.subr.msk.bf16.mxu1 %vm1241_vm4, %v1663_v22 }
 0x4d1   : > { %6129 = vmatpush3.bf16.xpose.msra.mxu1 %v1674_v24 }
 0x4d8   : > { %6131 = vmatmul.mubr.msk.bf16.vlgmr.msra.gmra.mrb[24].mxu1 %vm1241_vm4, %v1659_v25 }
 0x566   : > { %v7318_v26 = vpop.f32.mrb[12].mxu0 }
 0x567   : > { %v7320_v27 = vpop.f32.mrb[13].mxu0 }
 0x568   : > { %v6109_v28 = vpop.f32.mrb[14].mxu0 }
 0x569   : > { %v7322_v29 = vpop.f32.mrb[15].mxu0 }
 0x590   : > { %v6124_v30 = vpop.f32.mrb[16].mxu0 }
 0x591   : > { %v1642_v33 = vpop.f32.mrb[17].mxu0  ;;  %v1726_v34 = vmul.f32 0.35355338, %v6124_v30 }
 0x592   : > { %v1724_v36 = vmul.f32 0.35355338, %v1642_v33  ;;  %v6125_v38 = vpop.f32.mrb[18].mxu0 }
 0x593   : > { %v1645_v40 = vpop.f32.mrb[19].mxu0  ;;  %v1732_v45 = vadd.f32 %v7249_v37, %v1726_v34 }
 0x594   : > { %v1725_v41 = vmul.f32 0.35355338, %v1645_v40  ;;  %v1730_v42 = vadd.f32 %v7249_v37, %v1724_v36 }
 0x595   : > { %v1742_v47 = vsel %vm1392_vm5, %v1732_v45, -inf }
 0x596   : > { %v1736_v43 = vsel %vm1392_vm5, %v1730_v42, -inf  ;;  %v1731_v44 = vadd.f32 %v7249_v37, %v1725_v41 }
 0x597   : > { %1737 = vmax.xlane.f32.xlu0 %v1736_v43 }
 0x598   : > { %v1739_v46 = vsel %vm1392_vm5, %v1731_v44, -inf }
 0x599   : > { %1740 = vmax.xlane.f32.xlu1 %v1739_v46 }
 0x59b   : > { %v7330_v48 = vpop.f32.mrb[20].mxu1  ;;  %1743 = vmax.xlane.f32.xlu0 %v1742_v47 }
 0x59c   : > { %v7332_v49 = vpop.f32.mrb[21].mxu1 }
 0x59d   : > { %v6117_v50 = vpop.f32.mrb[22].mxu1 }
 0x59e   : > { %v7334_v39 = vpop.f32.mrb[23].mxu1 }
 0x5aa   : > { %1806 = vrot.lane.b32.xlu1 %v7214_v8, %s8365_s23 }
 0x5ab   : > { %v6132_v52 = vpop.f32.mrb[24].mxu1 }
 0x5ac   : > { %v1710_v55 = vpop.f32.mrb[25].mxu1  ;;  %v1729_v31 = vmul.f32 0.35355338, %v6132_v52 }
 0x5ad   : > { %v1727_v56 = vmul.f32 0.35355338, %v1710_v55  ;;  %v6133_v57 = vpop.f32.mrb[26].mxu1 }
 0x5ae   : > { %v1713_v58 = vpop.f32.mrb[27].mxu1  ;;  %1868 = vrot.lane.b32.xlu1 %v7224_v20, %s8365_s23  ;;  %v1735_v63 = vadd.f32 %v7260_v51, %v1729_v31 }
 0x5af   : > { %v1733_v59 = vadd.f32 %v7260_v51, %v1727_v56  ;;  %v1728_v2 = vmul.f32 0.35355338, %v1713_v58 }
 0x5b0   : > { %v1751_v1 = vsel %vm1392_vm5, %v1735_v63, -inf }
 0x5b1   : > { %v1745_v60 = vsel %vm1392_vm5, %v1733_v59, -inf  ;;  %v1734_v3 = vadd.f32 %v7260_v51, %v1728_v2 }
 0x5b2   : > { %1746 = vmax.xlane.f32.xlu0 %v1745_v60 }
 0x5b3   : > { %v1748_v4 = vsel %vm1392_vm5, %v1734_v3, -inf }
 0x5b6   : > { %1752 = vmax.xlane.f32.xlu0 %v1751_v1 }
 0x5cc   : > { %1808 = vrot.lane.b32.xlu0 %v7220_v13, %s8365_s23 }
 0x5d0   : > { %1870 = vrot.lane.b32.xlu0 %v7226_v23, %s8365_s23  ;;  %s7547_s23 = scalar_lea.vmem %s8336_s9, %s7141_s4 }
 0x5d2   : > { %1749 = vmax.xlane.f32.xlu1 %v1748_v4 }
 0x5e3   : > { %1934 = vrot.lane.b32.xlu1 %v7214_v8, %s8363_s27 }
 0x624   : > { %v1738_v5 = vpop.xlane.xlu0 %1737 }
 0x625   : > { %v1754_v7 = vsub.f32 %v1730_v42, %v1738_v5 }
 0x626   : > { %v1741_v6 = vpop.xlane.xlu1 %1740 }
 0x627   : > { %v1755_v9 = vsub.f32 %v1731_v44, %v1741_v6  ;;  %v1760_v15 = vmul.f32 1.442695, %v1754_v7 }
 0x628   : > { %v1744_v10 = vpop.xlane.xlu0 %1743 }
 0x629   : > { %v1762_v11 = vmul.f32 1.442695, %v1755_v9  ;;  %v1756_v12 = vsub.f32 %v1732_v45, %v1744_v10 }
 0x62a   : > { %v1807_v14 = vpop.permute.xlu1 %1806 }
 0x62b   : > { %6696 = vpow2.f32 %v1762_v11  ;;  %v1764_v16 = vmul.f32 1.442695, %v1756_v12  ;;  %6134 = vmatprep.subr.bf16.mxu0 %v1807_v14 }
 0x62c   : > { %6135 = vmatpush3.bf16.msra.mxu0 %v1807_v14 }
 0x62d   : > { %6698 = vpow2.f32 %v1764_v16 }
 0x62e   : > { %v1869_v17 = vpop.permute.xlu1 %1868  ;;  %6700 = vpow2.f32 %v1760_v15 }
 0x62f   : > { %6142 = vmatprep.subr.bf16.mxu1 %v1869_v17 }
 0x630   : > { %6143 = vmatpush3.bf16.msra.mxu1 %v1869_v17 }
 0x635   : > { %v6697_v18 = vpop.eup %6696 }
 0x636   : > { %v1775_v19 = vsel %vm1392_vm5, %v6697_v18, 0.0 }
 0x637   : > { %v6699_v21 = vpop.eup %6698  ;;  %1776 = vadd.xlane.f32.xlu0 %v1775_v19 }
 0x638   : > { %v1778_v22 = vsel %vm1392_vm5, %v6699_v21, 0.0  ;;  %v6701_v24 = vpop.eup %6700 }
 0x639   : > { %1779 = vadd.xlane.f32.xlu1 %v1778_v22  ;;  %v1772_v25 = vsel %vm1392_vm5, %v6701_v24, 0.0 }
 0x63d   : > { %1773 = vadd.xlane.f32.xlu1 %v1772_v25 }
 0x63f   : > { %v1747_v28 = vpop.xlane.xlu0 %1746 }
 0x640   : > { %v1757_v30 = vsub.f32 %v1733_v59, %v1747_v28 }
 0x642   : > { %v1766_v36 = vmul.f32 1.442695, %v1757_v30 }
 0x643   : > { %v1753_v33 = vpop.xlane.xlu0 %1752 }
 0x644   : > { %v1759_v34 = vsub.f32 %v1735_v63, %v1753_v33 }
 0x646   : > { %v1770_v38 = vmul.f32 1.442695, %v1759_v34 }
 0x647   : > { %v1809_v40 = vpop.permute.xlu0 %1808 }
 0x648   : > { %6702 = vpow2.f32 %v1770_v38  ;;  %6482 = vmatprep.subr.msk.bf16.mxu0 %vm1474_vm6, %v1809_v40  ;;  %v1818_v41 = vsel %vm1474_vm6, %v1809_v40, 0 }
 0x649   : > { %6137 = vmatpush3.bf16.msra.mxu0 %v1818_v41  ;;  %6704 = vpow2.f32 %v1766_v36 }
 0x64b   : > { %v1871_v42 = vpop.permute.xlu0 %1870 }
 0x64c   : > { %6483 = vmatprep.subr.msk.bf16.mxu1 %vm1474_vm6, %v1871_v42  ;;  %v1880_v43 = vsel %vm1474_vm6, %v1871_v42, 0 }
 0x64d   : > { %6145 = vmatpush3.bf16.msra.mxu1 %v1880_v43 }
 0x64e   : > { %1936 = vrot.lane.b32.xlu1 %v7220_v13, %s8363_s27 }
 0x652   : > { %v6703_v44 = vpop.eup %6702 }
 0x653   : > { %v1787_v45 = vsel %vm1392_vm5, %v6703_v44, 0.0  ;;  %v6705_v46 = vpop.eup %6704 }
 0x654   : > { %1788 = vadd.xlane.f32.xlu0 %v1787_v45  ;;  %v1781_v47 = vsel %vm1392_vm5, %v6705_v46, 0.0 }
 0x658   : > { %1782 = vadd.xlane.f32.xlu0 %v1781_v47 }
 0x65f   : > { %v1750_v50 = vpop.xlane.xlu1 %1749 }
 0x660   : > { %v1758_v52 = vsub.f32 %v1734_v3, %v1750_v50 }
 0x662   : > { %v1768_v55 = vmul.f32 1.442695, %v1758_v52 }
 0x663   : > { %v1935_v31 = vpop.permute.xlu1 %1934 }
 0x664   : > { %6706 = vpow2.f32 %v1768_v55  ;;  %6484 = vmatprep.subr.msk.bf16.mxu0 %vm1241_vm4, %v1935_v31  ;;  %v1945_v9 = vsel %vm1241_vm4, %v1935_v31, 0 }
 0x66e   : > { %v6707_v56 = vpop.eup %6706  ;;  %2002 = vrot.lane.b32.xlu0 %v7224_v20, %s8363_s27 }
 0x66f   : > { %v1784_v57 = vsel %vm1392_vm5, %v6707_v56, 0.0 }
 0x672   : > { %1932 = vrot.lane.b32.xlu0 %v7220_v13, %s8359_s28  ;;  %1785 = vadd.xlane.f32.xlu1 %v1784_v57 }
 0x676   : > { %1998 = vrot.lane.b32.xlu0 %v7224_v20, %s8359_s28 }
 0x683   : > { %1930 = vrot.lane.b32.xlu1 %v7214_v8, %s8359_s28 }
 0x687   : > { %2004 = vrot.lane.b32.xlu1 %v7226_v23, %s8363_s27  ;;  %s8404_s27 = smov 80  }
 0x68b   : > { %2000 = vrot.lane.b32.xlu1 %v7226_v23, %s8359_s28  ;;  %s8361_s28 = smov 40  }
 0x6c4   : > { %v1777_v58 = vpop.xlane.xlu0 %1776 }
 0x6c6   : > { %v1780_v59 = vpop.xlane.xlu1 %1779 }
 0x6c7   : > { %6708 = vrcp.f32 %v1780_v59 }
 0x6c8   : > { %6710 = vrcp.f32 %v1777_v58 }
 0x6ca   : > { %v1774_v60 = vpop.xlane.xlu1 %1773 }
 0x6cb   : > { %6712 = vrcp.f32 %v1774_v60 }
 0x6ce   : > { %v1937_v10 = vpop.permute.xlu1 %1936 }
 0x6cf   : > { %v1948_v12 = vsel %vm1241_vm4, %v1937_v10, 0 }
 0x6d1   : > { %v6709_v63 = vpop.eup %6708 }
 0x6d2   : > { %v6711_v1 = vpop.eup %6710  ;;  %v1798_v3 = vmul.f32 %v6709_v63, %v6699_v21 }
 0x6d3   : > { %v1797_v5 = vmul.f32 %v6711_v1, %v6697_v18 }
 0x6d4   : > { %v1803_v7 = vpack.c.bf16 %v1798_v3, %v1798_v3 }
 0x6d5   : > { %v6713_v2 = vpop.eup %6712 }
 0x6d6   : > { %v1796_v4 = vmul.f32 %v6713_v2, %v6701_v24 }
 0x6d8   : > { %v1802_v6 = vpack.c.bf16 %v1797_v5, %v1796_v4 }
 0x6da   : > { %6138 = vmatprep.mubr.msk.bf16.mxu0 %vm1392_vm5, %v1802_v6 }
 0x6db   : > { %6139 = vmatmul.mubr.msk.bf16.vlgmr.msra.gmra.mrb[20].mxu0 %vm1392_vm5, %v1803_v7 }
 0x6dc   : > { %6151 = vmatpush3.bf16.xpose.msra.mxu0 %v1945_v9 }
 0x6dd   : > { %6485 = vmatprep.subr.msk.bf16.mxu0 %vm1241_vm4, %v1937_v10 }
 0x6e1   : > { %v1789_v11 = vpop.xlane.xlu0 %1788 }
 0x6e2   : > { %6714 = vrcp.f32 %v1789_v11 }
 0x6e4   : > { %6153 = vmatpush3.bf16.xpose.msra.mxu0 %v1948_v12 }
 0x6e5   : > { %v1783_v14 = vpop.xlane.xlu0 %1782 }
 0x6e6   : > { %6716 = vrcp.f32 %v1783_v14 }
 0x6e9   : > { %v2003_v15 = vpop.permute.xlu0 %2002 }
 0x6ea   : > { %6486 = vmatprep.subr.msk.bf16.mxu1 %vm1241_vm4, %v2003_v15  ;;  %v2013_v36 = vsel %vm1241_vm4, %v2003_v15, 0 }
 0x6ec   : > { %v6715_v19 = vpop.eup %6714 }
 0x6ed   : > { %v1933_v18 = vpop.permute.xlu0 %1932  ;;  %v1801_v24 = vmul.f32 %v6715_v19, %v6703_v44 }
 0x6ef   : > { %v1805_v33 = vpack.c.bf16 %v1801_v24, %v1801_v24 }
 0x6f0   : > { %v6717_v21 = vpop.eup %6716 }
 0x6f1   : > { %v1799_v25 = vmul.f32 %v6717_v21, %v6705_v46  ;;  %v1999_v34 = vpop.permute.xlu0 %1998 }
 0x6ff   : > { %v1786_v16 = vpop.xlane.xlu1 %1785 }
 0x700   : > { %6718 = vrcp.f32 %v1786_v16 }
 0x703   : > { %v1931_v17 = vpop.permute.xlu1 %1930 }
 0x704   : > { %6154 = vmatprep.mubr.msk.bf16.mxu0 %vm1241_vm4, %v1931_v17 }
 0x705   : > { %6155 = vmatmul.mubr.msk.bf16.vlgmr.msra.gmra.mrb[24].mxu0 %vm1241_vm4, %v1933_v18 }
 0x707   : > { %v2005_v38 = vpop.permute.xlu1 %2004 }
 0x708   : > { %v2016_v40 = vsel %vm1241_vm4, %v2005_v38, 0 }
 0x70a   : > { %v6719_v22 = vpop.eup %6718 }
 0x70b   : > { %v1800_v28 = vmul.f32 %v6719_v22, %v6707_v56  ;;  %v2001_v41 = vpop.permute.xlu1 %2000 }
 0x70d   : > { %v1804_v30 = vpack.c.bf16 %v1800_v28, %v1799_v25 }
 0x70f   : > { %6146 = vmatprep.mubr.msk.bf16.mxu1 %vm1392_vm5, %v1804_v30 }
 0x710   : > { %6147 = vmatmul.mubr.msk.bf16.vlgmr.msra.gmra.mrb[28].mxu1 %vm1392_vm5, %v1805_v33 }
 0x711   : > { %6159 = vmatpush3.bf16.xpose.msra.mxu1 %v2013_v36  ;;  %6162 = vmatprep.mubr.msk.bf16.mxu1 %vm1241_vm4, %v1999_v34 }
 0x712   : > { %6487 = vmatprep.subr.msk.bf16.mxu1 %vm1241_vm4, %v2005_v38 }
 0x719   : > { %6161 = vmatpush3.bf16.xpose.msra.mxu1 %v2016_v40 }
 0x720   : > { %6163 = vmatmul.mubr.msk.bf16.vlgmr.msra.gmra.mrb[32].mxu1 %vm1241_vm4, %v2001_v41 }
 0x7ae   : > { %v7392_v42 = vpop.f32.mrb[20].mxu0 }
 0x7af   : > { %v7394_v43 = vpop.f32.mrb[21].mxu0 }
 0x7b0   : > { %v6141_v44 = vpop.f32.mrb[22].mxu0 }
 0x7b1   : > { %v7396_v45 = vpop.f32.mrb[23].mxu0 }
 0x7b2   : > { %v6548_v46 = vpack.i.bf16 %v7396_v45, %v7394_v43 }
 0x7d8   : > { %v6156_v47 = vpop.f32.mrb[24].mxu0 }
 0x7d9   : > { %v1984_v50 = vpop.f32.mrb[25].mxu0  ;;  %v2068_v52 = vmul.f32 0.35355338, %v6156_v47 }
 0x7da   : > { %v2066_v55 = vmul.f32 0.35355338, %v1984_v50  ;;  %v6157_v31 = vpop.f32.mrb[26].mxu0 }
 0x7db   : > { %v1987_v56 = vpop.f32.mrb[27].mxu0  ;;  %v2074_v63 = vadd.f32 %v7249_v37, %v2068_v52 }
 0x7dc   : > { %v2067_v57 = vmul.f32 0.35355338, %v1987_v56  ;;  %v2072_v58 = vadd.f32 %v7249_v37, %v2066_v55 }
 0x7dd   : > { %v2084_v2 = vsel %vm1392_vm5, %v2074_v63, -inf }
 0x7de   : > { %v2078_v59 = vsel %vm1392_vm5, %v2072_v58, -inf  ;;  %v2073_v60 = vadd.f32 %v7249_v37, %v2067_v57 }
 0x7df   : > { %2079 = vmax.xlane.f32.xlu0 %v2078_v59 }
 0x7e0   : > { %v2081_v1 = vsel %vm1392_vm5, %v2073_v60, -inf }
 0x7e1   : > { %2082 = vmax.xlane.f32.xlu1 %v2081_v1 }
 0x7e3   : > { %v7406_v3 = vpop.f32.mrb[28].mxu1  ;;  %2085 = vmax.xlane.f32.xlu0 %v2084_v2 }
 0x7e4   : > { %v7408_v4 = vpop.f32.mrb[29].mxu1 }
 0x7e5   : > { %v6563_v5 = vpack.i.bf16 %v7408_v4, %v7392_v42  ;;  %v6149_v6 = vpop.f32.mrb[30].mxu1 }
 0x7e6   : > { %v7412_v7 = vpop.f32.mrb[31].mxu1 }
 0x7e7   : > { %v6578_v9 = vpack.i.bf16 %v7406_v3, %v7412_v7 }
 0x7f2   : > { %2148 = vrot.lane.b32.xlu1 %v7214_v8, %s8353_s21 }
 0x7f3   : > { %v6164_v10 = vpop.f32.mrb[32].mxu1 }
 0x7f4   : > { %v2052_v11 = vpop.f32.mrb[33].mxu1  ;;  %v2071_v12 = vmul.f32 0.35355338, %v6164_v10 }
 0x7f5   : > { %v2069_v14 = vmul.f32 0.35355338, %v2052_v11  ;;  %v6165_v15 = vpop.f32.mrb[34].mxu1 }
 0x7f6   : > { %v2055_v16 = vpop.f32.mrb[35].mxu1  ;;  %2210 = vrot.lane.b32.xlu1 %v7224_v20, %s8353_s21  ;;  %v2077_v19 = vadd.f32 %v7260_v51, %v2071_v12 }
 0x7f7   : > { %v2075_v17 = vadd.f32 %v7260_v51, %v2069_v14  ;;  %v2070_v22 = vmul.f32 0.35355338, %v2055_v16 }
 0x7f8   : > { %v2093_v21 = vsel %vm1392_vm5, %v2077_v19, -inf }
 0x7f9   : > { %v2087_v18 = vsel %vm1392_vm5, %v2075_v17, -inf  ;;  %v2076_v24 = vadd.f32 %v7260_v51, %v2070_v22 }
 0x7fa   : > { %2088 = vmax.xlane.f32.xlu0 %v2087_v18 }
 0x7fb   : > { %v2090_v25 = vsel %vm1392_vm5, %v2076_v24, -inf }
 0x7fe   : > { %2094 = vmax.xlane.f32.xlu0 %v2093_v21 }
 0x814   : > { %2150 = vrot.lane.b32.xlu0 %v7220_v13, %s8353_s21 }
 0x818   : > { %2212 = vrot.lane.b32.xlu0 %v7226_v23, %s8353_s21  ;;  %s8355_s21 = smov 104  }
 0x81a   : > { %2091 = vmax.xlane.f32.xlu1 %v2090_v25 }
 0x82b   : > { %2276 = vrot.lane.b32.xlu1 %v7214_v8, %s8357_s2 }
 0x86c   : > { %v2080_v28 = vpop.xlane.xlu0 %2079 }
 0x86d   : > { %v2096_v33 = vsub.f32 %v2072_v58, %v2080_v28 }
 0x86e   : > { %v2083_v30 = vpop.xlane.xlu1 %2082 }
 0x86f   : > { %v2097_v34 = vsub.f32 %v2073_v60, %v2083_v30  ;;  %v2102_v44 = vmul.f32 1.442695, %v2096_v33 }
 0x870   : > { %v2086_v36 = vpop.xlane.xlu0 %2085 }
 0x871   : > { %v2104_v38 = vmul.f32 1.442695, %v2097_v34  ;;  %v2098_v40 = vsub.f32 %v2074_v63, %v2086_v36 }
 0x872   : > { %v2149_v41 = vpop.permute.xlu1 %2148 }
 0x873   : > { %6720 = vpow2.f32 %v2104_v38  ;;  %v2106_v51 = vmul.f32 1.442695, %v2098_v40  ;;  %6166 = vmatprep.subr.bf16.mxu0 %v2149_v41 }
 0x874   : > { %6167 = vmatpush3.bf16.msra.mxu0 %v2149_v41 }
 0x875   : > { %6722 = vpow2.f32 %v2106_v51 }
 0x876   : > { %v2211_v47 = vpop.permute.xlu1 %2210  ;;  %6724 = vpow2.f32 %v2102_v44 }
 0x877   : > { %6174 = vmatprep.subr.bf16.mxu1 %v2211_v47 }
 0x878   : > { %6175 = vmatpush3.bf16.msra.mxu1 %v2211_v47 }
 0x87d   : > { %v6721_v50 = vpop.eup %6720 }
 0x87e   : > { %v2117_v52 = vsel %vm1392_vm5, %v6721_v50, 0.0 }
 0x87f   : > { %v6723_v55 = vpop.eup %6722  ;;  %2118 = vadd.xlane.f32.xlu0 %v2117_v52 }
 0x880   : > { %v2120_v31 = vsel %vm1392_vm5, %v6723_v55, 0.0  ;;  %v6725_v56 = vpop.eup %6724 }
 0x881   : > { %2121 = vadd.xlane.f32.xlu1 %v2120_v31  ;;  %v2114_v57 = vsel %vm1392_vm5, %v6725_v56, 0.0 }
 0x885   : > { %2115 = vadd.xlane.f32.xlu1 %v2114_v57 }
 0x887   : > { %v2089_v58 = vpop.xlane.xlu0 %2088 }
 0x888   : > { %v2099_v59 = vsub.f32 %v2075_v17, %v2089_v58 }
 0x88a   : > { %v2108_v1 = vmul.f32 1.442695, %v2099_v59 }
 0x88b   : > { %v2095_v60 = vpop.xlane.xlu0 %2094 }
 0x88c   : > { %v2101_v63 = vsub.f32 %v2077_v19, %v2095_v60 }
 0x88e   : > { %v2112_v2 = vmul.f32 1.442695, %v2101_v63 }
 0x88f   : > { %v2151_v6 = vpop.permute.xlu0 %2150 }
 0x890   : > { %6726 = vpow2.f32 %v2112_v2  ;;  %6488 = vmatprep.subr.msk.bf16.mxu0 %vm1474_vm6, %v2151_v6  ;;  %v2160_v10 = vsel %vm1474_vm6, %v2151_v6, 0 }
 0x891   : > { %6169 = vmatpush3.bf16.msra.mxu0 %v2160_v10  ;;  %6728 = vpow2.f32 %v2108_v1 }
 0x893   : > { %v2213_v11 = vpop.permute.xlu0 %2212 }
 0x894   : > { %6489 = vmatprep.subr.msk.bf16.mxu1 %vm1474_vm6, %v2213_v11  ;;  %v2222_v12 = vsel %vm1474_vm6, %v2213_v11, 0 }
 0x895   : > { %6177 = vmatpush3.bf16.msra.mxu1 %v2222_v12 }
 0x896   : > { %2278 = vrot.lane.b32.xlu1 %v7220_v13, %s8357_s2 }
 0x89a   : > { %v6727_v14 = vpop.eup %6726 }
 0x89b   : > { %v2129_v15 = vsel %vm1392_vm5, %v6727_v14, 0.0  ;;  %v6729_v16 = vpop.eup %6728 }
 0x89c   : > { %2130 = vadd.xlane.f32.xlu0 %v2129_v15  ;;  %v2123_v17 = vsel %vm1392_vm5, %v6729_v16, 0.0 }
 0x8a0   : > { %2124 = vadd.xlane.f32.xlu0 %v2123_v17 }
 0x8a7   : > { %v2092_v18 = vpop.xlane.xlu1 %2091 }
 0x8a8   : > { %v2100_v19 = vsub.f32 %v2076_v24, %v2092_v18 }
 0x8aa   : > { %v2110_v21 = vmul.f32 1.442695, %v2100_v19 }
 0x8ab   : > { %v2277_v22 = vpop.permute.xlu1 %2276 }
 0x8ac   : > { %6730 = vpow2.f32 %v2110_v21  ;;  %6490 = vmatprep.subr.msk.bf16.mxu0 %vm1241_vm4, %v2277_v22  ;;  %v2287_v52 = vsel %vm1241_vm4, %v2277_v22, 0 }
 0x8b6   : > { %v6731_v25 = vpop.eup %6730  ;;  %2344 = vrot.lane.b32.xlu0 %v7224_v20, %s8357_s2 }
 0x8b7   : > { %v2126_v28 = vsel %vm1392_vm5, %v6731_v25, 0.0 }
 0x8ba   : > { %2274 = vrot.lane.b32.xlu0 %v7220_v13, %s8355_s21  ;;  %2127 = vadd.xlane.f32.xlu1 %v2126_v28 }
 0x8be   : > { %2340 = vrot.lane.b32.xlu0 %v7224_v20, %s8355_s21 }
 0x8cb   : > { %2272 = vrot.lane.b32.xlu1 %v7214_v8, %s8355_s21 }
 0x8cf   : > { %2346 = vrot.lane.b32.xlu1 %v7226_v23, %s8357_s2  ;;  %s8371_s2 = smov 16  }
 0x8d3   : > { %2342 = vrot.lane.b32.xlu1 %v7226_v23, %s8355_s21  ;;  %s8373_s21 = smov 8  }
 0x90c   : > { %v2119_v24 = vpop.xlane.xlu0 %2118 }
 0x90e   : > { %v2122_v30 = vpop.xlane.xlu1 %2121 }
 0x90f   : > { %6732 = vrcp.f32 %v2122_v30 }
 0x910   : > { %6734 = vrcp.f32 %v2119_v24 }
 0x912   : > { %v2116_v33 = vpop.xlane.xlu1 %2115 }
 0x913   : > { %6736 = vrcp.f32 %v2116_v33 }
 0x916   : > { %v2279_v31 = vpop.permute.xlu1 %2278 }
 0x917   : > { %v2290_v58 = vsel %vm1241_vm4, %v2279_v31, 0 }
 0x919   : > { %v6733_v34 = vpop.eup %6732 }
 0x91a   : > { %v6735_v36 = vpop.eup %6734  ;;  %v2140_v40 = vmul.f32 %v6733_v34, %v6723_v55 }
 0x91b   : > { %v2139_v44 = vmul.f32 %v6735_v36, %v6721_v50 }
 0x91c   : > { %v2145_v47 = vpack.c.bf16 %v2140_v40, %v2140_v40 }
 0x91d   : > { %v6737_v38 = vpop.eup %6736 }
 0x91e   : > { %v2138_v41 = vmul.f32 %v6737_v38, %v6725_v56 }
 0x920   : > { %v2144_v51 = vpack.c.bf16 %v2139_v44, %v2138_v41 }
 0x922   : > { %6170 = vmatprep.mubr.msk.bf16.mxu0 %vm1392_vm5, %v2144_v51 }
 0x923   : > { %6171 = vmatmul.mubr.msk.bf16.vlgmr.msra.gmra.mrb[28].mxu0 %vm1392_vm5, %v2145_v47  ;;  %v6928_v47 = vld [vmem:[%s8398_s20] ss:$0 sm:$0xff] }
 0x924   : > { %6183 = vmatpush3.bf16.xpose.msra.mxu0 %v2287_v52 }
 0x925   : > { %6491 = vmatprep.subr.msk.bf16.mxu0 %vm1241_vm4, %v2279_v31 }
 0x929   : > { %v2131_v57 = vpop.xlane.xlu0 %2130 }
 0x92a   : > { %6738 = vrcp.f32 %v2131_v57 }
 0x92c   : > { %6185 = vmatpush3.bf16.xpose.msra.mxu0 %v2290_v58 }
 0x92d   : > { %v2125_v59 = vpop.xlane.xlu0 %2124 }
 0x92e   : > { %6740 = vrcp.f32 %v2125_v59 }
 0x931   : > { %v2345_v55 = vpop.permute.xlu0 %2344 }
 0x932   : > { %6492 = vmatprep.subr.msk.bf16.mxu1 %vm1241_vm4, %v2345_v55  ;;  %v2355_v18 = vsel %vm1241_vm4, %v2345_v55, 0 }
 0x934   : > { %v6739_v63 = vpop.eup %6738 }
 0x935   : > { %v2275_v60 = vpop.permute.xlu0 %2274  ;;  %v2143_v6 = vmul.f32 %v6739_v63, %v6727_v14 }
 0x937   : > { %v2147_v15 = vpack.c.bf16 %v2143_v6, %v2143_v6 }
 0x938   : > { %v6741_v1 = vpop.eup %6740 }
 0x939   : > { %v2141_v10 = vmul.f32 %v6741_v1, %v6729_v16  ;;  %v2341_v17 = vpop.permute.xlu0 %2340 }
 0x947   : > { %v2128_v50 = vpop.xlane.xlu1 %2127 }
 0x948   : > { %6742 = vrcp.f32 %v2128_v50 }
 0x94b   : > { %v2273_v56 = vpop.permute.xlu1 %2272 }
 0x94c   : > { %6186 = vmatprep.mubr.msk.bf16.mxu0 %vm1241_vm4, %v2273_v56 }
 0x94d   : > { %6187 = vmatmul.mubr.msk.bf16.vlgmr.msra.gmra.mrb[32].mxu0 %vm1241_vm4, %v2275_v60 }
 0x94f   : > { %v2347_v19 = vpop.permute.xlu1 %2346 }
 0x950   : > { %v2358_v21 = vsel %vm1241_vm4, %v2347_v19, 0 }
 0x952   : > { %v6743_v2 = vpop.eup %6742 }
 0x953   : > { %v2142_v11 = vmul.f32 %v6743_v2, %v6731_v25  ;;  %v2343_v14 = vpop.permute.xlu1 %2342 }
 0x955   : > { %v2146_v12 = vpack.c.bf16 %v2142_v11, %v2141_v10 }
 0x957   : > { %6178 = vmatprep.mubr.msk.bf16.mxu1 %vm1392_vm5, %v2146_v12 }
 0x958   : > { %6179 = vmatmul.mubr.msk.bf16.vlgmr.msra.gmra.mrb[36].mxu1 %vm1392_vm5, %v2147_v15  ;;  %v6929_v15 = vld [vmem:[%s8398_s20 + $0x1] ss:$0 sm:$0xff] }
 0x959   : > { %6191 = vmatpush3.bf16.xpose.msra.mxu1 %v2355_v18  ;;  %6194 = vmatprep.mubr.msk.bf16.mxu1 %vm1241_vm4, %v2341_v17 }
 0x95a   : > { %6493 = vmatprep.subr.msk.bf16.mxu1 %vm1241_vm4, %v2347_v19 }
 0x961   : > { %6193 = vmatpush3.bf16.xpose.msra.mxu1 %v2358_v21 }
 0x968   : > { %6195 = vmatmul.mubr.msk.bf16.vlgmr.msra.gmra.mrb[40].mxu1 %vm1241_vm4, %v2343_v14 }
 0x9f6   : > { %v7472_v16 = vpop.f32.mrb[28].mxu0 }
 0x9f7   : > { %v7474_v22 = vpop.f32.mrb[29].mxu0 }
 0x9f8   : > { %v6173_v25 = vpop.f32.mrb[30].mxu0 }
 0x9f9   : > { %v7476_v28 = vpop.f32.mrb[31].mxu0 }
 0x9fa   : > { %v6553_v24 = vpack.i.bf16 %v7476_v28, %v7474_v22 }
 0xa20   : > { %v6188_v30 = vpop.f32.mrb[32].mxu0 }
 0xa21   : > { %v2326_v33 = vpop.f32.mrb[33].mxu0  ;;  %v2410_v34 = vmul.f32 0.35355338, %v6188_v30 }
 0xa22   : > { %v2408_v36 = vmul.f32 0.35355338, %v2326_v33  ;;  %v6189_v38 = vpop.f32.mrb[34].mxu0 }
 0xa23   : > { %v2329_v40 = vpop.f32.mrb[35].mxu0  ;;  %v2416_v31 = vadd.f32 %v6928_v47, %v2410_v34 }
 0xa24   : > { %v2409_v41 = vmul.f32 0.35355338, %v2329_v40  ;;  %v2414_v44 = vadd.f32 %v7249_v37, %v2408_v36 }
 0xa25   : > { %v2426_v58 = vsel %vm1392_vm5, %v2416_v31, -inf }
 0xa26   : > { %v2420_v51 = vsel %vm1392_vm5, %v2414_v44, -inf  ;;  %v2415_v52 = vadd.f32 %v6928_v47, %v2409_v41 }
 0xa27   : > { %2421 = vmax.xlane.f32.xlu0 %v2420_v51 }
 0xa28   : > { %v2423_v57 = vsel %vm1392_vm5, %v2415_v52, -inf }
 0xa29   : > { %2424 = vmax.xlane.f32.xlu1 %v2423_v57 }
 0xa2b   : > { %v7487_v59 = vpop.f32.mrb[36].mxu1  ;;  %2427 = vmax.xlane.f32.xlu0 %v2426_v58 }
 0xa2c   : > { %v7489_v55 = vpop.f32.mrb[37].mxu1 }
 0xa2d   : > { %v6568_v37 = vpack.i.bf16 %v7489_v55, %v7472_v16  ;;  %v6181_v50 = vpop.f32.mrb[38].mxu1 }
 0xa2e   : > { %v7493_v56 = vpop.f32.mrb[39].mxu1 }
 0xa2f   : > { %v6583_v60 = vpack.i.bf16 %v7487_v59, %v7493_v56 }
 0xa3b   : > { %v6196_v63 = vpop.f32.mrb[40].mxu1 }
 0xa3c   : > { %v2394_v1 = vpop.f32.mrb[41].mxu1  ;;  %v2413_v2 = vmul.f32 0.35355338, %v6196_v63 }
 0xa3d   : > { %v2411_v6 = vmul.f32 0.35355338, %v2394_v1  ;;  %v6197_v10 = vpop.f32.mrb[42].mxu1 }
 0xa3e   : > { %v2397_v11 = vpop.f32.mrb[43].mxu1  ;;  %v2419_v21 = vadd.f32 %v6929_v15, %v2413_v2 }
 0xa3f   : > { %v2412_v12 = vmul.f32 0.35355338, %v2397_v11  ;;  %v2417_v17 = vadd.f32 %v6929_v15, %v2411_v6 }
 0xa40   : > { %v2435_v25 = vsel %vm1392_vm5, %v2419_v21, -inf }
 0xa41   : > { %v2429_v18 = vsel %vm1392_vm5, %v2417_v17, -inf  ;;  %v2418_v19 = vadd.f32 %v6929_v15, %v2412_v12 }
 0xa42   : > { %2430 = vmax.xlane.f32.xlu0 %v2429_v18 }
 0xa43   : > { %v2432_v14 = vsel %vm1392_vm5, %v2418_v19, -inf }
 0xa44   : > { %2433 = vmax.xlane.f32.xlu1 %v2432_v14 }
 0xa46   : > { %2436 = vmax.xlane.f32.xlu0 %v2435_v25 }
 0xa55   : > { %2490 = vrot.lane.b32.xlu1 %v7214_v8, %s8361_s28 }
 0xab4   : > { %v2422_v30 = vpop.xlane.xlu0 %2421 }
 0xab5   : > { %v2438_v34 = vsub.f32 %v2414_v44, %v2422_v30 }
 0xab6   : > { %v2425_v33 = vpop.xlane.xlu1 %2424 }
 0xab7   : > { %v2439_v36 = vsub.f32 %v2415_v52, %v2425_v33  ;;  %v2444_v51 = vmul.f32 1.442695, %v2438_v34 }
 0xab8   : > { %v2428_v38 = vpop.xlane.xlu0 %2427 }
 0xab9   : > { %v2446_v40 = vmul.f32 1.442695, %v2439_v36  ;;  %v2440_v41 = vsub.f32 %v2416_v31, %v2428_v38 }
 0xabb   : > { %6744 = vpow2.f32 %v2446_v40  ;;  %v2448_v47 = vmul.f32 1.442695, %v2440_v41 }
 0xabd   : > { %6746 = vpow2.f32 %v2448_v47 }
 0xabe   : > { %6748 = vpow2.f32 %v2444_v51 }
 0xac5   : > { %v6745_v57 = vpop.eup %6744 }
 0xac6   : > { %v2459_v58 = vsel %vm1392_vm5, %v6745_v57, 0.0 }
 0xac7   : > { %v6747_v50 = vpop.eup %6746  ;;  %2460 = vadd.xlane.f32.xlu0 %v2459_v58 }
 0xac8   : > { %v2462_v63 = vsel %vm1392_vm5, %v6747_v50, 0.0  ;;  %v6749_v8 = vpop.eup %6748 }
 0xac9   : > { %2463 = vadd.xlane.f32.xlu1 %v2462_v63  ;;  %v2456_v44 = vsel %vm1392_vm5, %v6749_v8, 0.0 }
 0xacd   : > { %2457 = vadd.xlane.f32.xlu1 %v2456_v44 }
 0xacf   : > { %v2431_v52 = vpop.xlane.xlu0 %2430 }
 0xad0   : > { %v2441_v31 = vsub.f32 %v2417_v17, %v2431_v52 }
 0xad1   : > { %v2434_v1 = vpop.xlane.xlu1 %2433 }
 0xad2   : > { %v2450_v11 = vmul.f32 1.442695, %v2441_v31  ;;  %v2442_v17 = vsub.f32 %v2418_v19, %v2434_v1  ;;  %v6640_v1 = vld [vmem:[%s7547_s23] sm:$0xff]   ;;  %v6641_v31 = vld [vmem:[%s7547_s23 + $0x8] sm:$0xff]  }
 0xad3   : > { %v2437_v2 = vpop.xlane.xlu0 %2436 }
 0xad4   : > { %v2443_v6 = vsub.f32 %v2419_v21, %v2437_v2  ;;  %v2452_v21 = vmul.f32 1.442695, %v2442_v17 }
 0xad5   : > { %v2491_v10 = vpop.permute.xlu1 %2490 }
 0xad6   : > { %v2454_v12 = vmul.f32 1.442695, %v2443_v6  ;;  %6198 = vmatprep.subr.bf16.mxu0 %v2491_v10 }
 0xad7   : > { %6199 = vmatpush3.bf16.msra.mxu0 %v2491_v10 }
 0xad8   : > { %6750 = vpow2.f32 %v2454_v12 }
 0xad9   : > { %6752 = vpow2.f32 %v2450_v11 }
 0xada   : > { %6754 = vpow2.f32 %v2452_v21 }
 0xade   : > { %2552 = vrot.lane.b32.xlu1 %v7224_v20, %s8361_s28 }
 0xae2   : > { %v6751_v15 = vpop.eup %6750 }
 0xae3   : > { %v2471_v18 = vsel %vm1392_vm5, %v6751_v15, 0.0  ;;  %v6753_v14 = vpop.eup %6752 }
 0xae4   : > { %2472 = vadd.xlane.f32.xlu0 %v2471_v18  ;;  %v2465_v25 = vsel %vm1392_vm5, %v6753_v14, 0.0  ;;  %v6755_v30 = vpop.eup %6754 }
 0xae5   : > { %v2468_v33 = vsel %vm1392_vm5, %v6755_v30, 0.0 }
 0xae8   : > { %2466 = vadd.xlane.f32.xlu0 %v2465_v25 }
 0xafe   : > { %2492 = vrot.lane.b32.xlu0 %v7220_v13, %s8361_s28 }
 0xb02   : > { %6549 = vrot.lane.b32.xlu0 %v6548_v46, %s8373_s21  ;;  %2469 = vadd.xlane.f32.xlu1 %v2468_v33 }
 0xb13   : > { %2554 = vrot.lane.b32.xlu1 %v7226_v23, %s8361_s28  ;;  %s7648_s28 = scalar_lea.vmem %s8338_s11, %s7093_s5 }
 0xb17   : > { %6554 = vrot.lane.b32.xlu1 %v6553_v24, %s8371_s2 }
 0xb1b   : > { %6564 = vrot.lane.b32.xlu1 %v6563_v5, %s8373_s21 }
 0xb54   : > { %v2461_v13 = vpop.xlane.xlu0 %2460 }
 0xb55   : > { %6756 = vrcp.f32 %v2461_v13 }
 0xb56   : > { %v2464_v20 = vpop.xlane.xlu1 %2463 }
 0xb5a   : > { %v2458_v43 = vpop.xlane.xlu1 %2457 }
 0xb5b   : > { %6758 = vrcp.f32 %v2458_v43 }
 0xb5c   : > { %6760 = vrcp.f32 %v2464_v20 }
 0xb5e   : > { %v2553_v45 = vpop.permute.xlu1 %2552 }
 0xb5f   : > { %6206 = vmatprep.subr.bf16.mxu1 %v2553_v45  ;;  %v6757_v23 = vpop.eup %6756 }
 0xb60   : > { %6207 = vmatpush3.bf16.msra.mxu1 %v2553_v45  ;;  %v2481_v34 = vmul.f32 %v6757_v23, %v6745_v57 }
 0xb65   : > { %v6759_v46 = vpop.eup %6758 }
 0xb66   : > { %v2480_v19 = vmul.f32 %v6759_v46, %v6749_v8  ;;  %v6761_v28 = vpop.eup %6760 }
 0xb67   : > { %v2482_v4 = vmul.f32 %v6761_v28, %v6747_v50 }
 0xb68   : > { %v2486_v36 = vpack.c.bf16 %v2481_v34, %v2480_v19 }
 0xb69   : > { %v2487_v38 = vpack.c.bf16 %v2482_v4, %v2482_v4 }
 0xb6a   : > { %6202 = vmatprep.mubr.msk.bf16.mxu0 %vm1392_vm5, %v2486_v36 }
 0xb71   : > { %v2473_v22 = vpop.xlane.xlu0 %2472 }
 0xb72   : > { %6762 = vrcp.f32 %v2473_v22 }
 0xb75   : > { %v2467_v42 = vpop.xlane.xlu0 %2466 }
 0xb76   : > { %6764 = vrcp.f32 %v2467_v42 }
 0xb79   : > { %v2493_v5 = vpop.permute.xlu0 %2492 }
 0xb7a   : > { %6494 = vmatprep.subr.msk.bf16.mxu0 %vm1474_vm6, %v2493_v5  ;;  %v2502_v24 = vsel %vm1474_vm6, %v2493_v5, 0 }
 0xb7b   : > { %6201 = vmatpush3.bf16.msra.mxu0 %v2502_v24 }
 0xb7c   : > { %6214 = vmatprep.subr.bf16.mxu0 %v6940_v0  ;;  %v6763_v47 = vpop.eup %6762 }
 0xb7d   : > { %v2485_v50 = vmul.f32 %v6763_v47, %v6751_v15  ;;  %v6550_v16 = vpop.permute.xlu0 %6549 }
 0xb7e   : > { %6203 = vmatmul.mubr.msk.bf16.vlgmr.msra.gmra.mrb[36].mxu0 %vm1392_vm5, %v2487_v38  ;;  %v6551_v3 = vunpack.i.l.bf16 %v6550_v16 }
 0xb7f   : > { %6218 = vmatprep.mubr.msk.bf16.mxu0 %vm6941_vm0, %v6940_v0  ;;  %v2489_v52 = vpack.c.bf16 %v2485_v50, %v2485_v50  ;;  %6215 = vmatpush3.bf16.msra.mxu0 %v6640_v1 }
 0xb80   : > { %v6765_v57 = vpop.eup %6764  ;;  %6216 = vmatprep.subr.bf16.mxu0 %v6940_v0  ;;  %v2686_v13 = vsel %vm1241_vm4, %v7320_v27, %v6551_v3 }
 0xb81   : > { %v2483_v63 = vmul.f32 %v6765_v57, %v6753_v14 }
 0xb83   : > { %6217 = vmatpush3.bf16.msra.mxu0 %v6641_v31 }
 0xb84   : > { %6246 = vmatprep.subr.bf16.mxu0 %v6940_v0 }
 0xb8f   : > { %v2470_v40 = vpop.xlane.xlu1 %2469 }
 0xb90   : > { %6766 = vrcp.f32 %v2470_v40 }
 0xb93   : > { %v2555_v41 = vpop.permute.xlu1 %2554 }
 0xb94   : > { %6495 = vmatprep.subr.msk.bf16.mxu1 %vm1474_vm6, %v2555_v41  ;;  %v2564_v51 = vsel %vm1474_vm6, %v2555_v41, 0 }
 0xb95   : > { %6209 = vmatpush3.bf16.msra.mxu1 %v2564_v51 }
 0xb96   : > { %6230 = vmatprep.subr.bf16.mxu1 %v6940_v0 }
 0xb97   : > { %v6555_v55 = vpop.permute.xlu1 %6554 }
 0xb98   : > { %v6557_v7 = vunpack.i.h.bf16 %v6555_v55 }
 0xb9a   : > { %v6767_v58 = vpop.eup %6766 }
 0xb9b   : > { %v2484_v8 = vmul.f32 %v6767_v58, %v6755_v30  ;;  %v6565_v46 = vpop.permute.xlu1 %6564 }
 0xb9c   : > { %v6567_v19 = vunpack.i.h.bf16 %v6565_v46  ;;  %v6566_v27 = vunpack.i.l.bf16 %v6565_v46 }
 0xb9d   : > { %v2488_v44 = vpack.c.bf16 %v2484_v8, %v2483_v63 }
 0xb9e   : > { %v2689_v42 = vsel %vm1241_vm4, %v7332_v49, %v6567_v19  ;;  %v2688_v4 = vsel %vm1241_vm4, %v7318_v26, %v6566_v27 }
 0xb9f   : > { %6210 = vmatprep.mubr.msk.bf16.mxu1 %vm1392_vm5, %v2488_v44 }
 0xba0   : > { %6211 = vmatmul.mubr.msk.bf16.vlgmr.msra.gmra.mrb[44].mxu1 %vm1392_vm5, %v2489_v52 }
 0xba1   : > { %6234 = vmatprep.mubr.msk.bf16.mxu1 %vm6941_vm0, %v6940_v0 }
 0xc51   : > { %v6204_v2 = vpop.f32.mrb[36].mxu0 }
 0xc52   : > { %v2538_v6 = vpop.f32.mrb[37].mxu0 }
 0xc53   : > { %v6205_v10 = vpop.f32.mrb[38].mxu0 }
 0xc54   : > { %v2541_v11 = vpop.f32.mrb[39].mxu0 }
 0xc55   : > { %v6558_v12 = vpack.i.bf16 %v2541_v11, %v2538_v6 }
 0xc57   : > { %6559 = vrot.lane.b32.xlu0 %v6558_v12, %s8369_s0 }
 0xc5b   : > { %6569 = vrot.lane.b32.xlu0 %v6568_v37, %s8371_s2  ;;  %v6552_v37 = vunpack.i.h.bf16 %v6550_v16 }
 0xc5d   : > { %v2687_v33 = vsel %vm1241_vm4, %v7322_v29, %v6552_v37 }
 0xc5e   : > { %v2694_v45 = vsel %vm2692_vm7, %v2687_v33, %v6557_v7 }
 0xc5f   : > { %6579 = vrot.lane.b32.xlu0 %v6578_v9, %s8373_s21  ;;  %v6556_v9 = vunpack.i.l.bf16 %v6555_v55  ;;  %s7712_s21 = scalar_lea.vmem %s8343_s16, %s7093_s5 }
 0xc61   : > { %v2693_v59 = vsel %vm2692_vm7, %v2686_v13, %v6556_v9 }
 0xc73   : > { %v6212_v15 = vpop.f32.mrb[44].mxu1 }
 0xc74   : > { %v2600_v18 = vpop.f32.mrb[45].mxu1 }
 0xc75   : > { %v6573_v14 = vpack.i.bf16 %v2600_v18, %v6204_v2  ;;  %v6213_v25 = vpop.f32.mrb[46].mxu1 }
 0xc76   : > { %v2603_v17 = vpop.f32.mrb[47].mxu1 }
 0xc77   : > { %v6588_v21 = vpack.i.bf16 %v6212_v15, %v2603_v17  ;;  %6574 = vrot.lane.b32.xlu1 %v6573_v14, %s8369_s0 }
 0xc79   : > { %6589 = vrot.lane.b32.xlu0 %v6588_v21, %s8369_s0  ;;  %s7605_s0 = scalar_lea.vmem %s8337_s10, %s7093_s5 }
 0xc7b   : > { %6584 = vrot.lane.b32.xlu1 %v6583_v60, %s8371_s2  ;;  %s7632_s2 = scalar_lea.vmem %s8340_s13, %s7141_s4  ;;  %s7698_s4 = scalar_lea.vmem %s8341_s14, %s7093_s5 }
 0xcc9   : > { %v6560_v30 = vpop.permute.xlu0 %6559 }
 0xcca   : > { %v6562_v20 = vunpack.i.h.bf16 %v6560_v30  ;;  %v6561_v43 = vunpack.i.l.bf16 %v6560_v30 }
 0xccc   : > { %v2699_v56 = vsel %vm1392_vm5, %v2693_v59, %v6561_v43  ;;  %v2700_v60 = vsel %vm1392_vm5, %v2694_v45, %v6562_v20 }
 0xccd   : > { %v2705_v23 = vpack.c.bf16 %v2700_v60, %v2699_v56  ;;  %v6570_v29 = vpop.permute.xlu0 %6569 }
 0xcce   : > { %v6572_v34 = vunpack.i.h.bf16 %v6570_v29  ;;  %v6571_v36 = vunpack.i.l.bf16 %v6570_v29 }
 0xccf   : > { %6219 = vmatmul.mubr.msk.bf16.vlgmr.msra.gmra.mrb[40].mxu0 %vm1164_vm3, %v2705_v23 }
 0xcd0   : > { %6222 = vmatprep.mubr.msk.bf16.mxu0 %vm6941_vm0, %v6940_v0  ;;  %v2695_v38 = vsel %vm2692_vm7, %v2688_v4, %v6571_v36  ;;  %v2696_v40 = vsel %vm2692_vm7, %v2689_v42, %v6572_v34 }
 0xcd1   : > { %v6580_v22 = vpop.permute.xlu0 %6579 }
 0xcd2   : > { %v6582_v41 = vunpack.i.h.bf16 %v6580_v22  ;;  %v6581_v51 = vunpack.i.l.bf16 %v6580_v22 }
 0xcd4   : > { %v2691_v26 = vsel %vm1241_vm4, %v7330_v48, %v6582_v41  ;;  %v2690_v44 = vsel %vm1241_vm4, %v7334_v39, %v6581_v51  ;;  %v5753_v48 = vld [vmem:[%s7605_s0] ss:$0 sm:$0xff] }
 0xce9   : > { %v6575_v28 = vpop.permute.xlu1 %6574 }
 0xcea   : > { %v6577_v5 = vunpack.i.h.bf16 %v6575_v28  ;;  %v6576_v24 = vunpack.i.l.bf16 %v6575_v28 }
 0xceb   : > { %v6590_v58 = vpop.permute.xlu0 %6589 }
 0xcec   : > { %v2701_v47 = vsel %vm1392_vm5, %v2695_v38, %v6576_v24  ;;  %v2702_v57 = vsel %vm1392_vm5, %v2696_v40, %v6577_v5  ;;  %v6592_v52 = vunpack.i.h.bf16 %v6590_v58  ;;  %v6591_v1 = vunpack.i.l.bf16 %v6590_v58 }
 0xced   : > { %v6585_v50 = vpop.permute.xlu1 %6584  ;;  %v2706_v63 = vpack.c.bf16 %v2702_v57, %v2701_v47  ;;  %v6642_v57 = vld [vmem:[%s7632_s2] sm:$0xff]  }
 0xcee   : > { %v6587_v49 = vunpack.i.h.bf16 %v6585_v50  ;;  %v6586_v8 = vunpack.i.l.bf16 %v6585_v50  ;;  %6231 = vmatpush3.bf16.msra.mxu1 %v6642_v57  ;;  %v6645_v57 = vld [vmem:[%s7112_s19 + $0x8] sm:$0xff]  }
 0xcef   : > { %6223 = vmatmul.mubr.msk.bf16.gmra.mrb[44].mxu0 %vm1164_vm3, %v2706_v63  ;;  %6232 = vmatprep.subr.bf16.mxu1 %v6940_v0 }
 0xcf0   : > { %v2698_v31 = vsel %vm2692_vm7, %v2691_v26, %v6587_v49  ;;  %v2697_v2 = vsel %vm2692_vm7, %v2690_v44, %v6586_v8  ;;  %6226 = vmatprep.mubr.msk.bf16.mxu0 %vm6941_vm0, %v6940_v0  ;;  %v6643_v26 = vld [vmem:[%s7632_s2 + $0x8] sm:$0xff]  }
 0xcf1   : > { %v2703_v6 = vsel %vm1392_vm5, %v2697_v2, %v6591_v1  ;;  %v2704_v10 = vsel %vm1392_vm5, %v2698_v31, %v6592_v52 }
 0xcf2   : > { %v2707_v11 = vpack.c.bf16 %v2704_v10, %v2703_v6  ;;  %6233 = vmatpush3.bf16.msra.mxu1 %v6643_v26 }
 0xcf3   : > { %6266 = vmatprep.subr.bf16.mxu1 %v6940_v0 }
 0xcf7   : > { %6227 = vmatmul.mubr.msk.bf16.gmra.mrb[48].mxu0 %vm1164_vm3, %v2707_v11 }
 0xcf8   : > { %6254 = vmatprep.mubr.msk.bf16.mxu0 %vm6941_vm0, %v6940_v0 }
 0xda2   : > { %v2774_v39 = vpop.f32.mrb[40].mxu0 }
 0xda3   : > { %v2775_v12 = vadd.f32 %v5753_v48, %v2774_v39  ;;  %v6220_v15 = vpop.f32.mrb[41].mxu0 }
 0xda4   : > { %v2777_v18 = vpop.f32.mrb[42].mxu0 }
 0xda5   : > { %v2797_v14 = vadd.f32 %v2775_v12, %v7176_v32  ;;  %v2778_v25 = vadd.f32 %v5753_v48, %v2777_v18  ;;  %v6221_v17 = vpop.f32.mrb[43].mxu0 }
 0xda6   : > { %v5759_v17 = vld [vmem:[%s7648_s28] ss:$0 sm:$0xff] }
 0xda7   : > { %v2798_v21 = vadd.f32 %v2778_v25, %v7178_v35  ;;  %v2805_v16 = vsel %vm1164_vm3, %v2797_v14, 0.0 }
 0xda8   : > { %2806 = vadd.xlane.f32.xlu1 %v2805_v16 }
 0xda9   : > { %v2808_v55 = vsel %vm1164_vm3, %v2798_v21, 0.0 }
 0xdaa   : > { %2809 = vadd.xlane.f32.xlu0 %v2808_v55 }
 0xdc2   : > { %v2782_v37 = vpop.f32.mrb[44].mxu0 }
 0xdc3   : > { %v2783_v3 = vadd.f32 %v5753_v48, %v2782_v37  ;;  %v6224_v7 = vpop.f32.mrb[45].mxu0 }
 0xdc4   : > { %v2785_v9 = vpop.f32.mrb[46].mxu0 }
 0xdc5   : > { %v2799_v30 = vadd.f32 %v2783_v3, %v7189_v53  ;;  %v2786_v33 = vadd.f32 %v5753_v48, %v2785_v9  ;;  %v6225_v13 = vpop.f32.mrb[47].mxu0  ;;  %v5760_v3 = vld [vmem:[%s7655_s22] ss:$0 sm:$0xff] }
 0xdc7   : > { %v2800_v32 = vadd.f32 %v2786_v33, %v7191_v54  ;;  %v2811_v20 = vsel %vm1164_vm3, %v2799_v30, 0.0 }
 0xdc8   : > { %2812 = vadd.xlane.f32.xlu0 %v2811_v20 }
 0xdc9   : > { %v2814_v35 = vsel %vm1164_vm3, %v2800_v32, 0.0 }
 0xdca   : > { %2815 = vadd.xlane.f32.xlu1 %v2814_v35  ;;  %v2790_v43 = vpop.f32.mrb[48].mxu0 }
 0xdcb   : > { %v2791_v45 = vadd.f32 %v5753_v48, %v2790_v43  ;;  %v6228_v59 = vpop.f32.mrb[49].mxu0 }
 0xdcc   : > { %v2793_v56 = vpop.f32.mrb[50].mxu0 }
 0xdcd   : > { %v2801_v60 = vadd.f32 %v2791_v45, %v7202_v62  ;;  %v2794_v23 = vadd.f32 %v5753_v48, %v2793_v56  ;;  %v6229_v29 = vpop.f32.mrb[51].mxu0 }
 0xdcf   : > { %v2802_v53 = vadd.f32 %v2794_v23, %v7200_v61  ;;  %v2817_v46 = vsel %vm1164_vm3, %v2801_v60, 0.0 }
 0xdd0   : > { %2818 = vadd.xlane.f32.xlu0 %v2817_v46 }
 0xdd1   : > { %v2820_v54 = vsel %vm1164_vm3, %v2802_v53, 0.0 }
 0xdd2   : > { %2821 = vadd.xlane.f32.xlu1 %v2820_v54 }
 0xe35   : > { %v2807_v19 = vpop.xlane.xlu1 %2806 }
 0xe36   : > { %v2824_v27 = vmul.f32 0.03125, %v2807_v19 }
 0xe37   : > { %v2810_v34 = vpop.xlane.xlu0 %2809 }
 0xe38   : > { %v2830_v36 = vsub.f32 %v2797_v14, %v2824_v27  ;;  %v2825_v22 = vmul.f32 0.03125, %v2810_v34 }
 0xe3a   : > { %v2831_v28 = vsub.f32 %v2798_v21, %v2825_v22  ;;  %v2836_v42 = vmul.f32 %v2830_v36, %v2830_v36 }
 0xe3c   : > { %v2842_v62 = vsel %vm1164_vm3, %v2836_v42, 0.0  ;;  %v2837_v4 = vmul.f32 %v2831_v28, %v2831_v28 }
 0xe3d   : > { %2843 = vadd.xlane.f32.xlu0 %v2842_v62 }
 0xe3e   : > { %v2845_v61 = vsel %vm1164_vm3, %v2837_v4, 0.0 }
 0xe3f   : > { %2846 = vadd.xlane.f32.xlu1 %v2845_v61 }
 0xe55   : > { %v2813_v5 = vpop.xlane.xlu0 %2812 }
 0xe56   : > { %v2826_v24 = vmul.f32 0.03125, %v2813_v5 }
 0xe57   : > { %v2816_v38 = vpop.xlane.xlu1 %2815 }
 0xe58   : > { %v7622_v40 = vsub.f32 %v2799_v30, %v2826_v24  ;;  %v2827_v41 = vmul.f32 0.03125, %v2816_v38 }
 0xe5a   : > { %v7624_v51 = vsub.f32 %v2800_v32, %v2827_v41  ;;  %v2838_v47 = vmul.f32 %v7622_v40, %v7622_v40 }
 0xe5c   : > { %v2848_v58 = vsel %vm1164_vm3, %v2838_v47, 0.0  ;;  %v2839_v50 = vmul.f32 %v7624_v51, %v7624_v51  ;;  %v6644_v47 = vld [vmem:[%s7112_s19] sm:$0xff]  }
 0xe5d   : > { %2849 = vadd.xlane.f32.xlu0 %v2848_v58  ;;  %v2819_v63 = vpop.xlane.xlu0 %2818  ;;  %6247 = vmatpush3.bf16.msra.mxu0 %v6644_v47  ;;  %v6646_v58 = vld [vmem:[%s7112_s19 + $0x10] sm:$0xff]  }
 0xe5e   : > { %v2828_v49 = vmul.f32 0.03125, %v2819_v63  ;;  %v2851_v8 = vsel %vm1164_vm3, %v2839_v50, 0.0  ;;  %6248 = vmatprep.subr.bf16.mxu0 %v6940_v0  ;;  %v6647_v50 = vld [vmem:[%s7112_s19 + $0x18] sm:$0xff]   ;;  %v5761_v63 = vld [vmem:[%s7698_s4] ss:$0 sm:$0xff] }
 0xe5f   : > { %2852 = vadd.xlane.f32.xlu1 %v2851_v8  ;;  %v2822_v44 = vpop.xlane.xlu1 %2821 }
 0xe60   : > { %v2834_v52 = vsub.f32 %v2801_v60, %v2828_v49  ;;  %v2829_v1 = vmul.f32 0.03125, %v2822_v44 }
 0xe61   : > { %6249 = vmatpush3.bf16.msra.mxu0 %v6645_v57 }
 0xe62   : > { %v2835_v31 = vsub.f32 %v2802_v53, %v2829_v1  ;;  %v2840_v2 = vmul.f32 %v2834_v52, %v2834_v52  ;;  %6250 = vmatprep.subr.bf16.mxu0 %v6940_v0 }
 0xe64   : > { %v2854_v6 = vsel %vm1164_vm3, %v2840_v2, 0.0  ;;  %v2841_v10 = vmul.f32 %v2835_v31, %v2835_v31 }
 0xe65   : > { %2855 = vadd.xlane.f32.xlu0 %v2854_v6  ;;  %6251 = vmatpush3.bf16.msra.mxu0 %v6646_v58 }
 0xe66   : > { %v2857_v11 = vsel %vm1164_vm3, %v2841_v10, 0.0  ;;  %6252 = vmatprep.subr.bf16.mxu0 %v6940_v0 }
 0xe67   : > { %2858 = vadd.xlane.f32.xlu1 %v2857_v11 }
 0xe69   : > { %6253 = vmatpush3.bf16.msra.mxu0 %v6647_v50 }
 0xeca   : > { %v2844_v48 = vpop.xlane.xlu0 %2843 }
 0xecb   : > { %v2860_v39 = vmul.f32 0.03125, %v2844_v48 }
 0xecc   : > { %v2847_v12 = vpop.xlane.xlu1 %2846 }
 0xecd   : > { %v2866_v15 = vadd.f32 1e-05, %v2860_v39  ;;  %v2861_v18 = vmul.f32 0.03125, %v2847_v12 }
 0xecf   : > { %6768 = vrsqrt.f32 %v2866_v15  ;;  %v2867_v14 = vadd.f32 1e-05, %v2861_v18 }
 0xed1   : > { %6770 = vrsqrt.f32 %v2867_v14 }
 0xed9   : > { %v6769_v25 = vpop.eup %6768 }
 0xeda   : > { %v2878_v21 = vmul.f32 %v6769_v25, %v2830_v36 }
 0xedb   : > { %v6771_v16 = vpop.eup %6770 }
 0xedc   : > { %v2890_v55 = vmul.f32 %v5759_v17, %v2878_v21  ;;  %v2879_v37 = vmul.f32 %v6771_v16, %v2831_v28 }
 0xede   : > { %v2891_v7 = vmul.f32 %v5759_v17, %v2879_v37  ;;  %v7658_v9 = vadd.f32 %v5760_v3, %v2890_v55 }
 0xee0   : > { %v7660_v30 = vadd.f32 %v5760_v3, %v2891_v7 }
 0xee2   : > { %v2908_v33 = vpack.c.bf16 %v7660_v30, %v7658_v9 }
 0xee4   : > { %6235 = vmatmul.mubr.msk.bf16.vlgmr.msra.gmra.mrb[48].mxu1 %vm1164_vm3, %v2908_v33 }
 0xee5   : > { %6238 = vmatprep.mubr.msk.bf16.mxu1 %vm6941_vm0, %v6940_v0 }
 0xeea   : > { %v2850_v13 = vpop.xlane.xlu0 %2849 }
 0xeeb   : > { %v2862_v32 = vmul.f32 0.03125, %v2850_v13 }
 0xeec   : > { %v2853_v20 = vpop.xlane.xlu1 %2852 }
 0xeed   : > { %v2868_v35 = vadd.f32 1e-05, %v2862_v32  ;;  %v2863_v43 = vmul.f32 0.03125, %v2853_v20 }
 0xeef   : > { %6772 = vrsqrt.f32 %v2868_v35  ;;  %v2869_v45 = vadd.f32 1e-05, %v2863_v43 }
 0xef1   : > { %6774 = vrsqrt.f32 %v2869_v45 }
 0xef2   : > { %v2856_v59 = vpop.xlane.xlu0 %2855 }
 0xef3   : > { %v2864_v56 = vmul.f32 0.03125, %v2856_v59 }
 0xef4   : > { %v2859_v60 = vpop.xlane.xlu1 %2858 }
 0xef5   : > { %v2870_v23 = vadd.f32 1e-05, %v2864_v56  ;;  %v2865_v29 = vmul.f32 0.03125, %v2859_v60 }
 0xef7   : > { %6776 = vrsqrt.f32 %v2870_v23  ;;  %v2871_v53 = vadd.f32 1e-05, %v2865_v29 }
 0xef9   : > { %v6773_v46 = vpop.eup %6772  ;;  %6778 = vrsqrt.f32 %v2871_v53 }
 0xefa   : > { %v2880_v54 = vmul.f32 %v6773_v46, %v7622_v40 }
 0xefb   : > { %v6775_v19 = vpop.eup %6774 }
 0xefc   : > { %v2881_v27 = vmul.f32 %v6775_v19, %v7624_v51  ;;  %v2892_v34 = vmul.f32 %v5759_v17, %v2880_v54 }
 0xefe   : > { %v2893_v36 = vmul.f32 %v5759_v17, %v2881_v27  ;;  %v7669_v22 = vadd.f32 %v5760_v3, %v2892_v34 }
 0xf00   : > { %v7671_v28 = vadd.f32 %v5760_v3, %v2893_v36 }
 0xf01   : > { %v6777_v42 = vpop.eup %6776 }
 0xf02   : > { %v2909_v62 = vpack.c.bf16 %v7671_v28, %v7669_v22  ;;  %v2882_v4 = vmul.f32 %v6777_v42, %v2834_v52 }
 0xf03   : > { %v6779_v61 = vpop.eup %6778 }
 0xf04   : > { %6239 = vmatmul.mubr.msk.bf16.gmra.mrb[52].mxu1 %vm1164_vm3, %v2909_v62  ;;  %v2883_v5 = vmul.f32 %v6779_v61, %v2835_v31  ;;  %v2894_v24 = vmul.f32 %v5759_v17, %v2882_v4 }
 0xf05   : > { %6242 = vmatprep.mubr.msk.bf16.mxu1 %vm6941_vm0, %v6940_v0 }
 0xf06   : > { %v2895_v38 = vmul.f32 %v5759_v17, %v2883_v5  ;;  %v7678_v40 = vadd.f32 %v5760_v3, %v2894_v24 }
 0xf08   : > { %v7680_v41 = vadd.f32 %v5760_v3, %v2895_v38 }
 0xf0a   : > { %v2910_v51 = vpack.c.bf16 %v7680_v41, %v7678_v40 }
 0xf0c   : > { %6243 = vmatmul.mubr.msk.bf16.gmra.mrb[56].mxu1 %vm1164_vm3, %v2910_v51 }
 0xf0d   : > { %6270 = vmatprep.mubr.msk.bf16.mxu1 %vm6941_vm0, %v6940_v0 }
 0xfb7   : > { %v2977_v49 = vpop.f32.mrb[48].mxu1 }
 0xfb8   : > { %v2978_v8 = vadd.f32 %v5761_v63, %v2977_v49  ;;  %v6236_v26 = vpop.f32.mrb[49].mxu1 }
 0xfb9   : > { %v2980_v44 = vpop.f32.mrb[50].mxu1 }
 0xfba   : > { %v3006_v52 = vmul.f32 0.044715, %v2978_v8  ;;  %v2981_v1 = vadd.f32 %v5761_v63, %v2980_v44  ;;  %v6237_v31 = vpop.f32.mrb[51].mxu1  ;;  %v3000_v21 = vmul.f32 0.5, %v2978_v8 }
 0xfbc   : > { %v3012_v2 = vmul.f32 %v3006_v52, %v2978_v8  ;;  %v3007_v6 = vmul.f32 0.044715, %v2981_v1  ;;  %v3001_v16 = vmul.f32 0.5, %v2981_v1 }
 0xfbe   : > { %v3018_v10 = vmul.f32 %v3012_v2, %v2978_v8  ;;  %v3013_v11 = vmul.f32 %v3007_v6, %v2981_v1 }
 0xfc0   : > { %v3024_v48 = vadd.f32 %v3018_v10, %v2978_v8  ;;  %v3019_v39 = vmul.f32 %v3013_v11, %v2981_v1 }
 0xfc2   : > { %v3030_v12 = vmul.f32 0.7978846, %v3024_v48  ;;  %v3025_v15 = vadd.f32 %v3019_v39, %v2981_v1 }
 0xfc4   : > { %6780 = vtanh.f32 %v3030_v12  ;;  %v3031_v18 = vmul.f32 0.7978846, %v3025_v15 }
 0xfc6   : > { %6782 = vtanh.f32 %v3031_v18 }
 0xfce   : > { %v6781_v14 = vpop.eup %6780 }
 0xfcf   : > { %v3042_v25 = vadd.f32 1.0, %v6781_v14 }
 0xfd0   : > { %v6783_v17 = vpop.eup %6782 }
 0xfd1   : > { %v3043_v55 = vadd.f32 1.0, %v6783_v17  ;;  %v3048_v37 = vmul.f32 %v3042_v25, %v3000_v21  ;;  %v5767_v17 = vld [vmem:[%s7712_s21] ss:$0 sm:$0xff] }
 0xfd3   : > { %v3049_v3 = vmul.f32 %v3043_v55, %v3001_v16 }
 0xfd5   : > { %v3054_v7 = vpack.c.bf16 %v3049_v3, %v3048_v37 }
 0xfd7   : > { %6255 = vmatmul.mubr.msk.bf16.vlgmr.msra.gmra.mrb[52].mxu0 %vm3096_vm8, %v3054_v7  ;;  %v2985_v33 = vpop.f32.mrb[52].mxu1 }
 0xfd8   : > { %v2986_v13 = vadd.f32 %v5761_v63, %v2985_v33  ;;  %v6240_v32 = vpop.f32.mrb[53].mxu1  ;;  %6258 = vmatprep.mubr.msk.bf16.mxu0 %vm6941_vm0, %v6940_v0 }
 0xfd9   : > { %v2988_v20 = vpop.f32.mrb[54].mxu1 }
 0xfda   : > { %v3008_v35 = vmul.f32 0.044715, %v2986_v13  ;;  %v2989_v43 = vadd.f32 %v5761_v63, %v2988_v20  ;;  %v6241_v45 = vpop.f32.mrb[55].mxu1  ;;  %v3002_v52 = vmul.f32 0.5, %v2986_v13 }
 0xfdc   : > { %v3014_v59 = vmul.f32 %v3008_v35, %v2986_v13  ;;  %v3009_v56 = vmul.f32 0.044715, %v2989_v43 }
 0xfde   : > { %v3020_v60 = vmul.f32 %v3014_v59, %v2986_v13  ;;  %v3015_v23 = vmul.f32 %v3009_v56, %v2989_v43 }
 0xfdf   : > { %v2993_v29 = vpop.f32.mrb[56].mxu1 }
 0xfe0   : > { %v3026_v53 = vadd.f32 %v3020_v60, %v2986_v13  ;;  %v3021_v46 = vmul.f32 %v3015_v23, %v2989_v43  ;;  %v2994_v54 = vadd.f32 %v5761_v63, %v2993_v29  ;;  %v6244_v19 = vpop.f32.mrb[57].mxu1 }
 0xfe1   : > { %v2996_v27 = vpop.f32.mrb[58].mxu1 }
 0xfe2   : > { %v3032_v34 = vmul.f32 0.7978846, %v3026_v53  ;;  %v3027_v36 = vadd.f32 %v3021_v46, %v2989_v43  ;;  %v3010_v42 = vmul.f32 0.044715, %v2994_v54  ;;  %v2997_v62 = vadd.f32 %v5761_v63, %v2996_v27  ;;  %v6245_v4 = vpop.f32.mrb[59].mxu1 }
 0xfe3   : > { %v3003_v63 = vmul.f32 0.5, %v2989_v43  ;;  %v3004_v39 = vmul.f32 0.5, %v2994_v54 }
 0xfe4   : > { %6784 = vtanh.f32 %v3032_v34  ;;  %v3033_v61 = vmul.f32 0.7978846, %v3027_v36  ;;  %v3016_v5 = vmul.f32 %v3010_v42, %v2994_v54  ;;  %v3011_v24 = vmul.f32 0.044715, %v2997_v62 }
 0xfe5   : > { %v3005_v12 = vmul.f32 0.5, %v2997_v62 }
 0xfe6   : > { %6786 = vtanh.f32 %v3033_v61  ;;  %v3022_v38 = vmul.f32 %v3016_v5, %v2994_v54  ;;  %v3017_v51 = vmul.f32 %v3011_v24, %v2997_v62 }
 0xfe8   : > { %v3028_v47 = vadd.f32 %v3022_v38, %v2994_v54  ;;  %v3023_v57 = vmul.f32 %v3017_v51, %v2997_v62 }
 0xfea   : > { %v3034_v58 = vmul.f32 0.7978846, %v3028_v47  ;;  %v3029_v50 = vadd.f32 %v3023_v57, %v2997_v62 }
 0xfec   : > { %6788 = vtanh.f32 %v3034_v58  ;;  %v3035_v49 = vmul.f32 0.7978846, %v3029_v50 }
 0xfee   : > { %v6785_v8 = vpop.eup %6784  ;;  %6790 = vtanh.f32 %v3035_v49 }
 0xfef   : > { %v3044_v26 = vadd.f32 1.0, %v6785_v8 }
 0xff0   : > { %v6787_v44 = vpop.eup %6786 }
 0xff1   : > { %v3045_v1 = vadd.f32 1.0, %v6787_v44  ;;  %v3050_v31 = vmul.f32 %v3044_v26, %v3002_v52  ;;  %v6648_v52 = vld [vmem:[%s7147_s24 + $0x10] sm:$0xff]  }
 0xff2   : > { %6267 = vmatpush3.bf16.msra.mxu1 %v6648_v52 }
 0xff3   : > { %v3051_v2 = vmul.f32 %v3045_v1, %v3003_v63  ;;  %6268 = vmatprep.subr.bf16.mxu1 %v6940_v0 }
 0xff5   : > { %v3055_v6 = vpack.c.bf16 %v3051_v2, %v3050_v31 }
 0xff6   : > { %v6789_v10 = vpop.eup %6788 }
 0xff7   : > { %6259 = vmatmul.mubr.msk.bf16.gmra.mrb[56].mxu0 %vm3096_vm8, %v3055_v6  ;;  %v3046_v11 = vadd.f32 1.0, %v6789_v10 }
 0xff8   : > { %v6791_v48 = vpop.eup %6790  ;;  %6262 = vmatprep.mubr.msk.bf16.mxu0 %vm6941_vm0, %v6940_v0 }
 0xff9   : > { %v3047_v15 = vadd.f32 1.0, %v6791_v48  ;;  %v3052_v18 = vmul.f32 %v3046_v11, %v3004_v39  ;;  %v6649_v11 = vld [vmem:[%s7147_s24 + $0x18] sm:$0xff]   ;;  %s8403_s24 = smov 56  }
 0xffa   : > { %6269 = vmatpush3.bf16.msra.mxu1 %v6649_v11 }
 0xffb   : > { %v3053_v14 = vmul.f32 %v3047_v15, %v3005_v12 }
 0xffd   : > { %v3056_v25 = vpack.c.bf16 %v3053_v14, %v3052_v18 }
 0xfff   : > { %6263 = vmatmul.mubr.msk.bf16.gmra.mrb[60].mxu0 %vm3096_vm8, %v3056_v25 }
0x10aa   : > { %v3140_v21 = vpop.f32.mrb[52].mxu0 }
0x10ab   : > { %v3141_v16 = vadd.f32 %v5767_v17, %v3140_v21  ;;  %v6256_v55 = vpop.f32.mrb[53].mxu0 }
0x10ac   : > { %v3143_v37 = vpop.f32.mrb[54].mxu0 }
0x10ad   : > { %v3163_v3 = vadd.f32 %v3141_v16, %v7658_v9  ;;  %v3144_v7 = vadd.f32 %v5767_v17, %v3143_v37  ;;  %v6257_v33 = vpop.f32.mrb[55].mxu0 }
0x10ae   : > { %v5775_v33 = vld [vmem:[%s7748_s29] ss:$0 sm:$0xff] }
0x10af   : > { %v3164_v13 = vadd.f32 %v3144_v7, %v7660_v30  ;;  %v3171_v32 = vsel %vm1164_vm3, %v3163_v3, 0.0 }
0x10b0   : > { %3172 = vadd.xlane.f32.xlu0 %v3171_v32 }
0x10b1   : > { %v3174_v20 = vsel %vm1164_vm3, %v3164_v13, 0.0 }
0x10b2   : > { %3175 = vadd.xlane.f32.xlu1 %v3174_v20 }
0x10ca   : > { %v3148_v35 = vpop.f32.mrb[56].mxu0 }
0x10cb   : > { %v3149_v43 = vadd.f32 %v5767_v17, %v3148_v35  ;;  %v6260_v45 = vpop.f32.mrb[57].mxu0 }
0x10cc   : > { %v3151_v59 = vpop.f32.mrb[58].mxu0 }
0x10cd   : > { %v3165_v56 = vadd.f32 %v3149_v43, %v7669_v22  ;;  %v3152_v60 = vadd.f32 %v5767_v17, %v3151_v59  ;;  %v6261_v23 = vpop.f32.mrb[59].mxu0  ;;  %v5776_v43 = vld [vmem:[%s7755_s6] ss:$0 sm:$0xff] }
0x10cf   : > { %v3166_v9 = vadd.f32 %v3152_v60, %v7671_v28  ;;  %v3177_v29 = vsel %vm1164_vm3, %v3165_v56, 0.0 }
0x10d0   : > { %3178 = vadd.xlane.f32.xlu0 %v3177_v29 }
0x10d1   : > { %v3180_v30 = vsel %vm1164_vm3, %v3166_v9, 0.0 }
0x10d2   : > { %3181 = vadd.xlane.f32.xlu1 %v3180_v30  ;;  %v3156_v53 = vpop.f32.mrb[60].mxu0 }
0x10d3   : > { %v3157_v46 = vadd.f32 %v5767_v17, %v3156_v53  ;;  %v6264_v54 = vpop.f32.mrb[61].mxu0 }
0x10d4   : > { %v3159_v19 = vpop.f32.mrb[62].mxu0 }
0x10d5   : > { %v3167_v27 = vadd.f32 %v3157_v46, %v7678_v40  ;;  %v3160_v34 = vadd.f32 %v5767_v17, %v3159_v19  ;;  %v6265_v36 = vpop.f32.mrb[63].mxu0 }
0x10d7   : > { %v3168_v22 = vadd.f32 %v3160_v34, %v7680_v41  ;;  %v3183_v42 = vsel %vm1164_vm3, %v3167_v27, 0.0 }
0x10d8   : > { %3184 = vadd.xlane.f32.xlu0 %v3183_v42 }
0x10d9   : > { %v3186_v28 = vsel %vm1164_vm3, %v3168_v22, 0.0 }
0x10da   : > { %3187 = vadd.xlane.f32.xlu1 %v3186_v28 }
0x113d   : > { %v3173_v62 = vpop.xlane.xlu0 %3172 }
0x113e   : > { %v3189_v4 = vmul.f32 0.03125, %v3173_v62 }
0x113f   : > { %v3176_v61 = vpop.xlane.xlu1 %3175 }
0x1140   : > { %v3195_v5 = vsub.f32 %v3163_v3, %v3189_v4  ;;  %v3190_v24 = vmul.f32 0.03125, %v3176_v61 }
0x1142   : > { %v3196_v38 = vsub.f32 %v3164_v13, %v3190_v24  ;;  %v3201_v51 = vmul.f32 %v3195_v5, %v3195_v5 }
0x1144   : > { %v3207_v40 = vsel %vm1164_vm3, %v3201_v51, 0.0  ;;  %v3202_v47 = vmul.f32 %v3196_v38, %v3196_v38 }
0x1145   : > { %3208 = vadd.xlane.f32.xlu0 %v3207_v40 }
0x1146   : > { %v3210_v41 = vsel %vm1164_vm3, %v3202_v47, 0.0 }
0x1147   : > { %3211 = vadd.xlane.f32.xlu1 %v3210_v41 }
0x115d   : > { %v3179_v57 = vpop.xlane.xlu0 %3178 }
0x115e   : > { %v3191_v58 = vmul.f32 0.03125, %v3179_v57 }
0x115f   : > { %v3182_v50 = vpop.xlane.xlu1 %3181 }
0x1160   : > { %v7729_v49 = vsub.f32 %v3165_v56, %v3191_v58  ;;  %v3192_v8 = vmul.f32 0.03125, %v3182_v50 }
0x1162   : > { %v7731_v26 = vsub.f32 %v3166_v9, %v3192_v8  ;;  %v3203_v44 = vmul.f32 %v7729_v49, %v7729_v49 }
0x1164   : > { %v3213_v63 = vsel %vm1164_vm3, %v3203_v44, 0.0  ;;  %v3204_v1 = vmul.f32 %v7731_v26, %v7731_v26  ;;  %v5782_v44 = vld [vmem:[%s7211_s1 + $0x1] ss:$0 sm:$0xff]  ;;  %s8401_s1 = smov 88  }
0x1165   : > { %3214 = vadd.xlane.f32.xlu0 %v3213_v63  ;;  %v3185_v31 = vpop.xlane.xlu0 %3184 }
0x1166   : > { %v3193_v2 = vmul.f32 0.03125, %v3185_v31  ;;  %v3216_v6 = vsel %vm1164_vm3, %v3204_v1, 0.0 }
0x1167   : > { %3217 = vadd.xlane.f32.xlu1 %v3216_v6  ;;  %v3188_v10 = vpop.xlane.xlu1 %3187 }
0x1168   : > { %v3199_v48 = vsub.f32 %v3167_v27, %v3193_v2  ;;  %v3194_v39 = vmul.f32 0.03125, %v3188_v10 }
0x116a   : > { %v3200_v12 = vsub.f32 %v3168_v22, %v3194_v39  ;;  %v3205_v15 = vmul.f32 %v3199_v48, %v3199_v48 }
0x116c   : > { %v3219_v18 = vsel %vm1164_vm3, %v3205_v15, 0.0  ;;  %v3206_v14 = vmul.f32 %v3200_v12, %v3200_v12 }
0x116d   : > { %3220 = vadd.xlane.f32.xlu0 %v3219_v18 }
0x116e   : > { %v3222_v25 = vsel %vm1164_vm3, %v3206_v14, 0.0 }
0x116f   : > { %3223 = vadd.xlane.f32.xlu1 %v3222_v25 }
0x11d2   : > { %v3209_v17 = vpop.xlane.xlu0 %3208 }
0x11d3   : > { %v3225_v21 = vmul.f32 0.03125, %v3209_v17 }
0x11d4   : > { %v3212_v16 = vpop.xlane.xlu1 %3211 }
0x11d5   : > { %v3231_v55 = vadd.f32 1e-05, %v3225_v21  ;;  %v3226_v37 = vmul.f32 0.03125, %v3212_v16 }
0x11d7   : > { %6792 = vrsqrt.f32 %v3231_v55  ;;  %v3232_v3 = vadd.f32 1e-05, %v3226_v37 }
0x11d9   : > { %6794 = vrsqrt.f32 %v3232_v3 }
0x11e1   : > { %v6793_v7 = vpop.eup %6792 }
0x11e2   : > { %v3243_v13 = vmul.f32 %v6793_v7, %v3195_v5 }
0x11e3   : > { %v6795_v32 = vpop.eup %6794 }
0x11e4   : > { %v3255_v20 = vmul.f32 %v5775_v33, %v3243_v13  ;;  %v3244_v35 = vmul.f32 %v6795_v32, %v3196_v38 }
0x11e6   : > { %v3256_v45 = vmul.f32 %v5775_v33, %v3244_v35  ;;  %v7758_v59 = vadd.f32 %v5776_v43, %v3255_v20 }
0x11e8   : > { %v7760_v56 = vadd.f32 %v5776_v43, %v3256_v45 }
0x11ea   : > { %v3273_v60 = vpack.c.bf16 %v7760_v56, %v7758_v59 }
0x11ec   : > { %6271 = vmatmul.mubr.msk.bf16.vlgmr.msra.gmra.mrb[60].mxu1 %vm1164_vm3, %v3273_v60 }
0x11ed   : > { %6274 = vmatprep.mubr.msk.bf16.mxu1 %vm6941_vm0, %v6940_v0 }
0x11f2   : > { %v3215_v23 = vpop.xlane.xlu0 %3214 }
0x11f3   : > { %v3227_v9 = vmul.f32 0.03125, %v3215_v23 }
0x11f4   : > { %v3218_v29 = vpop.xlane.xlu1 %3217 }
0x11f5   : > { %v3233_v30 = vadd.f32 1e-05, %v3227_v9  ;;  %v3228_v53 = vmul.f32 0.03125, %v3218_v29 }
0x11f7   : > { %6796 = vrsqrt.f32 %v3233_v30  ;;  %v3234_v46 = vadd.f32 1e-05, %v3228_v53 }
0x11f9   : > { %6798 = vrsqrt.f32 %v3234_v46  ;;  %v7821_v46 = vld [vmem:[%s8398_s20] ss:$0 sm:$0xff] }
0x11fa   : > { %v3221_v54 = vpop.xlane.xlu0 %3220 }
0x11fb   : > { %v3229_v19 = vmul.f32 0.03125, %v3221_v54 }
0x11fc   : > { %v3224_v27 = vpop.xlane.xlu1 %3223 }
0x11fd   : > { %v3235_v34 = vadd.f32 1e-05, %v3229_v19  ;;  %v3230_v36 = vmul.f32 0.03125, %v3224_v27 }
0x11ff   : > { %6800 = vrsqrt.f32 %v3235_v34  ;;  %v3236_v22 = vadd.f32 1e-05, %v3230_v36 }
0x1201   : > { %v6797_v42 = vpop.eup %6796  ;;  %6802 = vrsqrt.f32 %v3236_v22 }
0x1202   : > { %v3245_v28 = vmul.f32 %v6797_v42, %v7729_v49 }
0x1203   : > { %v6799_v62 = vpop.eup %6798 }
0x1204   : > { %v3246_v4 = vmul.f32 %v6799_v62, %v7731_v26  ;;  %v3257_v61 = vmul.f32 %v5775_v33, %v3245_v28 }
0x1206   : > { %v3258_v5 = vmul.f32 %v5775_v33, %v3246_v4  ;;  %v7769_v24 = vadd.f32 %v5776_v43, %v3257_v61 }
0x1208   : > { %v7771_v38 = vadd.f32 %v5776_v43, %v3258_v5 }
0x1209   : > { %v6801_v51 = vpop.eup %6800 }
0x120a   : > { %v3274_v40 = vpack.c.bf16 %v7771_v38, %v7769_v24  ;;  %v3247_v47 = vmul.f32 %v6801_v51, %v3199_v48 }
0x120b   : > { %v6803_v41 = vpop.eup %6802 }
0x120c   : > { %6275 = vmatmul.mubr.msk.bf16.gmra.mrb[64].mxu1 %vm1164_vm3, %v3274_v40  ;;  %v3248_v57 = vmul.f32 %v6803_v41, %v3200_v12  ;;  %v3259_v58 = vmul.f32 %v5775_v33, %v3247_v47  ;;  %v7832_v47 = vld [vmem:[%s8398_s20 + $0x1] ss:$0 sm:$0xff] }
0x120d   : > { %6278 = vmatprep.mubr.msk.bf16.mxu1 %vm6941_vm0, %v6940_v0 }
0x120e   : > { %v3260_v50 = vmul.f32 %v5775_v33, %v3248_v57  ;;  %v7778_v49 = vadd.f32 %v5776_v43, %v3259_v58 }
0x1210   : > { %v7780_v8 = vadd.f32 %v5776_v43, %v3260_v50 }
0x1212   : > { %v3275_v26 = vpack.c.bf16 %v7780_v8, %v7778_v49 }
0x1214   : > { %6279 = vmatmul.mubr.msk.bf16.gmra.mrb[68].mxu1 %vm1164_vm3, %v3275_v26 }
0x12bf   : > { %v3344_v52 = vpop.f32.mrb[60].mxu1 }
0x12c0   : > { %v6272_v63 = vpop.f32.mrb[61].mxu1  ;;  %v3345_v31 = vadd.f32 %v5782_v44, %v3344_v52 }
0x12c1   : > { %v3347_v1 = vpop.f32.mrb[62].mxu1 }
0x12c2   : > { %v3348_v2 = vadd.f32 %v5782_v44, %v3347_v1  ;;  %v6273_v6 = vpop.f32.mrb[63].mxu1 }
0x12c4   : > { %v7786_v10 = vpack.c.bf16 %v3348_v2, %v3345_v31 }
0x12c6   : > { %3373 = vrot.lane.b32.xlu0 %v7786_v10, %s8399_s3  ;;  %6286 = vmatprep.mubr.msk.bf16.mxu0 %vm1241_vm4, %v7786_v10 }
0x12df   : > { %v3352_v11 = vpop.f32.mrb[64].mxu1 }
0x12e0   : > { %v3353_v48 = vadd.f32 %v5782_v44, %v3352_v11  ;;  %v6276_v39 = vpop.f32.mrb[65].mxu1 }
0x12e1   : > { %v3355_v12 = vpop.f32.mrb[66].mxu1 }
0x12e2   : > { %v7792_v15 = vpack.c.bf16 %v3353_v48, %v3353_v48  ;;  %v6277_v18 = vpop.f32.mrb[67].mxu1  ;;  %v3356_v25 = vadd.f32 %v5782_v44, %v3355_v12 }
0x12e4   : > { %3375 = vrot.lane.b32.xlu1 %v7792_v15, %s8399_s3 }
0x12e7   : > { %v3360_v14 = vpop.f32.mrb[68].mxu1 }
0x12e8   : > { %v3361_v17 = vadd.f32 %v5782_v44, %v3360_v14  ;;  %v6280_v21 = vpop.f32.mrb[69].mxu1 }
0x12e9   : > { %v3363_v16 = vpop.f32.mrb[70].mxu1 }
0x12ea   : > { %v7796_v55 = vpack.c.bf16 %v3361_v17, %v3356_v25  ;;  %v3364_v37 = vadd.f32 %v5782_v44, %v3363_v16  ;;  %v6281_v3 = vpop.f32.mrb[71].mxu1 }
0x12ec   : > { %v7798_v7 = vpack.c.bf16 %v3364_v37, %v3364_v37  ;;  %3439 = vrot.lane.b32.xlu1 %v7796_v55, %s8399_s3  ;;  %6294 = vmatprep.mubr.msk.bf16.mxu1 %vm1241_vm4, %v7796_v55 }
0x12ee   : > { %3441 = vrot.lane.b32.xlu0 %v7798_v7, %s8399_s3  ;;  %s8400_s3 = smov 64  }
0x1338   : > { %v3374_v33 = vpop.permute.xlu0 %3373 }
0x1339   : > { %6496 = vmatprep.subr.msk.bf16.mxu0 %vm1241_vm4, %v3374_v33  ;;  %v3384_v13 = vsel %vm1241_vm4, %v3374_v33, 0 }
0x133a   : > { %6283 = vmatpush3.bf16.xpose.msra.mxu0 %v3384_v13 }
0x1356   : > { %v3376_v32 = vpop.permute.xlu1 %3375 }
0x1357   : > { %6497 = vmatprep.subr.msk.bf16.mxu0 %vm1241_vm4, %v3376_v32  ;;  %v3387_v20 = vsel %vm1241_vm4, %v3376_v32, 0 }
0x1358   : > { %6285 = vmatpush3.bf16.xpose.msra.mxu0 %v3387_v20 }
0x135e   : > { %v3440_v35 = vpop.permute.xlu1 %3439 }
0x135f   : > { %6287 = vmatmul.mubr.msk.bf16.vlgmr.msra.gmra.mrb[64].mxu0 %vm1241_vm4, %v7792_v15  ;;  %6498 = vmatprep.subr.msk.bf16.mxu1 %vm1241_vm4, %v3440_v35  ;;  %v3450_v43 = vsel %vm1241_vm4, %v3440_v35, 0 }
0x1360   : > { %v3442_v45 = vpop.permute.xlu0 %3441  ;;  %6291 = vmatpush3.bf16.xpose.msra.mxu1 %v3450_v43 }
0x1361   : > { %6499 = vmatprep.subr.msk.bf16.mxu1 %vm1241_vm4, %v3442_v45  ;;  %v3453_v60 = vsel %vm1241_vm4, %v3442_v45, 0 }
0x1368   : > { %6293 = vmatpush3.bf16.xpose.msra.mxu1 %v3453_v60 }
0x136f   : > { %6295 = vmatmul.mubr.msk.bf16.vlgmr.msra.gmra.mrb[72].mxu1 %vm1241_vm4, %v7798_v7 }
0x1432   : > { %v6288_v23 = vpop.f32.mrb[64].mxu0 }
0x1433   : > { %v3505_v9 = vmul.f32 0.35355338, %v6288_v23  ;;  %v3423_v29 = vpop.f32.mrb[65].mxu0 }
0x1434   : > { %v3503_v30 = vmul.f32 0.35355338, %v3423_v29  ;;  %v6289_v53 = vpop.f32.mrb[66].mxu0 }
0x1435   : > { %v3511_v54 = vadd.f32 %v7821_v46, %v3505_v9  ;;  %v3426_v19 = vpop.f32.mrb[67].mxu0 }
0x1436   : > { %v3509_v27 = vadd.f32 %v7821_v46, %v3503_v30  ;;  %v3504_v34 = vmul.f32 0.35355338, %v3426_v19 }
0x1437   : > { %v3521_v36 = vsel %vm1392_vm5, %v3511_v54, -inf }
0x1438   : > { %v3510_v22 = vadd.f32 %v7821_v46, %v3504_v34  ;;  %3522 = vmax.xlane.f32.xlu0 %v3521_v36  ;;  %v3515_v42 = vsel %vm1392_vm5, %v3509_v27, -inf }
0x1439   : > { %3516 = vmax.xlane.f32.xlu1 %v3515_v42 }
0x143a   : > { %v3518_v28 = vsel %vm1392_vm5, %v3510_v22, -inf }
0x143c   : > { %3519 = vmax.xlane.f32.xlu0 %v3518_v28 }
0x1442   : > { %v6296_v62 = vpop.f32.mrb[72].mxu1 }
0x1443   : > { %v3489_v4 = vpop.f32.mrb[73].mxu1  ;;  %v3508_v61 = vmul.f32 0.35355338, %v6296_v62 }
0x1444   : > { %v3506_v5 = vmul.f32 0.35355338, %v3489_v4  ;;  %v6297_v51 = vpop.f32.mrb[74].mxu1 }
0x1445   : > { %v3492_v40 = vpop.f32.mrb[75].mxu1  ;;  %v3514_v58 = vadd.f32 %v7832_v47, %v3508_v61 }
0x1446   : > { %v3512_v41 = vadd.f32 %v7832_v47, %v3506_v5  ;;  %v3507_v57 = vmul.f32 0.35355338, %v3492_v40 }
0x1447   : > { %v3530_v52 = vsel %vm1392_vm5, %v3514_v58, -inf }
0x1448   : > { %v7837_v50 = vadd.f32 %v7832_v47, %v3507_v57  ;;  %v3524_v26 = vsel %vm1392_vm5, %v3512_v41, -inf }
0x1449   : > { %3525 = vmax.xlane.f32.xlu1 %v3524_v26 }
0x144a   : > { %v3527_v44 = vsel %vm1392_vm5, %v7837_v50, -inf }
0x144b   : > { %3528 = vmax.xlane.f32.xlu0 %v3527_v44 }
0x144d   : > { %3531 = vmax.xlane.f32.xlu1 %v3530_v52 }
0x145e   : > { %3587 = vrot.lane.b32.xlu1 %v7792_v15, %s8400_s3 }
0x1461   : > { %3585 = vrot.lane.b32.xlu0 %v7786_v10, %s8400_s3 }
0x1462   : > { %3647 = vrot.lane.b32.xlu1 %v7796_v55, %s8400_s3 }
0x1466   : > { %3649 = vrot.lane.b32.xlu1 %v7798_v7, %s8400_s3  ;;  %s8405_s3 = smov 112  }
0x14c5   : > { %v3523_v63 = vpop.xlane.xlu0 %3522 }
0x14c6   : > { %v3535_v1 = vsub.f32 %v3511_v54, %v3523_v63  ;;  %v3517_v31 = vpop.xlane.xlu1 %3516 }
0x14c7   : > { %v3533_v2 = vsub.f32 %v3509_v27, %v3517_v31 }
0x14c8   : > { %v3543_v6 = vmul.f32 1.442695, %v3535_v1 }
0x14c9   : > { %v3539_v11 = vmul.f32 1.442695, %v3533_v2  ;;  %v3520_v48 = vpop.xlane.xlu0 %3519 }
0x14ca   : > { %6804 = vpow2.f32 %v3543_v6  ;;  %v3534_v39 = vsub.f32 %v3510_v22, %v3520_v48 }
0x14cb   : > { %6806 = vpow2.f32 %v3539_v11 }
0x14cc   : > { %v3541_v12 = vmul.f32 1.442695, %v3534_v39 }
0x14ce   : > { %6808 = vpow2.f32 %v3541_v12 }
0x14d4   : > { %v7851_v18 = vpop.eup %6804 }
0x14d5   : > { %v3557_v14 = vsel %vm1392_vm5, %v7851_v18, 0.0  ;;  %v7855_v25 = vpop.eup %6806 }
0x14d6   : > { %v3526_v17 = vpop.xlane.xlu1 %3525  ;;  %3558 = vadd.xlane.f32.xlu0 %v3557_v14  ;;  %v3551_v3 = vsel %vm1392_vm5, %v7855_v25, 0.0 }
0x14d7   : > { %v3536_v37 = vsub.f32 %v3512_v41, %v3526_v17 }
0x14d8   : > { %v6809_v21 = vpop.eup %6808  ;;  %v3529_v16 = vpop.xlane.xlu0 %3528 }
0x14d9   : > { %v3554_v33 = vsel %vm1392_vm5, %v6809_v21, 0.0  ;;  %v3545_v35 = vmul.f32 1.442695, %v3536_v37  ;;  %v3537_v27 = vsub.f32 %v7837_v50, %v3529_v16 }
0x14da   : > { %v3532_v13 = vpop.xlane.xlu1 %3531  ;;  %3552 = vadd.xlane.f32.xlu0 %v3551_v3  ;;  %3555 = vadd.xlane.f32.xlu1 %v3554_v33 }
0x14db   : > { %v3538_v32 = vsub.f32 %v3514_v58, %v3532_v13  ;;  %v3547_v34 = vmul.f32 1.442695, %v3537_v27 }
0x14dc   : > { %v3586_v20 = vpop.permute.xlu0 %3585 }
0x14dd   : > { %v3549_v43 = vmul.f32 1.442695, %v3538_v32  ;;  %6298 = vmatprep.subr.bf16.mxu0 %v3586_v20 }
0x14de   : > { %v3588_v45 = vpop.permute.xlu1 %3587  ;;  %6299 = vmatpush3.bf16.msra.mxu0 %v3586_v20 }
0x14df   : > { %6810 = vpow2.f32 %v3549_v43  ;;  %6500 = vmatprep.subr.msk.bf16.mxu0 %vm1474_vm6, %v3588_v45  ;;  %v3597_v60 = vsel %vm1474_vm6, %v3588_v45, 0 }
0x14e0   : > { %6812 = vpow2.f32 %v3545_v35 }
0x14e1   : > { %6814 = vpow2.f32 %v3547_v34 }
0x14e2   : > { %v3648_v23 = vpop.permute.xlu1 %3647  ;;  %6301 = vmatpush3.bf16.msra.mxu0 %v3597_v60 }
0x14e3   : > { %6306 = vmatprep.subr.bf16.mxu1 %v3648_v23 }
0x14e4   : > { %6307 = vmatpush3.bf16.msra.mxu1 %v3648_v23 }
0x14e6   : > { %v3650_v9 = vpop.permute.xlu1 %3649 }
0x14e7   : > { %6501 = vmatprep.subr.msk.bf16.mxu1 %vm1474_vm6, %v3650_v9  ;;  %v3659_v29 = vsel %vm1474_vm6, %v3650_v9, 0 }
0x14e8   : > { %6309 = vmatpush3.bf16.msra.mxu1 %v3659_v29 }
0x14e9   : > { %v6811_v30 = vpop.eup %6810 }
0x14ea   : > { %v3566_v53 = vsel %vm1392_vm5, %v6811_v30, 0.0  ;;  %v6813_v54 = vpop.eup %6812 }
0x14eb   : > { %3567 = vadd.xlane.f32.xlu1 %v3566_v53  ;;  %v3560_v19 = vsel %vm1392_vm5, %v6813_v54, 0.0  ;;  %v6815_v36 = vpop.eup %6814 }
0x14ec   : > { %v3563_v22 = vsel %vm1392_vm5, %v6815_v36, 0.0 }
0x14ef   : > { %3561 = vadd.xlane.f32.xlu1 %v3560_v19 }
0x14f0   : > { %3713 = vrot.lane.b32.xlu0 %v7786_v10, %s8401_s1 }
0x1500   : > { %3781 = vrot.lane.b32.xlu1 %v7796_v55, %s8401_s1 }
0x1504   : > { %3711 = vrot.lane.b32.xlu1 %v7792_v15, %s8402_s26 }
0x1508   : > { %3777 = vrot.lane.b32.xlu1 %v7796_v55, %s8402_s26 }
0x150f   : > { %3564 = vadd.xlane.f32.xlu0 %v3563_v22 }
0x1525   : > { %3715 = vrot.lane.b32.xlu0 %v7792_v15, %s8401_s1 }
0x1529   : > { %3709 = vrot.lane.b32.xlu0 %v7786_v10, %s8402_s26 }
0x152d   : > { %3783 = vrot.lane.b32.xlu0 %v7798_v7, %s8401_s1  ;;  %s8406_s1 = smov 48  }
0x1531   : > { %3779 = vrot.lane.b32.xlu0 %v7798_v7, %s8402_s26  ;;  %s8407_s26 = smov 72  }
0x1563   : > { %v3559_v42 = vpop.xlane.xlu0 %3558 }
0x1564   : > { %6816 = vrcp.f32 %v3559_v42 }
0x1567   : > { %v3556_v28 = vpop.xlane.xlu1 %3555  ;;  %v3553_v62 = vpop.xlane.xlu0 %3552 }
0x1568   : > { %6818 = vrcp.f32 %v3556_v28 }
0x1569   : > { %6820 = vrcp.f32 %v3553_v62 }
0x156b   : > { %v3714_v4 = vpop.permute.xlu0 %3713 }
0x156c   : > { %6502 = vmatprep.subr.msk.bf16.mxu0 %vm1241_vm4, %v3714_v4  ;;  %v3724_v44 = vsel %vm1241_vm4, %v3714_v4, 0 }
0x156e   : > { %v6817_v61 = vpop.eup %6816 }
0x156f   : > { %v3577_v41 = vmul.f32 %v6817_v61, %v7851_v18 }
0x1571   : > { %v3582_v50 = vpack.c.bf16 %v3577_v41, %v3577_v41 }
0x1572   : > { %v6819_v5 = vpop.eup %6818 }
0x1573   : > { %v6821_v51 = vpop.eup %6820  ;;  %v3576_v40 = vmul.f32 %v6819_v5, %v6809_v21 }
0x1574   : > { %v3575_v57 = vmul.f32 %v6821_v51, %v7855_v25 }
0x1576   : > { %v3581_v58 = vpack.c.bf16 %v3576_v40, %v3575_v57 }
0x1578   : > { %6302 = vmatprep.mubr.msk.bf16.mxu0 %vm1392_vm5, %v3581_v58  ;;  %v3568_v26 = vpop.xlane.xlu1 %3567 }
0x1579   : > { %6303 = vmatmul.mubr.msk.bf16.vlgmr.msra.gmra.mrb[68].mxu0 %vm1392_vm5, %v3582_v50  ;;  %6822 = vrcp.f32 %v3568_v26 }
0x157a   : > { %6315 = vmatpush3.bf16.xpose.msra.mxu0 %v3724_v44 }
0x157c   : > { %v3562_v52 = vpop.xlane.xlu1 %3561 }
0x157d   : > { %6824 = vrcp.f32 %v3562_v52 }
0x1580   : > { %v3782_v63 = vpop.permute.xlu1 %3781 }
0x1581   : > { %6504 = vmatprep.subr.msk.bf16.mxu1 %vm1241_vm4, %v3782_v63  ;;  %v3792_v16 = vsel %vm1241_vm4, %v3782_v63, 0 }
0x1583   : > { %v6823_v6 = vpop.eup %6822 }
0x1584   : > { %v3712_v12 = vpop.permute.xlu1 %3711  ;;  %v3580_v18 = vmul.f32 %v6823_v6, %v6811_v30 }
0x1586   : > { %v3584_v21 = vpack.c.bf16 %v3580_v18, %v3580_v18 }
0x1587   : > { %v6825_v48 = vpop.eup %6824 }
0x1588   : > { %v3578_v14 = vmul.f32 %v6825_v48, %v6813_v54  ;;  %v3778_v37 = vpop.permute.xlu1 %3777 }
0x159c   : > { %v3565_v1 = vpop.xlane.xlu0 %3564 }
0x159d   : > { %6826 = vrcp.f32 %v3565_v1 }
0x15a0   : > { %v3716_v31 = vpop.permute.xlu0 %3715 }
0x15a1   : > { %v3727_v2 = vsel %vm1241_vm4, %v3716_v31, 0  ;;  %6503 = vmatprep.subr.msk.bf16.mxu0 %vm1241_vm4, %v3716_v31 }
0x15a2   : > { %6317 = vmatpush3.bf16.xpose.msra.mxu0 %v3727_v2 }
0x15a4   : > { %v3710_v11 = vpop.permute.xlu0 %3709 }
0x15a5   : > { %6318 = vmatprep.mubr.msk.bf16.mxu0 %vm1241_vm4, %v3710_v11 }
0x15a7   : > { %v6827_v39 = vpop.eup %6826 }
0x15a8   : > { %v3579_v25 = vmul.f32 %v6827_v39, %v6815_v36  ;;  %v3784_v3 = vpop.permute.xlu0 %3783 }
0x15a9   : > { %6319 = vmatmul.mubr.msk.bf16.vlgmr.msra.gmra.mrb[72].mxu0 %vm1241_vm4, %v3712_v12  ;;  %v3795_v33 = vsel %vm1241_vm4, %v3784_v3, 0 }
0x15aa   : > { %v3583_v17 = vpack.c.bf16 %v3579_v25, %v3578_v14 }
0x15ac   : > { %6310 = vmatprep.mubr.msk.bf16.mxu1 %vm1392_vm5, %v3583_v17  ;;  %v3780_v13 = vpop.permute.xlu0 %3779 }
0x15ad   : > { %6311 = vmatmul.mubr.msk.bf16.vlgmr.msra.gmra.mrb[76].mxu1 %vm1392_vm5, %v3584_v21 }
0x15ae   : > { %6323 = vmatpush3.bf16.xpose.msra.mxu1 %v3792_v16  ;;  %6326 = vmatprep.mubr.msk.bf16.mxu1 %vm1241_vm4, %v3778_v37 }
0x15af   : > { %6505 = vmatprep.subr.msk.bf16.mxu1 %vm1241_vm4, %v3784_v3 }
0x15b6   : > { %6325 = vmatpush3.bf16.xpose.msra.mxu1 %v3795_v33 }
0x15bd   : > { %6327 = vmatmul.mubr.msk.bf16.vlgmr.msra.gmra.mrb[80].mxu1 %vm1241_vm4, %v3780_v13 }
0x164c   : > { %v7902_v32 = vpop.f32.mrb[68].mxu0 }
0x164d   : > { %v7904_v20 = vpop.f32.mrb[69].mxu0 }
0x164e   : > { %v6305_v35 = vpop.f32.mrb[70].mxu0 }
0x164f   : > { %v7906_v43 = vpop.f32.mrb[71].mxu0 }
0x167c   : > { %v6320_v45 = vpop.f32.mrb[72].mxu0 }
0x167d   : > { %v3847_v60 = vmul.f32 0.35355338, %v6320_v45  ;;  %v3763_v23 = vpop.f32.mrb[73].mxu0 }
0x167e   : > { %v3845_v9 = vmul.f32 0.35355338, %v3763_v23  ;;  %v6321_v29 = vpop.f32.mrb[74].mxu0 }
0x167f   : > { %v3853_v30 = vadd.f32 %v7821_v46, %v3847_v60  ;;  %v3766_v53 = vpop.f32.mrb[75].mxu0 }
0x1680   : > { %v3851_v54 = vadd.f32 %v7821_v46, %v3845_v9  ;;  %v3846_v19 = vmul.f32 0.35355338, %v3766_v53  ;;  %v7910_v27 = vpop.f32.mrb[76].mxu1 }
0x1681   : > { %v7912_v34 = vpop.f32.mrb[77].mxu1  ;;  %v3863_v36 = vsel %vm1392_vm5, %v3853_v30, -inf }
0x1682   : > { %v3852_v22 = vadd.f32 %v7821_v46, %v3846_v19  ;;  %v6313_v42 = vpop.f32.mrb[78].mxu1  ;;  %3864 = vmax.xlane.f32.xlu0 %v3863_v36  ;;  %v3857_v28 = vsel %vm1392_vm5, %v3851_v54, -inf }
0x1683   : > { %v7917_v62 = vpop.f32.mrb[79].mxu1  ;;  %3858 = vmax.xlane.f32.xlu1 %v3857_v28 }
0x1684   : > { %v3860_v4 = vsel %vm1392_vm5, %v3852_v22, -inf }
0x1686   : > { %3861 = vmax.xlane.f32.xlu0 %v3860_v4 }
0x1690   : > { %v6328_v61 = vpop.f32.mrb[80].mxu1 }
0x1691   : > { %v3831_v5 = vpop.f32.mrb[81].mxu1  ;;  %v3850_v51 = vmul.f32 0.35355338, %v6328_v61 }
0x1692   : > { %v3848_v40 = vmul.f32 0.35355338, %v3831_v5  ;;  %v6329_v41 = vpop.f32.mrb[82].mxu1 }
0x1693   : > { %v3834_v57 = vpop.f32.mrb[83].mxu1  ;;  %v3856_v26 = vadd.f32 %v7832_v47, %v3850_v51 }
0x1694   : > { %v3854_v58 = vadd.f32 %v7832_v47, %v3848_v40  ;;  %v3849_v50 = vmul.f32 0.35355338, %v3834_v57 }
0x1695   : > { %v3872_v1 = vsel %vm1392_vm5, %v3856_v26, -inf }
0x1696   : > { %v7923_v44 = vadd.f32 %v7832_v47, %v3849_v50  ;;  %v3866_v52 = vsel %vm1392_vm5, %v3854_v58, -inf }
0x1697   : > { %3867 = vmax.xlane.f32.xlu1 %v3866_v52 }
0x1698   : > { %v3869_v63 = vsel %vm1392_vm5, %v7923_v44, -inf }
0x1699   : > { %3870 = vmax.xlane.f32.xlu0 %v3869_v63 }
0x169b   : > { %3873 = vmax.xlane.f32.xlu1 %v3872_v1 }
0x16ac   : > { %3929 = vrot.lane.b32.xlu1 %v7792_v15, %s8403_s24 }
0x16af   : > { %3927 = vrot.lane.b32.xlu0 %v7786_v10, %s8403_s24 }
0x16b0   : > { %3989 = vrot.lane.b32.xlu1 %v7796_v55, %s8403_s24 }
0x16b4   : > { %3991 = vrot.lane.b32.xlu1 %v7798_v7, %s8403_s24  ;;  %s8408_s24 = smov 104  }
0x170f   : > { %v3865_v31 = vpop.xlane.xlu0 %3864 }
0x1710   : > { %v3877_v2 = vsub.f32 %v3853_v30, %v3865_v31  ;;  %v3859_v6 = vpop.xlane.xlu1 %3858 }
0x1711   : > { %v3875_v11 = vsub.f32 %v3851_v54, %v3859_v6 }
0x1712   : > { %v3885_v48 = vmul.f32 1.442695, %v3877_v2 }
0x1713   : > { %v3881_v39 = vmul.f32 1.442695, %v3875_v11  ;;  %v3862_v12 = vpop.xlane.xlu0 %3861 }
0x1714   : > { %6828 = vpow2.f32 %v3885_v48  ;;  %v3876_v18 = vsub.f32 %v3852_v22, %v3862_v12 }
0x1715   : > { %6830 = vpow2.f32 %v3881_v39 }
0x1716   : > { %v3883_v14 = vmul.f32 1.442695, %v3876_v18 }
0x1718   : > { %6832 = vpow2.f32 %v3883_v14 }
0x171e   : > { %v7937_v25 = vpop.eup %6828 }
0x171f   : > { %v3899_v17 = vsel %vm1392_vm5, %v7937_v25, 0.0  ;;  %v7941_v21 = vpop.eup %6830 }
0x1720   : > { %3900 = vadd.xlane.f32.xlu0 %v3899_v17  ;;  %v3893_v37 = vsel %vm1392_vm5, %v7941_v21, 0.0 }
0x1722   : > { %v6833_v16 = vpop.eup %6832 }
0x1723   : > { %v3896_v3 = vsel %vm1392_vm5, %v6833_v16, 0.0 }
0x1724   : > { %v3868_v33 = vpop.xlane.xlu1 %3867  ;;  %3894 = vadd.xlane.f32.xlu0 %v3893_v37  ;;  %3897 = vadd.xlane.f32.xlu1 %v3896_v3 }
0x1725   : > { %v3878_v35 = vsub.f32 %v3854_v58, %v3868_v33 }
0x1726   : > { %v3871_v13 = vpop.xlane.xlu0 %3870 }
0x1727   : > { %v3887_v9 = vmul.f32 1.442695, %v3878_v35  ;;  %v3879_v61 = vsub.f32 %v7923_v44, %v3871_v13 }
0x1728   : > { %v3874_v45 = vpop.xlane.xlu1 %3873 }
0x1729   : > { %v3880_v60 = vsub.f32 %v3856_v26, %v3874_v45  ;;  %v3889_v5 = vmul.f32 1.442695, %v3879_v61 }
0x172a   : > { %v3928_v23 = vpop.permute.xlu0 %3927 }
0x172b   : > { %v3891_v29 = vmul.f32 1.442695, %v3880_v60  ;;  %6330 = vmatprep.subr.bf16.mxu0 %v3928_v23 }
0x172c   : > { %v3930_v30 = vpop.permute.xlu1 %3929  ;;  %6331 = vmatpush3.bf16.msra.mxu0 %v3928_v23 }
0x172d   : > { %6834 = vpow2.f32 %v3891_v29  ;;  %6506 = vmatprep.subr.msk.bf16.mxu0 %vm1474_vm6, %v3930_v30  ;;  %v3939_v53 = vsel %vm1474_vm6, %v3930_v30, 0 }
0x172e   : > { %6836 = vpow2.f32 %v3887_v9 }
0x172f   : > { %6838 = vpow2.f32 %v3889_v5 }
0x1730   : > { %v3990_v54 = vpop.permute.xlu1 %3989  ;;  %6333 = vmatpush3.bf16.msra.mxu0 %v3939_v53 }
0x1731   : > { %6338 = vmatprep.subr.bf16.mxu1 %v3990_v54 }
0x1732   : > { %6339 = vmatpush3.bf16.msra.mxu1 %v3990_v54 }
0x1734   : > { %v3992_v19 = vpop.permute.xlu1 %3991 }
0x1735   : > { %v4001_v36 = vsel %vm1474_vm6, %v3992_v19, 0  ;;  %6507 = vmatprep.subr.msk.bf16.mxu1 %vm1474_vm6, %v3992_v19 }
0x1736   : > { %6341 = vmatpush3.bf16.msra.mxu1 %v4001_v36 }
0x1737   : > { %v6835_v22 = vpop.eup %6834 }
0x1738   : > { %v3908_v42 = vsel %vm1392_vm5, %v6835_v22, 0.0  ;;  %v6837_v28 = vpop.eup %6836 }
0x1739   : > { %3909 = vadd.xlane.f32.xlu1 %v3908_v42  ;;  %v3902_v4 = vsel %vm1392_vm5, %v6837_v28, 0.0  ;;  %v6839_v51 = vpop.eup %6838 }
0x173a   : > { %4055 = vrot.lane.b32.xlu0 %v7786_v10, %s8404_s27  ;;  %v3905_v40 = vsel %vm1392_vm5, %v6839_v51, 0.0 }
0x173d   : > { %3903 = vadd.xlane.f32.xlu1 %v3902_v4 }
0x174e   : > { %4123 = vrot.lane.b32.xlu1 %v7796_v55, %s8404_s27 }
0x1752   : > { %4053 = vrot.lane.b32.xlu1 %v7792_v15, %s8405_s3 }
0x1756   : > { %4119 = vrot.lane.b32.xlu1 %v7796_v55, %s8405_s3 }
0x1759   : > { %3906 = vadd.xlane.f32.xlu0 %v3905_v40 }
0x176f   : > { %4057 = vrot.lane.b32.xlu0 %v7792_v15, %s8404_s27 }
0x1773   : > { %4051 = vrot.lane.b32.xlu0 %v7786_v10, %s8405_s3 }
0x1777   : > { %4125 = vrot.lane.b32.xlu0 %v7798_v7, %s8404_s27  ;;  %s8409_s27 = smov 40  }
0x177b   : > { %4121 = vrot.lane.b32.xlu0 %v7798_v7, %s8405_s3  ;;  %s8410_s3 = smov 8  }
0x17ad   : > { %v3901_v41 = vpop.xlane.xlu0 %3900 }
0x17ae   : > { %6840 = vrcp.f32 %v3901_v41 }
0x17b1   : > { %v3898_v57 = vpop.xlane.xlu1 %3897  ;;  %v3895_v58 = vpop.xlane.xlu0 %3894 }
0x17b2   : > { %6842 = vrcp.f32 %v3898_v57 }
0x17b3   : > { %6844 = vrcp.f32 %v3895_v58 }
0x17b5   : > { %v4056_v50 = vpop.permute.xlu0 %4055 }
0x17b6   : > { %6508 = vmatprep.subr.msk.bf16.mxu0 %vm1241_vm4, %v4056_v50  ;;  %v4066_v11 = vsel %vm1241_vm4, %v4056_v50, 0 }
0x17b8   : > { %v6841_v26 = vpop.eup %6840 }
0x17b9   : > { %v3919_v63 = vmul.f32 %v6841_v26, %v7937_v25 }
0x17bb   : > { %v3924_v6 = vpack.c.bf16 %v3919_v63, %v3919_v63 }
0x17bc   : > { %v6843_v44 = vpop.eup %6842 }
0x17bd   : > { %v6845_v52 = vpop.eup %6844  ;;  %v3918_v1 = vmul.f32 %v6843_v44, %v6833_v16 }
0x17be   : > { %v3917_v31 = vmul.f32 %v6845_v52, %v7941_v21 }
0x17c0   : > { %v3923_v2 = vpack.c.bf16 %v3918_v1, %v3917_v31 }
0x17c2   : > { %6334 = vmatprep.mubr.msk.bf16.mxu0 %vm1392_vm5, %v3923_v2 }
0x17c3   : > { %6335 = vmatmul.mubr.msk.bf16.vlgmr.msra.gmra.mrb[76].mxu0 %vm1392_vm5, %v3924_v6 }
0x17c4   : > { %6347 = vmatpush3.bf16.xpose.msra.mxu0 %v4066_v11 }
0x17c6   : > { %v3910_v48 = vpop.xlane.xlu1 %3909 }
0x17c7   : > { %6846 = vrcp.f32 %v3910_v48 }
0x17ca   : > { %v3904_v39 = vpop.xlane.xlu1 %3903 }
0x17cb   : > { %6848 = vrcp.f32 %v3904_v39 }
0x17ce   : > { %v4124_v12 = vpop.permute.xlu1 %4123 }
0x17cf   : > { %6510 = vmatprep.subr.msk.bf16.mxu1 %vm1241_vm4, %v4124_v12  ;;  %v4134_v23 = vsel %vm1241_vm4, %v4124_v12, 0 }
0x17d1   : > { %v6847_v17 = vpop.eup %6846 }
0x17d2   : > { %v3922_v3 = vmul.f32 %v6847_v17, %v6835_v22  ;;  %v4054_v33 = vpop.permute.xlu1 %4053 }
0x17d4   : > { %v3926_v60 = vpack.c.bf16 %v3922_v3, %v3922_v3 }
0x17d5   : > { %v6849_v16 = vpop.eup %6848 }
0x17d6   : > { %v3920_v13 = vmul.f32 %v6849_v16, %v6837_v28  ;;  %v4120_v9 = vpop.permute.xlu1 %4119 }
0x17e6   : > { %v3907_v18 = vpop.xlane.xlu0 %3906 }
0x17e7   : > { %6850 = vrcp.f32 %v3907_v18 }
0x17ea   : > { %v4058_v14 = vpop.permute.xlu0 %4057 }
0x17eb   : > { %v4069_v25 = vsel %vm1241_vm4, %v4058_v14, 0  ;;  %6509 = vmatprep.subr.msk.bf16.mxu0 %vm1241_vm4, %v4058_v14 }
0x17ec   : > { %6349 = vmatpush3.bf16.xpose.msra.mxu0 %v4069_v25 }
0x17ee   : > { %v4052_v21 = vpop.permute.xlu0 %4051 }
0x17ef   : > { %6350 = vmatprep.mubr.msk.bf16.mxu0 %vm1241_vm4, %v4052_v21 }
0x17f1   : > { %v6851_v37 = vpop.eup %6850 }
0x17f2   : > { %v3921_v35 = vmul.f32 %v6851_v37, %v6839_v51  ;;  %v4126_v29 = vpop.permute.xlu0 %4125 }
0x17f3   : > { %6351 = vmatmul.mubr.msk.bf16.vlgmr.msra.gmra.mrb[80].mxu0 %vm1241_vm4, %v4054_v33  ;;  %v4137_v30 = vsel %vm1241_vm4, %v4126_v29, 0 }
0x17f4   : > { %v3925_v45 = vpack.c.bf16 %v3921_v35, %v3920_v13 }
0x17f6   : > { %6342 = vmatprep.mubr.msk.bf16.mxu1 %vm1392_vm5, %v3925_v45  ;;  %v4122_v53 = vpop.permute.xlu0 %4121 }
0x17f7   : > { %6343 = vmatmul.mubr.msk.bf16.vlgmr.msra.gmra.mrb[84].mxu1 %vm1392_vm5, %v3926_v60 }
0x17f8   : > { %6355 = vmatpush3.bf16.xpose.msra.mxu1 %v4134_v23  ;;  %6358 = vmatprep.mubr.msk.bf16.mxu1 %vm1241_vm4, %v4120_v9 }
0x17f9   : > { %6511 = vmatprep.subr.msk.bf16.mxu1 %vm1241_vm4, %v4126_v29 }
0x1800   : > { %6357 = vmatpush3.bf16.xpose.msra.mxu1 %v4137_v30 }
0x1807   : > { %6359 = vmatmul.mubr.msk.bf16.vlgmr.msra.gmra.mrb[88].mxu1 %vm1241_vm4, %v4122_v53 }
0x1896   : > { %v7988_v54 = vpop.f32.mrb[76].mxu0 }
0x1897   : > { %v7990_v19 = vpop.f32.mrb[77].mxu0 }
0x1898   : > { %v6337_v36 = vpop.f32.mrb[78].mxu0 }
0x1899   : > { %v7992_v22 = vpop.f32.mrb[79].mxu0 }
0x189a   : > { %v6593_v42 = vpack.i.bf16 %v7992_v22, %v7990_v19 }
0x18c6   : > { %v6352_v28 = vpop.f32.mrb[80].mxu0 }
0x18c7   : > { %v4189_v4 = vmul.f32 0.35355338, %v6352_v28  ;;  %v4105_v61 = vpop.f32.mrb[81].mxu0 }
0x18c8   : > { %v4187_v5 = vmul.f32 0.35355338, %v4105_v61  ;;  %v6353_v51 = vpop.f32.mrb[82].mxu0 }
0x18c9   : > { %v4195_v40 = vadd.f32 %v7821_v46, %v4189_v4  ;;  %v4108_v41 = vpop.f32.mrb[83].mxu0 }
0x18ca   : > { %v4193_v57 = vadd.f32 %v7821_v46, %v4187_v5  ;;  %v4188_v58 = vmul.f32 0.35355338, %v4108_v41  ;;  %v7998_v50 = vpop.f32.mrb[84].mxu1 }
0x18cb   : > { %v8000_v26 = vpop.f32.mrb[85].mxu1  ;;  %v4205_v44 = vsel %vm1392_vm5, %v4195_v40, -inf }
0x18cc   : > { %v4194_v52 = vadd.f32 %v7821_v46, %v4188_v58  ;;  %v6608_v63 = vpack.i.bf16 %v8000_v26, %v7988_v54  ;;  %v6345_v1 = vpop.f32.mrb[86].mxu1  ;;  %4206 = vmax.xlane.f32.xlu0 %v4205_v44  ;;  %v4199_v31 = vsel %vm1392_vm5, %v4193_v57, -inf }
0x18cd   : > { %v8007_v2 = vpop.f32.mrb[87].mxu1  ;;  %4200 = vmax.xlane.f32.xlu1 %v4199_v31 }
0x18ce   : > { %v6623_v6 = vpack.i.bf16 %v7998_v50, %v8007_v2  ;;  %v4202_v11 = vsel %vm1392_vm5, %v4194_v52, -inf }
0x18d0   : > { %4203 = vmax.xlane.f32.xlu0 %v4202_v11 }
0x18da   : > { %v6360_v48 = vpop.f32.mrb[88].mxu1 }
0x18db   : > { %v4173_v39 = vpop.f32.mrb[89].mxu1  ;;  %v4192_v12 = vmul.f32 0.35355338, %v6360_v48 }
0x18dc   : > { %v4190_v18 = vmul.f32 0.35355338, %v4173_v39  ;;  %v6361_v14 = vpop.f32.mrb[90].mxu1 }
0x18dd   : > { %v4176_v25 = vpop.f32.mrb[91].mxu1  ;;  %v4198_v16 = vadd.f32 %v7832_v47, %v4192_v12 }
0x18de   : > { %v4196_v17 = vadd.f32 %v7832_v47, %v4190_v18  ;;  %v4191_v21 = vmul.f32 0.35355338, %v4176_v25 }
0x18df   : > { %v4214_v13 = vsel %vm1392_vm5, %v4198_v16, -inf }
0x18e0   : > { %v8015_v37 = vadd.f32 %v7832_v47, %v4191_v21  ;;  %v4208_v3 = vsel %vm1392_vm5, %v4196_v17, -inf }
0x18e1   : > { %4209 = vmax.xlane.f32.xlu1 %v4208_v3 }
0x18e2   : > { %v4211_v33 = vsel %vm1392_vm5, %v8015_v37, -inf }
0x18e3   : > { %4212 = vmax.xlane.f32.xlu0 %v4211_v33 }
0x18e5   : > { %4215 = vmax.xlane.f32.xlu1 %v4214_v13 }
0x18f6   : > { %4271 = vrot.lane.b32.xlu1 %v7792_v15, %s8406_s1 }
0x18f9   : > { %4269 = vrot.lane.b32.xlu0 %v7786_v10, %s8406_s1 }
0x18fa   : > { %4331 = vrot.lane.b32.xlu1 %v7796_v55, %s8406_s1 }
0x18fe   : > { %4333 = vrot.lane.b32.xlu1 %v7798_v7, %s8406_s1  ;;  %s8411_s1 = smov 16  }
0x1959   : > { %v4207_v35 = vpop.xlane.xlu0 %4206 }
0x195a   : > { %v4219_v45 = vsub.f32 %v4195_v40, %v4207_v35  ;;  %v4201_v60 = vpop.xlane.xlu1 %4200 }
0x195b   : > { %v4217_v23 = vsub.f32 %v4193_v57, %v4201_v60 }
0x195c   : > { %v4227_v9 = vmul.f32 1.442695, %v4219_v45 }
0x195d   : > { %v4223_v29 = vmul.f32 1.442695, %v4217_v23  ;;  %v4204_v30 = vpop.xlane.xlu0 %4203 }
0x195e   : > { %6852 = vpow2.f32 %v4227_v9  ;;  %v4218_v53 = vsub.f32 %v4194_v52, %v4204_v30 }
0x195f   : > { %6854 = vpow2.f32 %v4223_v29 }
0x1960   : > { %v4225_v36 = vmul.f32 1.442695, %v4218_v53 }
0x1962   : > { %6856 = vpow2.f32 %v4225_v36 }
0x1968   : > { %v8029_v28 = vpop.eup %6852 }
0x1969   : > { %v4241_v4 = vsel %vm1392_vm5, %v8029_v28, 0.0  ;;  %v8033_v61 = vpop.eup %6854 }
0x196a   : > { %4242 = vadd.xlane.f32.xlu0 %v4241_v4  ;;  %v4235_v51 = vsel %vm1392_vm5, %v8033_v61, 0.0 }
0x196c   : > { %v6857_v5 = vpop.eup %6856 }
0x196d   : > { %v4238_v40 = vsel %vm1392_vm5, %v6857_v5, 0.0 }
0x196e   : > { %v4210_v41 = vpop.xlane.xlu1 %4209  ;;  %4236 = vadd.xlane.f32.xlu0 %v4235_v51  ;;  %4239 = vadd.xlane.f32.xlu1 %v4238_v40 }
0x196f   : > { %v4220_v58 = vsub.f32 %v4196_v17, %v4210_v41 }
0x1970   : > { %v4213_v57 = vpop.xlane.xlu0 %4212 }
0x1971   : > { %v4229_v31 = vmul.f32 1.442695, %v4220_v58  ;;  %v4221_v3 = vsub.f32 %v8015_v37, %v4213_v57 }
0x1972   : > { %v4216_v44 = vpop.xlane.xlu1 %4215 }
0x1973   : > { %v4222_v52 = vsub.f32 %v4198_v16, %v4216_v44  ;;  %v4231_v33 = vmul.f32 1.442695, %v4221_v3 }
0x1974   : > { %v4270_v1 = vpop.permute.xlu0 %4269 }
0x1975   : > { %v4233_v11 = vmul.f32 1.442695, %v4222_v52  ;;  %6362 = vmatprep.subr.bf16.mxu0 %v4270_v1 }
0x1976   : > { %v4272_v48 = vpop.permute.xlu1 %4271  ;;  %6363 = vmatpush3.bf16.msra.mxu0 %v4270_v1 }
0x1977   : > { %6858 = vpow2.f32 %v4233_v11  ;;  %6512 = vmatprep.subr.msk.bf16.mxu0 %vm1474_vm6, %v4272_v48  ;;  %v4281_v39 = vsel %vm1474_vm6, %v4272_v48, 0 }
0x1978   : > { %6860 = vpow2.f32 %v4229_v31 }
0x1979   : > { %6862 = vpow2.f32 %v4231_v33 }
0x197a   : > { %v4332_v12 = vpop.permute.xlu1 %4331  ;;  %6365 = vmatpush3.bf16.msra.mxu0 %v4281_v39 }
0x197b   : > { %6370 = vmatprep.subr.bf16.mxu1 %v4332_v12 }
0x197c   : > { %6371 = vmatpush3.bf16.msra.mxu1 %v4332_v12 }
0x197e   : > { %v4334_v18 = vpop.permute.xlu1 %4333 }
0x197f   : > { %v4343_v14 = vsel %vm1474_vm6, %v4334_v18, 0  ;;  %6513 = vmatprep.subr.msk.bf16.mxu1 %vm1474_vm6, %v4334_v18 }
0x1980   : > { %6373 = vmatpush3.bf16.msra.mxu1 %v4343_v14 }
0x1981   : > { %v6859_v25 = vpop.eup %6858 }
0x1982   : > { %v4250_v17 = vsel %vm1392_vm5, %v6859_v25, 0.0  ;;  %v6861_v21 = vpop.eup %6860 }
0x1983   : > { %4251 = vadd.xlane.f32.xlu1 %v4250_v17  ;;  %v4244_v16 = vsel %vm1392_vm5, %v6861_v21, 0.0  ;;  %v6863_v13 = vpop.eup %6862 }
0x1984   : > { %4397 = vrot.lane.b32.xlu0 %v7786_v10, %s8407_s26  ;;  %v4247_v35 = vsel %vm1392_vm5, %v6863_v13, 0.0 }
0x1987   : > { %4245 = vadd.xlane.f32.xlu1 %v4244_v16 }
0x1998   : > { %4465 = vrot.lane.b32.xlu1 %v7796_v55, %s8407_s26 }
0x199c   : > { %4395 = vrot.lane.b32.xlu1 %v7792_v15, %s8408_s24 }
0x19a0   : > { %4461 = vrot.lane.b32.xlu1 %v7796_v55, %s8408_s24 }
0x19a3   : > { %4248 = vadd.xlane.f32.xlu0 %v4247_v35 }
0x19b9   : > { %4399 = vrot.lane.b32.xlu0 %v7792_v15, %s8407_s26 }
0x19bd   : > { %4393 = vrot.lane.b32.xlu0 %v7786_v10, %s8408_s24 }
0x19c1   : > { %4467 = vrot.lane.b32.xlu0 %v7798_v7, %s8407_s26  ;;  %s8412_s26 = smov 24  }
0x19c5   : > { %4463 = vrot.lane.b32.xlu0 %v7798_v7, %s8408_s24  ;;  %s8415_s24 = sld [smem:[#allocation11_spill]] }
0x19f7   : > { %v4243_v37 = vpop.xlane.xlu0 %4242 }
0x19f8   : > { %6864 = vrcp.f32 %v4243_v37 }
0x19fb   : > { %v4240_v45 = vpop.xlane.xlu1 %4239  ;;  %v4237_v60 = vpop.xlane.xlu0 %4236 }
0x19fc   : > { %6866 = vrcp.f32 %v4240_v45 }
0x19fd   : > { %6868 = vrcp.f32 %v4237_v60 }
0x19ff   : > { %v4398_v23 = vpop.permute.xlu0 %4397 }
0x1a00   : > { %6514 = vmatprep.subr.msk.bf16.mxu0 %vm1241_vm4, %v4398_v23  ;;  %v4408_v41 = vsel %vm1241_vm4, %v4398_v23, 0 }
0x1a02   : > { %v6865_v9 = vpop.eup %6864 }
0x1a03   : > { %v4261_v53 = vmul.f32 %v6865_v9, %v8029_v28 }
0x1a05   : > { %v4266_v40 = vpack.c.bf16 %v4261_v53, %v4261_v53 }
0x1a06   : > { %v6867_v29 = vpop.eup %6866 }
0x1a07   : > { %v6869_v30 = vpop.eup %6868  ;;  %v4260_v36 = vmul.f32 %v6867_v29, %v6857_v5 }
0x1a08   : > { %v4259_v4 = vmul.f32 %v6869_v30, %v8033_v61 }
0x1a0a   : > { %v4265_v51 = vpack.c.bf16 %v4260_v36, %v4259_v4 }
0x1a0c   : > { %6366 = vmatprep.mubr.msk.bf16.mxu0 %vm1392_vm5, %v4265_v51 }
0x1a0d   : > { %6367 = vmatmul.mubr.msk.bf16.vlgmr.msra.gmra.mrb[84].mxu0 %vm1392_vm5, %v4266_v40 }
0x1a0e   : > { %6379 = vmatpush3.bf16.xpose.msra.mxu0 %v4408_v41 }
0x1a10   : > { %v4252_v57 = vpop.xlane.xlu1 %4251 }
0x1a11   : > { %6870 = vrcp.f32 %v4252_v57 }
0x1a14   : > { %v4246_v58 = vpop.xlane.xlu1 %4245 }
0x1a15   : > { %6872 = vrcp.f32 %v4246_v58 }
0x1a18   : > { %v4466_v44 = vpop.permute.xlu1 %4465 }
0x1a19   : > { %6516 = vmatprep.subr.msk.bf16.mxu1 %vm1241_vm4, %v4466_v44  ;;  %v4476_v16 = vsel %vm1241_vm4, %v4466_v44, 0 }
0x1a1b   : > { %v6871_v52 = vpop.eup %6870 }
0x1a1c   : > { %v4264_v48 = vmul.f32 %v6871_v52, %v6859_v25  ;;  %v4396_v39 = vpop.permute.xlu1 %4395 }
0x1a1e   : > { %v4268_v17 = vpack.c.bf16 %v4264_v48, %v4264_v48 }
0x1a1f   : > { %v6873_v31 = vpop.eup %6872 }
0x1a20   : > { %v4262_v12 = vmul.f32 %v6873_v31, %v6861_v21  ;;  %v4462_v3 = vpop.permute.xlu1 %4461 }
0x1a30   : > { %v4249_v28 = vpop.xlane.xlu0 %4248 }
0x1a31   : > { %6874 = vrcp.f32 %v4249_v28 }
0x1a34   : > { %v4400_v5 = vpop.permute.xlu0 %4399 }
0x1a35   : > { %v4411_v61 = vsel %vm1241_vm4, %v4400_v5, 0  ;;  %6515 = vmatprep.subr.msk.bf16.mxu0 %vm1241_vm4, %v4400_v5 }
0x1a36   : > { %6381 = vmatpush3.bf16.xpose.msra.mxu0 %v4411_v61 }
0x1a38   : > { %v4394_v1 = vpop.permute.xlu0 %4393 }
0x1a39   : > { %6382 = vmatprep.mubr.msk.bf16.mxu0 %vm1241_vm4, %v4394_v1 }
0x1a3b   : > { %v6875_v11 = vpop.eup %6874 }
0x1a3c   : > { %v4263_v18 = vmul.f32 %v6875_v11, %v6863_v13  ;;  %v4468_v33 = vpop.permute.xlu0 %4467 }
0x1a3d   : > { %6383 = vmatmul.mubr.msk.bf16.vlgmr.msra.gmra.mrb[88].mxu0 %vm1241_vm4, %v4396_v39  ;;  %v4479_v25 = vsel %vm1241_vm4, %v4468_v33, 0 }
0x1a3e   : > { %v4267_v14 = vpack.c.bf16 %v4263_v18, %v4262_v12 }
0x1a40   : > { %6374 = vmatprep.mubr.msk.bf16.mxu1 %vm1392_vm5, %v4267_v14  ;;  %v4464_v21 = vpop.permute.xlu0 %4463 }
0x1a41   : > { %6375 = vmatmul.mubr.msk.bf16.vlgmr.msra.gmra.mrb[92].mxu1 %vm1392_vm5, %v4268_v17 }
0x1a42   : > { %6387 = vmatpush3.bf16.xpose.msra.mxu1 %v4476_v16  ;;  %6390 = vmatprep.mubr.msk.bf16.mxu1 %vm1241_vm4, %v4462_v3 }
0x1a43   : > { %6517 = vmatprep.subr.msk.bf16.mxu1 %vm1241_vm4, %v4468_v33 }
0x1a4a   : > { %6389 = vmatpush3.bf16.xpose.msra.mxu1 %v4479_v25 }
0x1a51   : > { %6391 = vmatmul.mubr.msk.bf16.vlgmr.msra.gmra.mrb[96].mxu1 %vm1241_vm4, %v4464_v21 }
0x1ae0   : > { %v8080_v13 = vpop.f32.mrb[84].mxu0 }
0x1ae1   : > { %v8082_v35 = vpop.f32.mrb[85].mxu0 }
0x1ae2   : > { %v6369_v37 = vpop.f32.mrb[86].mxu0 }
0x1ae3   : > { %v8084_v45 = vpop.f32.mrb[87].mxu0 }
0x1ae4   : > { %v6598_v60 = vpack.i.bf16 %v8084_v45, %v8082_v35 }
0x1b10   : > { %v6384_v23 = vpop.f32.mrb[88].mxu0 }
0x1b11   : > { %v4447_v9 = vpop.f32.mrb[89].mxu0  ;;  %v4531_v36 = vmul.f32 0.35355338, %v6384_v23 }
0x1b12   : > { %v4529_v29 = vmul.f32 0.35355338, %v4447_v9  ;;  %v6385_v30 = vpop.f32.mrb[90].mxu0 }
0x1b13   : > { %v4450_v53 = vpop.f32.mrb[91].mxu0  ;;  %v4537_v61 = vadd.f32 %v7821_v46, %v4531_v36 }
0x1b14   : > { %v4535_v4 = vadd.f32 %v7821_v46, %v4529_v29  ;;  %v4530_v51 = vmul.f32 0.35355338, %v4450_v53  ;;  %v8089_v40 = vpop.f32.mrb[92].mxu1 }
0x1b15   : > { %v8091_v41 = vpop.f32.mrb[93].mxu1  ;;  %v4547_v31 = vsel %vm1392_vm5, %v4537_v61, -inf }
0x1b16   : > { %v4536_v57 = vadd.f32 %v7821_v46, %v4530_v51  ;;  %v6613_v58 = vpack.i.bf16 %v8091_v41, %v8080_v13  ;;  %v6377_v44 = vpop.f32.mrb[94].mxu1  ;;  %v4541_v28 = vsel %vm1392_vm5, %v4535_v4, -inf }
0x1b17   : > { %v8097_v5 = vpop.f32.mrb[95].mxu1  ;;  %4542 = vmax.xlane.f32.xlu1 %v4541_v28 }
0x1b18   : > { %v6628_v52 = vpack.i.bf16 %v8089_v40, %v8097_v5  ;;  %v4544_v1 = vsel %vm1392_vm5, %v4536_v57, -inf  ;;  %v8224_v5 = vld [vmem:[%s7648_s28 + $0x1] ss:$0 sm:$0xff] }
0x1b19   : > { %4545 = vmax.xlane.f32.xlu0 %v4544_v1 }
0x1b1d   : > { %4548 = vmax.xlane.f32.xlu0 %v4547_v31 }
0x1b24   : > { %v6392_v11 = vpop.f32.mrb[96].mxu1 }
0x1b25   : > { %v4515_v48 = vpop.f32.mrb[97].mxu1  ;;  %v4534_v39 = vmul.f32 0.35355338, %v6392_v11 }
0x1b26   : > { %v4532_v12 = vmul.f32 0.35355338, %v4515_v48  ;;  %v6393_v18 = vpop.f32.mrb[98].mxu1 }
0x1b27   : > { %v4518_v14 = vpop.f32.mrb[99].mxu1  ;;  %v4540_v46 = vadd.f32 %v7832_v47, %v4534_v39 }
0x1b28   : > { %v4538_v17 = vadd.f32 %v7832_v47, %v4532_v12  ;;  %v4533_v16 = vmul.f32 0.35355338, %v4518_v14 }
0x1b29   : > { %v4556_v21 = vsel %vm1392_vm5, %v4540_v46, -inf }
0x1b2a   : > { %v4539_v3 = vadd.f32 %v7832_v47, %v4533_v16  ;;  %v4550_v33 = vsel %vm1392_vm5, %v4538_v17, -inf }
0x1b2b   : > { %4551 = vmax.xlane.f32.xlu1 %v4550_v33 }
0x1b2c   : > { %v4553_v25 = vsel %vm1392_vm5, %v4539_v3, -inf }
0x1b2d   : > { %4554 = vmax.xlane.f32.xlu0 %v4553_v25 }
0x1b2f   : > { %4557 = vmax.xlane.f32.xlu1 %v4556_v21 }
0x1b40   : > { %4613 = vrot.lane.b32.xlu1 %v7792_v15, %s8409_s27 }
0x1ba4   : > { %v4543_v37 = vpop.xlane.xlu1 %4542 }
0x1ba5   : > { %v4559_v29 = vsub.f32 %v4535_v4, %v4543_v37 }
0x1ba6   : > { %v4546_v23 = vpop.xlane.xlu0 %4545 }
0x1ba7   : > { %v4560_v9 = vsub.f32 %v4536_v57, %v4546_v23  ;;  %v4565_v36 = vmul.f32 1.442695, %v4559_v29 }
0x1ba9   : > { %v4567_v30 = vmul.f32 1.442695, %v4560_v9 }
0x1baa   : > { %v4549_v53 = vpop.xlane.xlu0 %4548 }
0x1bab   : > { %6876 = vpow2.f32 %v4567_v30  ;;  %v4561_v47 = vsub.f32 %v4537_v61, %v4549_v53 }
0x1bad   : > { %v4569_v51 = vmul.f32 1.442695, %v4561_v47 }
0x1baf   : > { %6878 = vpow2.f32 %v4569_v51 }
0x1bb0   : > { %6880 = vpow2.f32 %v4565_v36 }
0x1bb5   : > { %v6877_v44 = vpop.eup %6876 }
0x1bb6   : > { %v4580_v28 = vsel %vm1392_vm5, %v6877_v44, 0.0 }
0x1bb7   : > { %4581 = vadd.xlane.f32.xlu1 %v4580_v28 }
0x1bb8   : > { %v4552_v1 = vpop.xlane.xlu1 %4551 }
0x1bb9   : > { %v6879_v31 = vpop.eup %6878  ;;  %v4562_v48 = vsub.f32 %v4538_v17, %v4552_v1 }
0x1bba   : > { %v4583_v15 = vsel %vm1392_vm5, %v6879_v31, 0.0  ;;  %v6881_v11 = vpop.eup %6880  ;;  %v4555_v17 = vpop.xlane.xlu0 %4554 }
0x1bbb   : > { %4584 = vadd.xlane.f32.xlu0 %v4583_v15  ;;  %v4577_v39 = vsel %vm1392_vm5, %v6881_v11, 0.0  ;;  %v4571_v61 = vmul.f32 1.442695, %v4562_v48 }
0x1bbc   : > { %v4558_v4 = vpop.xlane.xlu1 %4557 }
0x1bbd   : > { %v4564_v57 = vsub.f32 %v4540_v46, %v4558_v4  ;;  %v4563_v46 = vsub.f32 %v4539_v3, %v4555_v17  ;;  %v6650_v4 = vld [vmem:[%s7547_s23 + $0x10] sm:$0xff]  }
0x1bbf   : > { %v4575_v12 = vmul.f32 1.442695, %v4564_v57  ;;  %4578 = vadd.xlane.f32.xlu0 %v4577_v39  ;;  %v4573_v25 = vmul.f32 1.442695, %v4563_v46  ;;  %v6651_v57 = vld [vmem:[%s7547_s23 + $0x18] sm:$0xff]   ;;  %s5876_s23 = sshll.u32 %s8419_s25, 4 }
0x1bc1   : > { %6882 = vpow2.f32 %v4575_v12 }
0x1bc2   : > { %6884 = vpow2.f32 %v4571_v61 }
0x1bc3   : > { %6886 = vpow2.f32 %v4573_v25 }
0x1bcb   : > { %v6883_v18 = vpop.eup %6882 }
0x1bcc   : > { %v4592_v14 = vsel %vm1392_vm5, %v6883_v18, 0.0  ;;  %v6885_v16 = vpop.eup %6884 }
0x1bcd   : > { %4593 = vadd.xlane.f32.xlu1 %v4592_v14  ;;  %v4586_v33 = vsel %vm1392_vm5, %v6885_v16, 0.0  ;;  %v6887_v21 = vpop.eup %6886 }
0x1bce   : > { %v4589_v37 = vsel %vm1392_vm5, %v6887_v21, 0.0 }
0x1bd1   : > { %4587 = vadd.xlane.f32.xlu1 %v4586_v33 }
0x1bd5   : > { %4611 = vrot.lane.b32.xlu0 %v7786_v10, %s8409_s27  ;;  %v4614_v10 = vpop.permute.xlu1 %4613 }
0x1bd6   : > { %v4623_v45 = vsel %vm1474_vm6, %v4614_v10, 0 }
0x1be2   : > { %4673 = vrot.lane.b32.xlu1 %v7796_v55, %s8409_s27 }
0x1be6   : > { %6594 = vrot.lane.b32.xlu1 %v6593_v42, %s8410_s3 }
0x1bf4   : > { %4590 = vadd.xlane.f32.xlu0 %v4589_v37 }
0x1c0a   : > { %4675 = vrot.lane.b32.xlu0 %v7798_v7, %s8409_s27  ;;  %s928_s27 = scalar_lea.vmem %s8415_s24, %s7093_s5 }
0x1c0e   : > { %6599 = vrot.lane.b32.xlu0 %v6598_v60, %s8411_s1 }
0x1c12   : > { %6609 = vrot.lane.b32.xlu0 %v6608_v63, %s8410_s3 }
0x1c44   : > { %v4582_v55 = vpop.xlane.xlu1 %4581 }
0x1c48   : > { %v4585_v19 = vpop.xlane.xlu0 %4584 }
0x1c49   : > { %6888 = vrcp.f32 %v4585_v19 }
0x1c4a   : > { %6890 = vrcp.f32 %v4582_v55 }
0x1c4c   : > { %v4579_v22 = vpop.xlane.xlu0 %4578 }
0x1c4d   : > { %6892 = vrcp.f32 %v4579_v22 }
0x1c50   : > { %v4612_v42 = vpop.permute.xlu0 %4611 }
0x1c51   : > { %6394 = vmatprep.subr.bf16.mxu0 %v4612_v42 }
0x1c52   : > { %6395 = vmatpush3.bf16.msra.mxu0 %v4612_v42 }
0x1c53   : > { %6518 = vmatprep.subr.msk.bf16.mxu0 %vm1474_vm6, %v4614_v10  ;;  %v6889_v7 = vpop.eup %6888 }
0x1c54   : > { %v6891_v35 = vpop.eup %6890  ;;  %v4603_v54 = vmul.f32 %v6889_v7, %v6879_v31 }
0x1c55   : > { %v4602_v63 = vmul.f32 %v6891_v35, %v6877_v44 }
0x1c56   : > { %6397 = vmatpush3.bf16.msra.mxu0 %v4623_v45  ;;  %v4608_v9 = vpack.c.bf16 %v4603_v54, %v4603_v54 }
0x1c57   : > { %v6893_v60 = vpop.eup %6892  ;;  %6410 = vmatprep.subr.bf16.mxu0 %v6940_v0 }
0x1c58   : > { %v4601_v26 = vmul.f32 %v6893_v60, %v6881_v11 }
0x1c5a   : > { %v4594_v3 = vpop.xlane.xlu1 %4593  ;;  %v4607_v23 = vpack.c.bf16 %v4602_v63, %v4601_v26 }
0x1c5b   : > { %6894 = vrcp.f32 %v4594_v3 }
0x1c5c   : > { %6398 = vmatprep.mubr.msk.bf16.mxu0 %vm1392_vm5, %v4607_v23 }
0x1c5d   : > { %6399 = vmatmul.mubr.msk.bf16.vlgmr.msra.gmra.mrb[92].mxu0 %vm1392_vm5, %v4608_v9 }
0x1c5e   : > { %v4588_v29 = vpop.xlane.xlu1 %4587  ;;  %6414 = vmatprep.mubr.msk.bf16.mxu0 %vm6941_vm0, %v6940_v0  ;;  %6411 = vmatpush3.bf16.msra.mxu0 %v6650_v4 }
0x1c5f   : > { %6896 = vrcp.f32 %v4588_v29  ;;  %6412 = vmatprep.subr.bf16.mxu0 %v6940_v0 }
0x1c62   : > { %v4674_v30 = vpop.permute.xlu1 %4673  ;;  %6413 = vmatpush3.bf16.msra.mxu0 %v6651_v57 }
0x1c63   : > { %6402 = vmatprep.subr.bf16.mxu1 %v4674_v30  ;;  %6442 = vmatprep.subr.bf16.mxu0 %v6940_v0 }
0x1c64   : > { %6403 = vmatpush3.bf16.msra.mxu1 %v4674_v30 }
0x1c65   : > { %v6895_v51 = vpop.eup %6894 }
0x1c66   : > { %v4606_v1 = vmul.f32 %v6895_v51, %v6883_v18  ;;  %v6595_v37 = vpop.permute.xlu1 %6594 }
0x1c67   : > { %v6597_v55 = vunpack.i.h.bf16 %v6595_v37  ;;  %v6596_v19 = vunpack.i.l.bf16 %v6595_v37 }
0x1c68   : > { %v4610_v48 = vpack.c.bf16 %v4606_v1, %v4606_v1 }
0x1c69   : > { %v6897_v44 = vpop.eup %6896  ;;  %v4808_v41 = vsel %vm1241_vm4, %v7906_v43, %v6597_v55 }
0x1c6a   : > { %v4604_v31 = vmul.f32 %v6897_v44, %v6885_v16 }
0x1c81   : > { %v4591_v53 = vpop.xlane.xlu0 %4590 }
0x1c82   : > { %6898 = vrcp.f32 %v4591_v53 }
0x1c85   : > { %v4676_v47 = vpop.permute.xlu0 %4675 }
0x1c86   : > { %v4685_v36 = vsel %vm1474_vm6, %v4676_v47, 0  ;;  %6519 = vmatprep.subr.msk.bf16.mxu1 %vm1474_vm6, %v4676_v47 }
0x1c87   : > { %6405 = vmatpush3.bf16.msra.mxu1 %v4685_v36 }
0x1c88   : > { %6426 = vmatprep.subr.bf16.mxu1 %v6940_v0 }
0x1c89   : > { %v6600_v10 = vpop.permute.xlu0 %6599 }
0x1c8a   : > { %v6602_v22 = vunpack.i.h.bf16 %v6600_v10  ;;  %v6601_v42 = vunpack.i.l.bf16 %v6600_v10 }
0x1c8c   : > { %v6899_v28 = vpop.eup %6898  ;;  %v4814_v45 = vsel %vm2692_vm7, %v4808_v41, %v6602_v22 }
0x1c8d   : > { %v4605_v15 = vmul.f32 %v6899_v28, %v6887_v21  ;;  %v6610_v43 = vpop.permute.xlu0 %6609 }
0x1c8e   : > { %v6612_v23 = vunpack.i.h.bf16 %v6610_v43 }
0x1c8f   : > { %v4609_v11 = vpack.c.bf16 %v4605_v15, %v4604_v31 }
0x1c90   : > { %v4810_v53 = vsel %vm1241_vm4, %v7912_v34, %v6612_v23  ;;  %v8189_v34 = vld [vmem:[%s7605_s0 + $0x1] ss:$0 sm:$0xff]  ;;  %s8413_s0 = sld [smem:[#allocation7_spill]] }
0x1c91   : > { %6406 = vmatprep.mubr.msk.bf16.mxu1 %vm1392_vm5, %v4609_v11 }
0x1c92   : > { %6407 = vmatmul.mubr.msk.bf16.vlgmr.msra.gmra.mrb[100].mxu1 %vm1392_vm5, %v4610_v48 }
0x1c93   : > { %6430 = vmatprep.mubr.msk.bf16.mxu1 %vm6941_vm0, %v6940_v0 }
0x1d30   : > { %v6400_v39 = vpop.f32.mrb[92].mxu0 }
0x1d31   : > { %v4659_v61 = vpop.f32.mrb[93].mxu0 }
0x1d32   : > { %v6401_v12 = vpop.f32.mrb[94].mxu0 }
0x1d33   : > { %v4662_v18 = vpop.f32.mrb[95].mxu0 }
0x1d34   : > { %v6603_v14 = vpack.i.bf16 %v4662_v18, %v4659_v61 }
0x1d36   : > { %6604 = vrot.lane.b32.xlu1 %v6603_v14, %s8412_s26 }
0x1d3a   : > { %6614 = vrot.lane.b32.xlu1 %v6613_v58, %s8411_s1  ;;  %v4807_v58 = vsel %vm1241_vm4, %v7904_v20, %v6596_v19  ;;  %v6611_v20 = vunpack.i.l.bf16 %v6610_v43 }
0x1d3b   : > { %v4813_v60 = vsel %vm2692_vm7, %v4807_v58, %v6601_v42 }
0x1d3c   : > { %v4809_v47 = vsel %vm1241_vm4, %v7902_v32, %v6611_v20 }
0x1d65   : > { %v8159_v16 = vpop.f32.mrb[100].mxu1 }
0x1d66   : > { %v4721_v33 = vpop.f32.mrb[101].mxu1 }
0x1d67   : > { %v6618_v17 = vpack.i.bf16 %v4721_v33, %v6400_v39  ;;  %v6409_v46 = vpop.f32.mrb[102].mxu1 }
0x1d68   : > { %v8161_v25 = vpop.f32.mrb[103].mxu1 }
0x1d69   : > { %v6633_v21 = vpack.i.bf16 %v8159_v16, %v8161_v25  ;;  %6619 = vrot.lane.b32.xlu0 %v6618_v17, %s8412_s26 }
0x1da8   : > { %v6605_v13 = vpop.permute.xlu1 %6604 }
0x1da9   : > { %v6607_v7 = vunpack.i.h.bf16 %v6605_v13  ;;  %v6606_v35 = vunpack.i.l.bf16 %v6605_v13 }
0x1dab   : > { %v4819_v54 = vsel %vm1392_vm5, %v4813_v60, %v6606_v35  ;;  %v4820_v26 = vsel %vm1392_vm5, %v4814_v45, %v6607_v7 }
0x1dac   : > { %v4825_v63 = vpack.c.bf16 %v4820_v26, %v4819_v54  ;;  %v6615_v3 = vpop.permute.xlu1 %6614  ;;  %v6652_v54 = vld [vmem:[%s7632_s2 + $0x10] sm:$0xff]   ;;  %v6653_v26 = vld [vmem:[%s7632_s2 + $0x18] sm:$0xff]  }
0x1dad   : > { %v6617_v9 = vunpack.i.h.bf16 %v6615_v3  ;;  %v6616_v29 = vunpack.i.l.bf16 %v6615_v3  ;;  %6427 = vmatpush3.bf16.msra.mxu1 %v6652_v54  ;;  %v6654_v54 = vld [vmem:[%s7112_s19 + $0x20] sm:$0xff]  }
0x1dae   : > { %6415 = vmatmul.mubr.msk.bf16.vlgmr.msra.gmra.mrb[96].mxu0 %vm1164_vm3, %v4825_v63  ;;  %6428 = vmatprep.subr.bf16.mxu1 %v6940_v0 }
0x1daf   : > { %6418 = vmatprep.mubr.msk.bf16.mxu0 %vm6941_vm0, %v6940_v0  ;;  %v4815_v44 = vsel %vm2692_vm7, %v4809_v47, %v6616_v29  ;;  %v4816_v28 = vsel %vm2692_vm7, %v4810_v53, %v6617_v9  ;;  %6443 = vmatpush3.bf16.msra.mxu0 %v6654_v54 }
0x1db0   : > { %6444 = vmatprep.subr.bf16.mxu0 %v6940_v0 }
0x1db1   : > { %6429 = vmatpush3.bf16.msra.mxu1 %v6653_v26  ;;  %v6655_v26 = vld [vmem:[%s7112_s19 + $0x28] sm:$0xff]  }
0x1db2   : > { %6462 = vmatprep.subr.bf16.mxu1 %v6940_v0 }
0x1db3   : > { %6445 = vmatpush3.bf16.msra.mxu0 %v6655_v26 }
0x1db4   : > { %6446 = vmatprep.subr.bf16.mxu0 %v6940_v0 }
0x1ddb   : > { %v6620_v30 = vpop.permute.xlu0 %6619 }
0x1ddc   : > { %v6622_v36 = vunpack.i.h.bf16 %v6620_v30  ;;  %v6621_v51 = vunpack.i.l.bf16 %v6620_v30 }
0x1dde   : > { %v4821_v1 = vsel %vm1392_vm5, %v4815_v44, %v6621_v51  ;;  %v4822_v31 = vsel %vm1392_vm5, %v4816_v28, %v6622_v36 }
0x1ddf   : > { %v4826_v15 = vpack.c.bf16 %v4822_v31, %v4821_v1 }
0x1de1   : > { %6419 = vmatmul.mubr.msk.bf16.gmra.mrb[100].mxu0 %vm1164_vm3, %v4826_v15  ;;  %v8228_v15 = vld [vmem:[%s7655_s22 + $0x1] ss:$0 sm:$0xff] }
0x1de2   : > { %6422 = vmatprep.mubr.msk.bf16.mxu0 %vm6941_vm0, %v6940_v0 }
0x1e81   : > { %v4896_v11 = vpop.f32.mrb[96].mxu0 }
0x1e82   : > { %v4897_v32 = vadd.f32 %v8189_v34, %v4896_v11  ;;  %v6416_v48 = vpop.f32.mrb[97].mxu0 }
0x1e83   : > { %v4899_v4 = vpop.f32.mrb[98].mxu0 }
0x1e84   : > { %v4919_v57 = vadd.f32 %v4897_v32, %v7758_v59  ;;  %v4900_v39 = vadd.f32 %v8189_v34, %v4899_v4  ;;  %v6417_v61 = vpop.f32.mrb[99].mxu0 }
0x1e86   : > { %v4920_v12 = vadd.f32 %v4900_v39, %v7760_v56  ;;  %v4929_v18 = vsel %vm1164_vm3, %v4919_v57, 0.0 }
0x1e87   : > { %4930 = vadd.xlane.f32.xlu1 %v4929_v18 }
0x1e88   : > { %v4932_v14 = vsel %vm1164_vm3, %v4920_v12, 0.0 }
0x1e89   : > { %4933 = vadd.xlane.f32.xlu0 %v4932_v14 }
0x1eb4   : > { %v4904_v33 = vpop.f32.mrb[100].mxu0 }
0x1eb5   : > { %v4905_v17 = vadd.f32 %v8189_v34, %v4904_v33  ;;  %v6420_v46 = vpop.f32.mrb[101].mxu0 }
0x1eb6   : > { %v4907_v37 = vpop.f32.mrb[102].mxu0 }
0x1eb7   : > { %v4921_v10 = vadd.f32 %v4905_v17, %v7769_v24  ;;  %v4908_v59 = vadd.f32 %v8189_v34, %v4907_v37  ;;  %v6421_v55 = vpop.f32.mrb[103].mxu0 }
0x1eb9   : > { %v4922_v19 = vadd.f32 %v4908_v59, %v7771_v38  ;;  %v4935_v56 = vsel %vm1164_vm3, %v4921_v10, 0.0 }
0x1eba   : > { %4936 = vadd.xlane.f32.xlu0 %v4935_v56 }
0x1ebb   : > { %v4938_v22 = vsel %vm1164_vm3, %v4922_v19, 0.0 }
0x1ebc   : > { %4939 = vadd.xlane.f32.xlu1 %v4938_v22 }
0x1f14   : > { %v4931_v42 = vpop.xlane.xlu1 %4930 }
0x1f15   : > { %v4947_v13 = vmul.f32 0.03125, %v4931_v42 }
0x1f16   : > { %v4934_v41 = vpop.xlane.xlu0 %4933 }
0x1f17   : > { %v4953_v58 = vsub.f32 %v4919_v57, %v4947_v13  ;;  %v4948_v7 = vmul.f32 0.03125, %v4934_v41 }
0x1f19   : > { %v4954_v35 = vsub.f32 %v4920_v12, %v4948_v7  ;;  %v4959_v24 = vmul.f32 %v4953_v58, %v4953_v58 }
0x1f1b   : > { %v4965_v45 = vsel %vm1164_vm3, %v4959_v24, 0.0  ;;  %v4960_v60 = vmul.f32 %v4954_v35, %v4954_v35 }
0x1f1c   : > { %4966 = vadd.xlane.f32.xlu0 %v4965_v45 }
0x1f1d   : > { %v4968_v38 = vsel %vm1164_vm3, %v4960_v60, 0.0 }
0x1f1e   : > { %4969 = vadd.xlane.f32.xlu1 %v4968_v38 }
0x1f47   : > { %v4937_v63 = vpop.xlane.xlu0 %4936 }
0x1f48   : > { %v4949_v43 = vmul.f32 0.03125, %v4937_v63  ;;  %v6656_v63 = vld [vmem:[%s7112_s19 + $0x30] sm:$0xff]  }
0x1f49   : > { %v4940_v3 = vpop.xlane.xlu1 %4939  ;;  %6447 = vmatpush3.bf16.msra.mxu0 %v6656_v63 }
0x1f4a   : > { %v4955_v23 = vsub.f32 %v4921_v10, %v4949_v43  ;;  %v4950_v20 = vmul.f32 0.03125, %v4940_v3  ;;  %6448 = vmatprep.subr.bf16.mxu0 %v6940_v0  ;;  %v6657_v43 = vld [vmem:[%s7112_s19 + $0x38] sm:$0xff]   ;;  %v8268_v3 = vld [vmem:[%s7698_s4 + $0x1] ss:$0 sm:$0xff]  ;;  %s8414_s4 = sld [smem:[#allocation10_spill]] }
0x1f4c   : > { %v4956_v9 = vsub.f32 %v4922_v19, %v4950_v20  ;;  %v4961_v29 = vmul.f32 %v4955_v23, %v4955_v23 }
0x1f4d   : > { %6449 = vmatpush3.bf16.msra.mxu0 %v6657_v43 }
0x1f4e   : > { %v4971_v30 = vsel %vm1164_vm3, %v4961_v29, 0.0  ;;  %v4962_v53 = vmul.f32 %v4956_v9, %v4956_v9 }
0x1f4f   : > { %4972 = vadd.xlane.f32.xlu0 %v4971_v30 }
0x1f50   : > { %v4974_v47 = vsel %vm1164_vm3, %v4962_v53, 0.0 }
0x1f51   : > { %4975 = vadd.xlane.f32.xlu1 %v4974_v47 }
0x1f62   : > { %6629 = vrot.lane.b32.xlu1 %v6628_v52, %s8411_s1  ;;  %s8416_s1 = sld [smem:[#allocation12_spill]] }
0x1f65   : > { %6624 = vrot.lane.b32.xlu0 %v6623_v6, %s8410_s3 }
0x1f66   : > { %6634 = vrot.lane.b32.xlu1 %v6633_v21, %s8412_s26 }
0x1f68   : > { %s932_s26 = scalar_lea.vmem %s8416_s1, %s7093_s5 }
0x1fa9   : > { %v4967_v36 = vpop.xlane.xlu0 %4966 }
0x1faa   : > { %v4983_v51 = vmul.f32 0.03125, %v4967_v36 }
0x1fab   : > { %v4970_v44 = vpop.xlane.xlu1 %4969 }
0x1fac   : > { %v4989_v28 = vadd.f32 1e-05, %v4983_v51  ;;  %v4984_v1 = vmul.f32 0.03125, %v4970_v44 }
0x1fae   : > { %6900 = vrsqrt.f32 %v4989_v28  ;;  %v4990_v31 = vadd.f32 1e-05, %v4984_v1 }
0x1fb0   : > { %6902 = vrsqrt.f32 %v4990_v31 }
0x1fb8   : > { %v6901_v40 = vpop.eup %6900 }
0x1fb9   : > { %v5001_v52 = vmul.f32 %v6901_v40, %v4953_v58 }
0x1fba   : > { %v6903_v50 = vpop.eup %6902 }
0x1fbb   : > { %v5013_v2 = vmul.f32 %v8224_v5, %v5001_v52  ;;  %v5002_v6 = vmul.f32 %v6903_v50, %v4954_v35 }
0x1fbd   : > { %v5014_v16 = vmul.f32 %v8224_v5, %v5002_v6  ;;  %v8232_v25 = vadd.f32 %v8228_v15, %v5013_v2 }
0x1fbf   : > { %v5026_v21 = vadd.f32 %v8228_v15, %v5014_v16 }
0x1fc1   : > { %v5031_v11 = vpack.c.bf16 %v5026_v21, %v8232_v25 }
0x1fc3   : > { %6431 = vmatmul.mubr.msk.bf16.vlgmr.msra.gmra.mrb[104].mxu1 %vm1164_vm3, %v5031_v11 }
0x1fc4   : > { %6434 = vmatprep.mubr.msk.bf16.mxu1 %vm6941_vm0, %v6940_v0 }
0x1fdc   : > { %v4973_v32 = vpop.xlane.xlu0 %4972 }
0x1fdd   : > { %v4985_v48 = vmul.f32 0.03125, %v4973_v32 }
0x1fde   : > { %v4976_v4 = vpop.xlane.xlu1 %4975 }
0x1fdf   : > { %v4991_v57 = vadd.f32 1e-05, %v4985_v48  ;;  %v4986_v39 = vmul.f32 0.03125, %v4976_v4 }
0x1fe0   : > { %v6625_v61 = vpop.permute.xlu0 %6624 }
0x1fe1   : > { %6904 = vrsqrt.f32 %v4991_v57  ;;  %v4992_v12 = vadd.f32 1e-05, %v4986_v39  ;;  %v6627_v18 = vunpack.i.h.bf16 %v6625_v61  ;;  %v6626_v14 = vunpack.i.l.bf16 %v6625_v61 }
0x1fe2   : > { %v6630_v33 = vpop.permute.xlu1 %6629 }
0x1fe3   : > { %6906 = vrsqrt.f32 %v4992_v12  ;;  %v6632_v17 = vunpack.i.h.bf16 %v6630_v33  ;;  %v6631_v46 = vunpack.i.l.bf16 %v6630_v33  ;;  %v4812_v37 = vsel %vm1241_vm4, %v7910_v27, %v6627_v18 }
0x1fe4   : > { %v4811_v10 = vsel %vm1241_vm4, %v7917_v62, %v6626_v14 }
0x1fe5   : > { %v4818_v56 = vsel %vm2692_vm7, %v4812_v37, %v6632_v17  ;;  %v4817_v22 = vsel %vm2692_vm7, %v4811_v10, %v6631_v46 }
0x1fe6   : > { %v6635_v59 = vpop.permute.xlu1 %6634 }
0x1fe7   : > { %v6637_v55 = vunpack.i.h.bf16 %v6635_v59  ;;  %v6636_v19 = vunpack.i.l.bf16 %v6635_v59 }
0x1fe9   : > { %v4823_v42 = vsel %vm1392_vm5, %v4817_v22, %v6636_v19  ;;  %v4824_v13 = vsel %vm1392_vm5, %v4818_v56, %v6637_v55 }
0x1fea   : > { %v4827_v41 = vpack.c.bf16 %v4824_v13, %v4823_v42 }
0x1feb   : > { %v6905_v58 = vpop.eup %6904 }
0x1fec   : > { %v5003_v7 = vmul.f32 %v6905_v58, %v4955_v23  ;;  %6423 = vmatmul.mubr.msk.bf16.gmra.mrb[104].mxu0 %vm1164_vm3, %v4827_v41 }
0x1fed   : > { %v6907_v27 = vpop.eup %6906  ;;  %6450 = vmatprep.mubr.msk.bf16.mxu0 %vm6941_vm0, %v6940_v0 }
0x1fee   : > { %v5004_v62 = vmul.f32 %v6907_v27, %v4956_v9  ;;  %v5015_v35 = vmul.f32 %v8224_v5, %v5003_v7 }
0x1ff0   : > { %v5016_v24 = vmul.f32 %v8224_v5, %v5004_v62  ;;  %v5027_v45 = vadd.f32 %v8228_v15, %v5015_v35 }
0x1ff2   : > { %v8254_v60 = vadd.f32 %v8228_v15, %v5016_v24 }
0x1ff4   : > { %v5032_v38 = vpack.c.bf16 %v8254_v60, %v5027_v45 }
0x1ff6   : > { %6435 = vmatmul.mubr.msk.bf16.gmra.mrb[108].mxu1 %vm1164_vm3, %v5032_v38 }
0x1ff7   : > { %6438 = vmatprep.mubr.msk.bf16.mxu1 %vm6941_vm0, %v6940_v0 }
0x2096   : > { %v5102_v23 = vpop.f32.mrb[104].mxu1 }
0x2097   : > { %v5103_v20 = vadd.f32 %v8268_v3, %v5102_v23  ;;  %v6432_v9 = vpop.f32.mrb[105].mxu1 }
0x2098   : > { %v5105_v29 = vpop.f32.mrb[106].mxu1 }
0x2099   : > { %v5131_v30 = vmul.f32 0.044715, %v5103_v20  ;;  %v5106_v53 = vadd.f32 %v8268_v3, %v5105_v29  ;;  %v6433_v47 = vpop.f32.mrb[107].mxu1  ;;  %v5125_v21 = vmul.f32 0.5, %v5103_v20 }
0x209b   : > { %v5137_v36 = vmul.f32 %v5131_v30, %v5103_v20  ;;  %v5132_v51 = vmul.f32 0.044715, %v5106_v53  ;;  %v5126_v11 = vmul.f32 0.5, %v5106_v53 }
0x209d   : > { %v5143_v44 = vmul.f32 %v5137_v36, %v5103_v20  ;;  %v5138_v28 = vmul.f32 %v5132_v51, %v5106_v53 }
0x209f   : > { %v5149_v1 = vadd.f32 %v5143_v44, %v5103_v20  ;;  %v5144_v31 = vmul.f32 %v5138_v28, %v5106_v53 }
0x20a1   : > { %v5155_v40 = vmul.f32 0.7978846, %v5149_v1  ;;  %v5150_v52 = vadd.f32 %v5144_v31, %v5106_v53  ;;  %v5855_v31 = vld [vmem:[%s7712_s21 + $0x1] ss:$0 sm:$0xff]  ;;  %s924_s21 = scalar_lea.vmem %s8414_s4, %s5876_s23 }
0x20a3   : > { %6908 = vtanh.f32 %v5155_v40  ;;  %v5156_v50 = vmul.f32 0.7978846, %v5150_v52 }
0x20a5   : > { %6910 = vtanh.f32 %v5156_v50 }
0x20ad   : > { %v6909_v2 = vpop.eup %6908 }
0x20ae   : > { %v5167_v6 = vadd.f32 1.0, %v6909_v2 }
0x20af   : > { %v6911_v16 = vpop.eup %6910 }
0x20b0   : > { %v5168_v32 = vadd.f32 1.0, %v6911_v16  ;;  %v5173_v48 = vmul.f32 %v5167_v6, %v5125_v21 }
0x20b2   : > { %v5174_v4 = vmul.f32 %v5168_v32, %v5126_v11 }
0x20b4   : > { %v5179_v57 = vpack.c.bf16 %v5174_v4, %v5173_v48 }
0x20b6   : > { %6451 = vmatmul.mubr.msk.bf16.vlgmr.msra.gmra.mrb[108].mxu0 %vm3096_vm8, %v5179_v57 }
0x20b7   : > { %6454 = vmatprep.mubr.msk.bf16.mxu0 %vm6941_vm0, %v6940_v0 }
0x20bf   : > { %v4912_v39 = vpop.f32.mrb[104].mxu0 }
0x20c0   : > { %v4913_v61 = vadd.f32 %v8189_v34, %v4912_v39  ;;  %v6424_v12 = vpop.f32.mrb[105].mxu0 }
0x20c1   : > { %v4915_v18 = vpop.f32.mrb[106].mxu0 }
0x20c2   : > { %v4923_v14 = vadd.f32 %v4913_v61, %v7778_v49  ;;  %v4916_v33 = vadd.f32 %v8189_v34, %v4915_v18  ;;  %v6425_v17 = vpop.f32.mrb[107].mxu0 }
0x20c4   : > { %v4924_v46 = vadd.f32 %v4916_v33, %v7780_v8  ;;  %v4941_v37 = vsel %vm1164_vm3, %v4923_v14, 0.0 }
0x20c5   : > { %4942 = vadd.xlane.f32.xlu0 %v4941_v37 }
0x20c6   : > { %v4944_v10 = vsel %vm1164_vm3, %v4924_v46, 0.0 }
0x20c7   : > { %4945 = vadd.xlane.f32.xlu1 %v4944_v10 }
0x20c9   : > { %v5110_v59 = vpop.f32.mrb[108].mxu1 }
0x20ca   : > { %v5111_v55 = vadd.f32 %v8268_v3, %v5110_v59  ;;  %v6436_v19 = vpop.f32.mrb[109].mxu1 }
0x20cb   : > { %v5113_v56 = vpop.f32.mrb[110].mxu1 }
0x20cc   : > { %v5133_v22 = vmul.f32 0.044715, %v5111_v55  ;;  %v5114_v42 = vadd.f32 %v8268_v3, %v5113_v56  ;;  %v6437_v49 = vpop.f32.mrb[111].mxu1  ;;  %v5127_v54 = vmul.f32 0.5, %v5111_v55 }
0x20ce   : > { %v5139_v13 = vmul.f32 %v5133_v22, %v5111_v55  ;;  %v5134_v34 = vmul.f32 0.044715, %v5114_v42  ;;  %v5128_v26 = vmul.f32 0.5, %v5114_v42 }
0x20d0   : > { %v5145_v41 = vmul.f32 %v5139_v13, %v5111_v55  ;;  %v5140_v58 = vmul.f32 %v5134_v34, %v5114_v42 }
0x20d2   : > { %v5151_v8 = vadd.f32 %v5145_v41, %v5111_v55  ;;  %v5146_v7 = vmul.f32 %v5140_v58, %v5114_v42 }
0x20d4   : > { %v5157_v27 = vmul.f32 0.7978846, %v5151_v8  ;;  %v5152_v62 = vadd.f32 %v5146_v7, %v5114_v42 }
0x20d6   : > { %6912 = vtanh.f32 %v5157_v27  ;;  %v5158_v35 = vmul.f32 0.7978846, %v5152_v62  ;;  %v5333_v27 = vld [vmem:[%s8413_s0] sm:$0x3] }
0x20d7   : > { %v6658_v62 = vld [vmem:[%s924_s21] sm:$0xff]  }
0x20d8   : > { %6914 = vtanh.f32 %v5158_v35  ;;  %6463 = vmatpush3.bf16.msra.mxu1 %v6658_v62  ;;  %v6659_v35 = vld [vmem:[%s924_s21 + $0x8] sm:$0xff]  }
0x20d9   : > { %6464 = vmatprep.subr.bf16.mxu1 %v6940_v0 }
0x20dc   : > { %6465 = vmatpush3.bf16.msra.mxu1 %v6659_v35 }
0x20e0   : > { %v6913_v24 = vpop.eup %6912 }
0x20e1   : > { %v5169_v45 = vadd.f32 1.0, %v6913_v24 }
0x20e2   : > { %v6915_v38 = vpop.eup %6914 }
0x20e3   : > { %v5170_v63 = vadd.f32 1.0, %v6915_v38  ;;  %v5175_v43 = vmul.f32 %v5169_v45, %v5127_v54 }
0x20e5   : > { %v5176_v23 = vmul.f32 %v5170_v63, %v5128_v26 }
0x20e7   : > { %v5180_v20 = vpack.c.bf16 %v5176_v23, %v5175_v43 }
0x20e9   : > { %6455 = vmatmul.mubr.msk.bf16.gmra.mrb[112].mxu0 %vm3096_vm8, %v5180_v20 }
0x20ea   : > { %6458 = vmatprep.mubr.msk.bf16.mxu0 %vm6941_vm0, %v6940_v0 }
0x2152   : > { %v4943_v9 = vpop.xlane.xlu0 %4942 }
0x2153   : > { %v4951_v29 = vmul.f32 0.03125, %v4943_v9 }
0x2154   : > { %v4946_v30 = vpop.xlane.xlu1 %4945 }
0x2155   : > { %v4957_v53 = vsub.f32 %v4923_v14, %v4951_v29  ;;  %v4952_v47 = vmul.f32 0.03125, %v4946_v30 }
0x2157   : > { %v4958_v36 = vsub.f32 %v4924_v46, %v4952_v47  ;;  %v4963_v51 = vmul.f32 %v4957_v53, %v4957_v53 }
0x2159   : > { %v4977_v44 = vsel %vm1164_vm3, %v4963_v51, 0.0  ;;  %v4964_v28 = vmul.f32 %v4958_v36, %v4958_v36 }
0x215a   : > { %4978 = vadd.xlane.f32.xlu0 %v4977_v44 }
0x215b   : > { %v4980_v1 = vsel %vm1164_vm3, %v4964_v28, 0.0 }
0x215e   : > { %4981 = vadd.xlane.f32.xlu0 %v4980_v1 }
0x2189   : > { %v5266_v40 = vpop.f32.mrb[108].mxu0 }
0x218a   : > { %v5267_v52 = vadd.f32 %v5855_v31, %v5266_v40  ;;  %v6452_v50 = vpop.f32.mrb[109].mxu0 }
0x218b   : > { %v5269_v2 = vpop.f32.mrb[110].mxu0 }
0x218c   : > { %v5285_v6 = vadd.f32 %v5267_v52, %v8232_v25  ;;  %v6453_v16 = vpop.f32.mrb[111].mxu0 }
0x218e   : > { %v5291_v21 = vsel %vm1164_vm3, %v5285_v6, 0.0 }
0x218f   : > { %5292 = vadd.xlane.f32.xlu0 %v5291_v21 }
0x21bc   : > { %v5273_v11 = vpop.f32.mrb[112].mxu0 }
0x21bd   : > { %v6456_v32 = vpop.f32.mrb[113].mxu0 }
0x21be   : > { %v5275_v48 = vpop.f32.mrb[114].mxu0  ;;  %v5865_v32 = vld [vmem:[%s7748_s29 + $0x1] ss:$0 sm:$0xff] }
0x21bf   : > { %v5276_v4 = vadd.f32 %v5855_v31, %v5275_v48  ;;  %v6457_v57 = vpop.f32.mrb[115].mxu0 }
0x21c1   : > { %v5286_v39 = vadd.f32 %v5276_v4, %v8254_v60 }
0x21c3   : > { %v5294_v61 = vsel %vm1164_vm3, %v5286_v39, 0.0 }
0x21c4   : > { %5295 = vadd.xlane.f32.xlu1 %v5294_v61 }
0x21e7   : > { %v4979_v12 = vpop.xlane.xlu0 %4978 }
0x21e8   : > { %v4987_v18 = vmul.f32 0.03125, %v4979_v12  ;;  %v5866_v12 = vld [vmem:[%s7755_s6 + $0x1] ss:$0 sm:$0xff] }
0x21ea   : > { %v4993_v14 = vadd.f32 1e-05, %v4987_v18 }
0x21eb   : > { %v4982_v33 = vpop.xlane.xlu0 %4981 }
0x21ec   : > { %6916 = vrsqrt.f32 %v4993_v14  ;;  %v4988_v25 = vmul.f32 0.03125, %v4982_v33 }
0x21ee   : > { %v4994_v17 = vadd.f32 1e-05, %v4988_v25 }
0x21f0   : > { %6918 = vrsqrt.f32 %v4994_v17 }
0x21f6   : > { %v6917_v46 = vpop.eup %6916 }
0x21f7   : > { %v5005_v37 = vmul.f32 %v6917_v46, %v4957_v53 }
0x21f9   : > { %v5017_v55 = vmul.f32 %v8224_v5, %v5005_v37 }
0x21fa   : > { %v6919_v10 = vpop.eup %6918 }
0x21fb   : > { %v5006_v59 = vmul.f32 %v6919_v10, %v4958_v36  ;;  %v5029_v60 = vadd.f32 %v8228_v15, %v5017_v55 }
0x21fd   : > { %v5018_v19 = vmul.f32 %v8224_v5, %v5006_v59 }
0x21ff   : > { %v5030_v56 = vadd.f32 %v8228_v15, %v5018_v19 }
0x2201   : > { %v5033_v22 = vpack.c.bf16 %v5030_v56, %v5029_v60 }
0x2203   : > { %6439 = vmatmul.mubr.msk.bf16.gmra.mrb[112].mxu1 %vm1164_vm3, %v5033_v22 }
0x2204   : > { %6466 = vmatprep.mubr.msk.bf16.mxu1 %vm6941_vm0, %v6940_v0 }
0x221c   : > { %v5293_v42 = vpop.xlane.xlu0 %5292 }
0x221d   : > { %v5297_v49 = vmul.f32 0.03125, %v5293_v42 }
0x221f   : > { %v5299_v13 = vsub.f32 %v5285_v6, %v5297_v49 }
0x2221   : > { %v5301_v34 = vmul.f32 %v5299_v13, %v5299_v13 }
0x2223   : > { %v5303_v41 = vsel %vm1164_vm3, %v5301_v34, 0.0 }
0x2224   : > { %5304 = vadd.xlane.f32.xlu0 %v5303_v41 }
0x2251   : > { %v5296_v58 = vpop.xlane.xlu1 %5295 }
0x2252   : > { %v5298_v5 = vmul.f32 0.03125, %v5296_v58 }
0x2254   : > { %v5300_v8 = vsub.f32 %v5286_v39, %v5298_v5 }
0x2256   : > { %v5302_v7 = vmul.f32 %v5300_v8, %v5300_v8 }
0x2258   : > { %v5306_v15 = vsel %vm1164_vm3, %v5302_v7, 0.0 }
0x2259   : > { %5307 = vadd.xlane.f32.xlu1 %v5306_v15 }
0x226a   : > { %5336 = vperm.xlu1 %6547, %v5333_v27  }
0x22b1   : > { %v5305_v45 = vpop.xlane.xlu0 %5304 }
0x22b2   : > { %v5309_v20 = vmul.f32 0.03125, %v5305_v45 }
0x22b4   : > { %v5311_v47 = vadd.f32 1e-05, %v5309_v20 }
0x22b6   : > { %6920 = vrsqrt.f32 %v5311_v47 }
0x22d6   : > { %v5118_v24 = vpop.f32.mrb[112].mxu1 }
0x22d7   : > { %v5119_v38 = vadd.f32 %v8268_v3, %v5118_v24  ;;  %v6440_v54 = vpop.f32.mrb[113].mxu1 }
0x22d8   : > { %v5121_v26 = vpop.f32.mrb[114].mxu1 }
0x22d9   : > { %v5135_v63 = vmul.f32 0.044715, %v5119_v38  ;;  %v5122_v43 = vadd.f32 %v8268_v3, %v5121_v26  ;;  %v6441_v23 = vpop.f32.mrb[115].mxu1  ;;  %v6921_v3 = vpop.eup %6920  ;;  %v5129_v16 = vmul.f32 0.5, %v5119_v38 }
0x22da   : > { %v5315_v6 = vmul.f32 %v6921_v3, %v5299_v13 }
0x22db   : > { %v5141_v9 = vmul.f32 %v5135_v63, %v5119_v38  ;;  %v5136_v29 = vmul.f32 0.044715, %v5122_v43  ;;  %v5130_v21 = vmul.f32 0.5, %v5122_v43 }
0x22dc   : > { %v5323_v57 = vmul.f32 %v5865_v32, %v5315_v6 }
0x22dd   : > { %v5147_v30 = vmul.f32 %v5141_v9, %v5119_v38  ;;  %v5142_v53 = vmul.f32 %v5136_v29, %v5122_v43 }
0x22de   : > { %v5331_v25 = vadd.f32 %v5866_v12, %v5323_v57 }
0x22df   : > { %v5153_v36 = vadd.f32 %v5147_v30, %v5119_v38  ;;  %v5148_v0 = vmul.f32 %v5142_v53, %v5122_v43 }
0x22e1   : > { %v5159_v51 = vmul.f32 0.7978846, %v5153_v36  ;;  %v5154_v44 = vadd.f32 %v5148_v0, %v5122_v43 }
0x22e3   : > { %6922 = vtanh.f32 %v5159_v51  ;;  %v5160_v28 = vmul.f32 0.7978846, %v5154_v44 }
0x22e5   : > { %6924 = vtanh.f32 %v5160_v28 }
0x22e6   : > { %v5308_v1 = vpop.xlane.xlu1 %5307 }
0x22e7   : > { %v5310_v31 = vmul.f32 0.03125, %v5308_v1 }
0x22e9   : > { %v5312_v40 = vadd.f32 1e-05, %v5310_v31 }
0x22ea   : > { %v5337_v14 = vpop.permute.xlu1 %5336 }
0x22eb   : > { %6926 = vrsqrt.f32 %v5312_v40  ;;  %v5338_v46 = vrot.slane %v5337_v14, 1  ;;  %v5341_v37 = vmul.f32 %v5337_v14, %v5331_v25 }
0x22ed   : > { %v6923_v52 = vpop.eup %6922  ;;  %v5351_v55 = vpack.c.bf16 %v5341_v37, %v5341_v37 }
0x22ee   : > { %v5171_v50 = vadd.f32 1.0, %v6923_v52 }
0x22ef   : > { %v6925_v2 = vpop.eup %6924  ;;  %v5359_v22 = vunpack.c.l.b16 %v5351_v55 }
0x22f0   : > { %v5172_v11 = vadd.f32 1.0, %v6925_v2  ;;  %v5177_v48 = vmul.f32 %v5171_v50, %v5129_v16 }
0x22f2   : > { %v5178_v4 = vmul.f32 %v5172_v11, %v5130_v21 }
0x22f4   : > { %v5181_v39 = vpack.c.bf16 %v5178_v4, %v5177_v48 }
0x22f5   : > { %v6927_v61 = vpop.eup %6926 }
0x22f6   : > { %v5316_v18 = vmul.f32 %v6927_v61, %v5300_v8  ;;  %6459 = vmatmul.mubr.msk.bf16.gmra.mrb[116].mxu0 %vm3096_vm8, %v5181_v39 }
0x22f8   : > { %v5324_v33 = vmul.f32 %v5865_v32, %v5316_v18 }
0x22fa   : > { %v5332_v17 = vadd.f32 %v5866_v12, %v5324_v33 }
0x22fc   : > { %v5342_v10 = vmul.f32 %v5338_v46, %v5332_v17 }
0x22fe   : > { %v5345_v59 = vrot.slane %v5342_v10, 7  ;;  %v5352_v19 = vpack.c.bf16 %v5342_v10, %v5342_v10 }
0x2300   : > { %v5347_v60 = vsel %vm5346_vm9, %v5345_v59, %v5341_v37  ;;  %v5360_v56 = vunpack.c.l.b16 %v5352_v19 }
0x2301   : > { %5350 = vst.msk [vmem:[%s928_s27] sm:$0x3] %vm5349_vm10, %v5347_v60 }
0x2302   : > { %v5361_v42 = vrot.slane %v5360_v56, 7 }
0x2304   : > { %v5362_v49 = vsel %vm5346_vm9, %v5361_v42, %v5359_v22 }
0x2305   : > { %v5363_v13 = vpack.c.b16 %v5362_v49, %v5362_v49 }
0x2307   : > { %6467 = vmatmul.mubr.msk.bf16.vlgmr.msra.gmra.mrb[116].mxu1 %vm1164_vm3, %v5363_v13 }
0x23c9   : > { %v5280_v34 = vpop.f32.mrb[116].mxu0 }
0x23ca   : > { %v6460_v41 = vpop.f32.mrb[117].mxu0 }
0x23cb   : > { %v5282_v58 = vpop.f32.mrb[118].mxu0 }
0x23cc   : > { %v6461_v5 = vpop.f32.mrb[119].mxu0 }
0x23da   : > { %v5413_v8 = vpop.f32.mrb[116].mxu1 }
0x23db   : > { %5420 = vst.msk [vmem:[%s932_s26] sm:$0x3] %vm5419_vm11, %v5413_v8  ;;  %v6468_v7 = vpop.f32.mrb[117].mxu1 }
0x23dc   : > { %v5416_v15 = vpop.f32.mrb[118].mxu1 }
0x23dd   : > { %v6469_v27 = vpop.f32.mrb[119].mxu1 }
0x23de PF: > { %s8417_s19 = sld [smem:[#allocation2_spill]] }
0x23e4   : > { %s32_s2 = sadd.s32 1, %s8417_s19  }
0x23e5   : > { %p29_p4 = scmp.ge.s32.totalorder %s32_s2, 4  }
0x23e7   :  { %31 = sbr.rel (!%p29_p4) target bundleno = 11 (0xb), region = 199 }

</bundles_post_ra>
